<compile_context>
chip_gen: v6e
topology: v6e:2x2x1
jax: 0.10.0
libtpu: 0.0.40
codegen_flags: <defaults>
</compile_context>

<pallas_src>
import math
import functools

import jax
import jax.numpy as jnp
from jax import lax
from jax.experimental import pallas as pl
from jax.experimental.pallas import tpu as pltpu

BN_EPS = 1e-5
BN_SCALE = 1.0 / math.sqrt(1.0 + BN_EPS)  # eval-mode BN, default stats, identity affine


# --------------------------------------------------------------------------
# Furthest-point-sampling kernel: whole point cloud stays in VMEM, indices go
# to an SMEM output.  One call per encoder level (all batches unrolled, B=2).
# --------------------------------------------------------------------------
def _fps_kernel(xyz_ref, idx_ref, *, n, m, batch):
    for b in range(batch):
        idx_ref[b, 0] = jnp.int32(0)
        pts = xyz_ref[b]                                           # [N, 3]
        row_ids = lax.broadcasted_iota(jnp.int32, (n, 1), 0)

        def body(i, carry):
            dists, last = carry
            pt = xyz_ref[b, pl.ds(last, 1), :]                     # [1, 3] selected point
            diff = pts - pt
            d = jnp.sum(diff * diff, axis=1, keepdims=True)        # [N, 1]
            dists = jnp.minimum(dists, d)
            mx = jnp.max(dists)
            nxt = jnp.min(jnp.where(dists >= mx, row_ids, n)).astype(jnp.int32)
            idx_ref[b, i] = nxt                                    # SMEM scalar store
            return dists, nxt

        lax.fori_loop(1, m, body,
                      (jnp.full((n, 1), 1e10, jnp.float32), jnp.int32(0)))


def furthest_point_sample(xyz, m):
    """xyz: [B, N, 3] -> FPS indices [B, m] (int32), starting at point 0."""
    B, N, _ = xyz.shape
    kernel = functools.partial(_fps_kernel, n=N, m=m, batch=B)
    return pl.pallas_call(
        kernel,
        out_shape=jax.ShapeDtypeStruct((B, m), jnp.int32),
        out_specs=pl.BlockSpec(memory_space=pltpu.MemorySpace.SMEM),
    )(xyz)


# --------------------------------------------------------------------------
# Fused encoder-level kernel (single step, batch packed onto lanes)
# --------------------------------------------------------------------------
def _encoder_level_kernel(*refs, n_mlp, n_pts, n_knn, batch):
    graph_ref = refs[0]
    w_refs = refs[1:1 + n_mlp]
    wqkv_ref, bv_ref, wt_ref, bt_ref, out_ref = refs[1 + n_mlp:]

    # SharedMLP (1x1 conv + folded BN + ReLU) on the lane-dense [C0, k*B*M] graph
    x = graph_ref[...]
    for w_ref in w_refs:
        x = jnp.maximum(
            jnp.dot(w_ref[...], x, preferred_element_type=jnp.float32), 0.0)

    # EdgeConv neighbourhood max-pool: neighbour j is a contiguous B*M lane block
    bm = batch * n_pts
    feat = x[:, 0:bm]
    for j in range(1, n_knn):
        feat = jnp.maximum(feat, x[:, j * bm:(j + 1) * bm])        # [ch, B*M]

    ch = wt_ref.shape[0]
    # fused q/k + v projection: one matmul over the whole batch
    qkv = jnp.dot(wqkv_ref[...], feat, preferred_element_type=jnp.float32)  # [2ch, B*M]
    bv = bv_ref[...]

    # per-batch attention (M=16/32): unrolled, tiny
    mixed_parts = []
    for b in range(batch):
        lo = b * n_pts
        qk = qkv[0:ch, lo:lo + n_pts]                              # [ch, M]
        v = qkv[ch:2 * ch, lo:lo + n_pts] + bv                     # [ch, M]
        # energy = qk^T @ qk without materialising a transpose
        energy = lax.dot_general(qk, qk, (((0,), (0,)), ((), ())),
                                 preferred_element_type=jnp.float32)       # [M, M]
        energy = energy - jnp.max(energy, axis=-1, keepdims=True)
        p = jnp.exp(energy)
        attn = p * pl.reciprocal(jnp.sum(p, axis=-1, keepdims=True), approx=True)
        attn = attn / (1e-9 + jnp.sum(attn, axis=0, keepdims=True))        # exact renorm
        mixed_parts.append(jnp.dot(v, attn, preferred_element_type=jnp.float32))
    mixed = jnp.concatenate(mixed_parts, axis=-1) if batch > 1 else mixed_parts[0]

    # trans_conv + folded after_norm + ReLU + residual, batched over all lanes
    y = jnp.dot(wt_ref[...], feat - mixed,
                preferred_element_type=jnp.float32) + bt_ref[...]
    out_ref[...] = (feat + jnp.maximum(y, 0.0)).astype(out_ref.dtype)


def encoder_level(graph, mlp_ws, attn_p, n_pts, n_knn, batch):
    """graph: [C0, k*B*M] (neighbour-major, batch-packed); returns [ch, B*M]."""
    ch = mlp_ws[-1].shape[0]
    kernel = functools.partial(_encoder_level_kernel, n_mlp=len(mlp_ws),
                               n_pts=n_pts, n_knn=n_knn, batch=batch)
    return pl.pallas_call(
        kernel,
        out_shape=jax.ShapeDtypeStruct((ch, batch * n_pts), jnp.float32),
    )(graph, *mlp_ws, attn_p['Wqkv'], attn_p['bv'], attn_p['Wt'], attn_p['bt'])


# --------------------------------------------------------------------------
# Fused decoder-level kernel: upsample SharedConv + NetVLAD (single step)
# --------------------------------------------------------------------------
def _decoder_level_kernel(*refs, n_conv, n_pts, batch):
    x_ref = refs[0]
    w_refs = refs[1:1 + n_conv]
    cbn_ref, ca_ref, feat_ref, vlad_ref = refs[1 + n_conv:]

    x = x_ref[...]                                                 # [C_in, B*Nh]
    for w_ref in w_refs:                                           # banded conv + folded BN + ReLU
        x = jnp.maximum(
            jnp.dot(w_ref[...], x, preferred_element_type=jnp.float32), 0.0)
    feat_ref[...] = x.astype(feat_ref.dtype)                       # lane-dense [f, B*Nh]

    cbn = cbn_ref[...]                                             # center * BN_SCALE   [f, K]
    ca = ca_ref[...]                                               # center * cluster_a  [f, K]
    for b in range(batch):                                         # NetVLAD, per batch, unrolled
        xb = x[:, b * n_pts:(b + 1) * n_pts]                       # [f, Nh]
        act = lax.dot_general(xb, cbn, (((0,), (0,)), ((), ())),
                              preferred_element_type=jnp.float32)  # [Nh, K]
        act = act - jnp.max(act, axis=-1, keepdims=True)
        e = jnp.exp(act)
        act = e * pl.reciprocal(jnp.sum(e, axis=-1, keepdims=True), approx=True)
        a_sum = jnp.sum(act, axis=0, keepdims=True)                # [1, K]
        vlad = jnp.dot(xb, act, preferred_element_type=jnp.float32) - a_sum * ca
        inv = lax.rsqrt(jnp.maximum(jnp.sum(vlad * vlad, axis=0, keepdims=True), 1e-24))
        vlad_ref[b] = (vlad * inv).astype(vlad_ref.dtype)          # F.normalize(dim=1)


def decoder_level(x_packed, conv_mats, cbn, ca, n_pts, batch):
    """x_packed: [C_in, B*Nh] -> (features [f, B*Nh], vlad [B, f, K])."""
    C_in, L = x_packed.shape
    f = conv_mats[-1].shape[0]
    K = cbn.shape[1]
    kernel = functools.partial(_decoder_level_kernel, n_conv=len(conv_mats),
                               n_pts=n_pts, batch=batch)
    feat, vlad = pl.pallas_call(
        kernel,
        out_shape=(jax.ShapeDtypeStruct((f, L), jnp.float32),
                   jax.ShapeDtypeStruct((batch, f, K), jnp.float32)),
    )(x_packed, *conv_mats, cbn, ca)
    return feat, vlad


# --------------------------------------------------------------------------
# SharedConv (channel-strided conv) -> dense banded matrix (padding folded in)
# --------------------------------------------------------------------------
def calc_conv_para(ci, co, k):
    stride = max(math.ceil((ci - k) / (co - 1)), 1)
    if stride * (co - 1) > ci - k:
        padding = stride * (co - 1) - (ci - k)
    else:
        padding = 0
    return stride, padding


def shared_conv_geometry(ci, co, k):
    stride, padding = calc_conv_para(ci, co, k)
    if padding % 2 != 0:
        k = k + 1
        stride, padding = calc_conv_para(ci, co, k)
    return k, stride, padding // 2


def shared_conv_matrix(w, ci, co, stride, pad):
    """Dense banded matrix equivalent to the channel conv; pad columns trimmed."""
    k = w.shape[0]
    rows = jnp.arange(co)
    Wfull = jnp.zeros((co, ci + 2 * pad), jnp.float32)
    for j in range(k):
        Wfull = Wfull.at[rows, rows * stride + j].set(w[j])
    return Wfull[:, pad:pad + ci]


# --------------------------------------------------------------------------
# pointops glue kept in plain JAX (inside the jit)
# TODO(synk): kNN / gathers / 3-NN interpolation are data-dependent gathers with
# no clean Pallas block pattern at these sizes.
# --------------------------------------------------------------------------
def square_distance(a, b):
    return jnp.sum((a[:, :, None, :] - b[:, None, :, :]) ** 2, axis=-1)


def gather_features(features, idx):        # [B,C,N], [B,M] -> [B,C,M]
    return jax.vmap(lambda f, i: f[:, i])(features, idx)


def group_features(features, idx):         # [B,C,N], [B,M,k] -> [B,C,M,k]
    return jax.vmap(lambda f, i: f[:, i])(features, idx)


def knn_query(k, xyz, new_xyz):
    d2 = square_distance(new_xyz, xyz)
    _, idx = lax.top_k(-d2, k)
    return idx


def three_nn(H_xyz, L_xyz):
    d2 = square_distance(H_xyz, L_xyz)
    neg, idx = lax.top_k(-d2, 3)
    return -neg, idx                        # squared distances (pointops convention)


def three_interpolate(L_feat, idx, weight):
    grouped = group_features(L_feat, idx)   # [B, C, Nh, 3]
    return jnp.sum(grouped * weight[:, None, :, :], axis=-1)


def construct_graph(xyz, features, n_fps, n_knn):
    B = xyz.shape[0]
    center_idx = furthest_point_sample(xyz, n_fps)             # Pallas FPS kernel
    xyz_t = jnp.transpose(xyz, (0, 2, 1))                      # [B, 3, N]
    fps_xyz_t = gather_features(xyz_t, center_idx)             # [B, 3, M]
    fps_xyz = jnp.transpose(fps_xyz_t, (0, 2, 1))              # [B, M, 3]
    center_feat = gather_features(features, center_idx)        # [B, C, M]
    idx = knn_query(n_knn, xyz, fps_xyz)                       # [B, M, k]
    g_xyz = group_features(xyz_t, idx) - fps_xyz_t[..., None]  # [B, 3, M, k]
    g_feat = group_features(features, idx) - center_feat[..., None]
    graph = jnp.concatenate([g_xyz, g_feat], axis=1)           # [B, C0, M, k]
    C0 = graph.shape[1]
    # neighbour-major + batch-packed flatten -> [C0, k*B*M]
    graph = jnp.transpose(graph, (1, 3, 0, 2)).reshape(C0, n_knn * B * n_fps)
    return fps_xyz, graph


# --------------------------------------------------------------------------
# Network forward
# --------------------------------------------------------------------------
def network_forward(params, pc, args):
    n_levels = len(args['n_FPS'])
    B = pc.shape[0]
    all_feat = [jnp.transpose(pc, (0, 2, 1))]          # [B, 3, N]
    all_xyz = [pc]

    # encoder: FPS (Pallas) + kNN/gather glue + fused EdgeConv/attention kernel
    for i in range(n_levels):
        m = args['n_FPS'][i]
        fps_xyz, graph = construct_graph(all_xyz[i], all_feat[i], m, args['n_kNN'][i])
        all_xyz.append(fps_xyz)
        feat_packed = encoder_level(graph, params['edgeconv'][i], params['attention'][i],
                                    n_pts=m, n_knn=args['n_kNN'][i], batch=B)
        ch = feat_packed.shape[0]
        all_feat.append(jnp.transpose(feat_packed.reshape(ch, B, m), (1, 0, 2)))

    # decoder: 3-NN interpolation (plain JAX) + fused SharedConv/NetVLAD kernel
    for i in range(n_levels, 0, -1):
        dist, idx = three_nn(all_xyz[i - 1], all_xyz[i])
        dist_recip = 1.0 / (dist + 1e-8)
        weight = dist_recip / jnp.sum(dist_recip, axis=2, keepdims=True)
        interp = three_interpolate(all_feat[i], idx, weight)
        x = jnp.concatenate([interp, all_feat[i - 1]], axis=1)       # [B, C_in, Nh]
        C_in, Nh = x.shape[1], x.shape[2]
        x_packed = jnp.transpose(x, (1, 0, 2)).reshape(C_in, B * Nh)
        nv = params['netvlad'][i - 1]
        feat_packed, vlad = decoder_level(x_packed, params['upsample'][i - 1],
                                          nv['cbn'], nv['ca'], n_pts=Nh, batch=B)
        f = feat_packed.shape[0]
        K = nv['cbn'].shape[1]
        all_feat[i - 1] = jnp.transpose(feat_packed.reshape(f, B, Nh), (1, 0, 2))
        all_feat[i] = vlad.reshape(B, f * K)            # row-major flatten == torch .view

    global_descriptor = jnp.concatenate(all_feat[:0:-1], axis=-1)    # [B, G]
    # ContextGating: plain XLA GEMM (pre-transposed, BN-folded weight from init)
    return jnp.dot(global_descriptor, params['gate'])                # [B, opt_descriptor_dim]


# --------------------------------------------------------------------------
# Deterministic parameter initialisation (all folding done here, on the host)
# --------------------------------------------------------------------------
def init_params(key, args):
    keys = iter(jax.random.split(key, 64))
    nxt = lambda: next(keys)

    def uinit(k, shape, fan_in):
        bound = 1.0 / math.sqrt(fan_in)
        return jax.random.uniform(k, shape, jnp.float32, -bound, bound)

    n_levels = len(args['n_FPS'])
    params = {'edgeconv': [], 'attention': [], 'upsample': [], 'netvlad': []}

    # EdgeConv SharedMLP weights (channel BN folded in)
    for i in range(n_levels):
        dims = list(args['EdgeConv_mlp'][i])
        dims[0] += 3                                    # use_xyz
        params['edgeconv'].append(
            [uinit(nxt(), (dims[j + 1], dims[j]), dims[j]) * BN_SCALE
             for j in range(len(dims) - 1)])

    # attention: block-diagonal shared q/k weight stacked with Wv; after_norm folded
    for i in range(n_levels):
        ch = args['EdgeConv_mlp'][i][-1]
        gp = args['gp'][i]
        cs = ch // gp
        Wg = uinit(nxt(), (gp, cs, cs), cs)
        Wqk = jnp.zeros((ch, ch), jnp.float32)
        for g in range(gp):
            Wqk = Wqk.at[g * cs:(g + 1) * cs, g * cs:(g + 1) * cs].set(Wg[g])
        Wv = uinit(nxt(), (ch, ch), ch)
        bv = uinit(nxt(), (ch,), ch)
        Wt = uinit(nxt(), (ch, ch), ch)
        bt = uinit(nxt(), (ch,), ch)
        params['attention'].append(dict(
            Wqkv=jnp.concatenate([Wqk, Wv], axis=0),    # [2ch, ch] fused projection
            bv=bv.reshape(ch, 1),
            Wt=Wt * BN_SCALE,
            bt=(bt * BN_SCALE).reshape(ch, 1)))

    # upsample SharedConv banded matrices (channel BN folded)
    for i in range(n_levels):
        dims, kernels = args['upsample_mlp'][i]
        mats = []
        for j in range(len(kernels)):
            ci, co, k0 = dims[j], dims[j + 1], kernels[j]
            k_eff, stride, pad = shared_conv_geometry(ci, co, k0)
            w = uinit(nxt(), (k_eff,), k_eff)
            mats.append(shared_conv_matrix(w, ci, co, stride, pad) * BN_SCALE)
        params['upsample'].append(mats)

    # NetVLAD: BatchNorm1d(K) and cluster_a folded into two copies of the center
    g_dim = 0
    for i in range(n_levels):
        f = args['upsample_mlp'][i][0][-1]
        K = args['VLAD_cluster'][i]
        center = jax.random.normal(nxt(), (f, K), jnp.float32) / math.sqrt(f)
        cluster_a = jax.random.normal(nxt(), (), jnp.float32)
        params['netvlad'].append(dict(cbn=center * BN_SCALE, ca=center * cluster_a))
        g_dim += f * K

    # ContextGating banded conv: BN folded, pre-transposed for gd @ W
    out_dim = args['opt_descriptor_dim']
    k_eff, stride, pad = shared_conv_geometry(g_dim, out_dim, args['gate_conv'])
    wg = uinit(nxt(), (k_eff,), k_eff)
    params['gate'] = jnp.transpose(
        shared_conv_matrix(wg, g_dim, out_dim, stride, pad) * BN_SCALE)   # [G, out_dim]
    return params


# --------------------------------------------------------------------------
if __name__ == "__main__":
    args = {
        'n_FPS': [32, 16],
        'n_kNN': [8, 8],
        'gp': [2, 2],
        'EdgeConv_mlp': [[3, 16, 32], [32, 32, 32]],
        'EdgeConv_bn': 'channel',
        'upsample_mlp': [[[35, 32], [8]], [[64, 32], [8]]],
        'upsample_bn': 'channel',
        'VLAD_cluster': [8, 8],
        'VLADNet_ipt_size': [64, 32],
        'dropout': 0.0,
        'opt_descriptor_dim': 64,
        'gate_conv': 16,
    }

    key = jax.random.PRNGKey(0)
    k_pc, k_params = jax.random.split(key)
    B, N = 2, 64
    pc = jax.random.normal(k_pc, (B, N, 3), jnp.float32)

    params = init_params(k_params, args)
    forward = jax.jit(functools.partial(network_forward, args=args))
    out = jax.block_until_ready(forward(params, pc))

    assert out.shape == (B, args['opt_descriptor_dim']), out.shape
    assert bool(jnp.all(jnp.isfinite(out)))
    print("KERNEL_OK")
</pallas_src>

<mosaic_0001>
module attributes {stable_mosaic.version = 11 : i64} {
  func.func @_fps_kernel(%arg0: memref<2x64x3xf32, #tpu.memory_space<vmem>>, %arg1: memref<2x32xi32, #tpu.memory_space<smem>>) attributes {dimension_semantics = [], scalar_prefetch = 0 : i64, scratch_operands = 0 : i64, tpu.core_type = #tpu.core_type<tc>} {
    %c0_i32 = arith.constant 0 : i32
    %c0 = arith.constant 0 : index
    %c0_0 = arith.constant 0 : index
    %0 = memref.load %arg1[%c0, %c0_0] : memref<2x32xi32, #tpu.memory_space<smem>>
    memref.store %c0_i32, %arg1[%c0, %c0_0] : memref<2x32xi32, #tpu.memory_space<smem>>
    %c0_1 = arith.constant 0 : index
    %c0_2 = arith.constant 0 : index
    %c0_3 = arith.constant 0 : index
    %1 = vector.load %arg0[%c0_1, %c0_2, %c0_3] : memref<2x64x3xf32, #tpu.memory_space<vmem>>, vector<1x64x3xf32>
    %2 = vector.shape_cast %1 : vector<1x64x3xf32> to vector<64x3xf32>
    %3 = tpu.iota {dimensions = array<i32: 0>} : vector<64x1xi32>
    %cst = arith.constant 1.000000e+10 : f32
    %4 = vector.broadcast %cst : f32 to vector<64x1xf32>
    %c0_i32_4 = arith.constant 0 : i32
    %c1_i32 = arith.constant 1 : i32
    %c31_i32 = arith.constant 31 : i32
    %5 = arith.addi %c1_i32, %c31_i32 : i32
    %c1_i32_5 = arith.constant 1 : i32
    %6:2 = scf.for %arg2 = %c1_i32 to %5 step %c1_i32_5 iter_args(%arg3 = %4, %arg4 = %c0_i32_4) -> (vector<64x1xf32>, i32)  : i32 {
      %c0_18 = arith.constant 0 : index
      %14 = arith.index_cast %arg4 : i32 to index
      %c0_19 = arith.constant 0 : index
      %15 = vector.load %arg0[%c0_18, %14, %c0_19] : memref<2x64x3xf32, #tpu.memory_space<vmem>>, vector<1x1x3xf32>
      %16 = vector.shape_cast %15 : vector<1x1x3xf32> to vector<1x3xf32>
      %17 = vector.broadcast %16 : vector<1x3xf32> to vector<64x3xf32>
      %18 = arith.subf %2, %17 : vector<64x3xf32>
      %19 = arith.mulf %18, %18 : vector<64x3xf32>
      %cst_20 = arith.constant dense<0.000000e+00> : vector<64xf32>
      %20 = vector.multi_reduction <add>, %19, %cst_20 [1] : vector<64x3xf32> to vector<64xf32>
      %21 = vector.shape_cast %20 : vector<64xf32> to vector<64x1xf32>
      %22 = arith.minimumf %arg3, %21 : vector<64x1xf32>
      %23 = vector.shape_cast %22 : vector<64x1xf32> to vector<1x64x1xf32>
      %cst_21 = arith.constant dense<0xFF800000> : vector<1xf32>
      %24 = vector.multi_reduction <maximumf>, %23, %cst_21 [1, 2] : vector<1x64x1xf32> to vector<1xf32>
      %25 = vector.shape_cast %24 : vector<1xf32> to vector<1x1x1xf32>
      %26 = vector.extract %25[0, 0, 0] : f32 from vector<1x1x1xf32>
      %27 = vector.broadcast %26 : f32 to vector<64x1xf32>
      %28 = arith.cmpf oge, %22, %27 : vector<64x1xf32>
      %c64_i32 = arith.constant 64 : i32
      %29 = vector.broadcast %c64_i32 : i32 to vector<64x1xi32>
      %30 = arith.select %28, %3, %29 : vector<64x1xi1>, vector<64x1xi32>
      %31 = vector.shape_cast %30 : vector<64x1xi32> to vector<1x64x1xi32>
      %cst_22 = arith.constant dense<2147483647> : vector<1xi32>
      %32 = vector.multi_reduction <minsi>, %31, %cst_22 [1, 2] : vector<1x64x1xi32> to vector<1xi32>
      %33 = vector.shape_cast %32 : vector<1xi32> to vector<1x1x1xi32>
      %34 = vector.extract %33[0, 0, 0] : i32 from vector<1x1x1xi32>
      %c0_23 = arith.constant 0 : index
      %35 = arith.index_cast %arg2 : i32 to index
      %36 = memref.load %arg1[%c0_23, %35] : memref<2x32xi32, #tpu.memory_space<smem>>
      memref.store %34, %arg1[%c0_23, %35] : memref<2x32xi32, #tpu.memory_space<smem>>
      scf.yield %22, %34 : vector<64x1xf32>, i32
    }
    %c31_i32_6 = arith.constant 31 : i32
    %c0_i32_7 = arith.constant 0 : i32
    %c1 = arith.constant 1 : index
    %c0_8 = arith.constant 0 : index
    %7 = memref.load %arg1[%c1, %c0_8] : memref<2x32xi32, #tpu.memory_space<smem>>
    memref.store %c0_i32_7, %arg1[%c1, %c0_8] : memref<2x32xi32, #tpu.memory_space<smem>>
    %c1_9 = arith.constant 1 : index
    %c0_10 = arith.constant 0 : index
    %c0_11 = arith.constant 0 : index
    %8 = vector.load %arg0[%c1_9, %c0_10, %c0_11] : memref<2x64x3xf32, #tpu.memory_space<vmem>>, vector<1x64x3xf32>
    %9 = vector.shape_cast %8 : vector<1x64x3xf32> to vector<64x3xf32>
    %10 = tpu.iota {dimensions = array<i32: 0>} : vector<64x1xi32>
    %cst_12 = arith.constant 1.000000e+10 : f32
    %11 = vector.broadcast %cst_12 : f32 to vector<64x1xf32>
    %c0_i32_13 = arith.constant 0 : i32
    %c1_i32_14 = arith.constant 1 : i32
    %c31_i32_15 = arith.constant 31 : i32
    %12 = arith.addi %c1_i32_14, %c31_i32_15 : i32
    %c1_i32_16 = arith.constant 1 : i32
    %13:2 = scf.for %arg2 = %c1_i32_14 to %12 step %c1_i32_16 iter_args(%arg3 = %11, %arg4 = %c0_i32_13) -> (vector<64x1xf32>, i32)  : i32 {
      %c1_18 = arith.constant 1 : index
      %14 = arith.index_cast %arg4 : i32 to index
      %c0_19 = arith.constant 0 : index
      %15 = vector.load %arg0[%c1_18, %14, %c0_19] : memref<2x64x3xf32, #tpu.memory_space<vmem>>, vector<1x1x3xf32>
      %16 = vector.shape_cast %15 : vector<1x1x3xf32> to vector<1x3xf32>
      %17 = vector.broadcast %16 : vector<1x3xf32> to vector<64x3xf32>
      %18 = arith.subf %9, %17 : vector<64x3xf32>
      %19 = arith.mulf %18, %18 : vector<64x3xf32>
      %cst_20 = arith.constant dense<0.000000e+00> : vector<64xf32>
      %20 = vector.multi_reduction <add>, %19, %cst_20 [1] : vector<64x3xf32> to vector<64xf32>
      %21 = vector.shape_cast %20 : vector<64xf32> to vector<64x1xf32>
      %22 = arith.minimumf %arg3, %21 : vector<64x1xf32>
      %23 = vector.shape_cast %22 : vector<64x1xf32> to vector<1x64x1xf32>
      %cst_21 = arith.constant dense<0xFF800000> : vector<1xf32>
      %24 = vector.multi_reduction <maximumf>, %23, %cst_21 [1, 2] : vector<1x64x1xf32> to vector<1xf32>
      %25 = vector.shape_cast %24 : vector<1xf32> to vector<1x1x1xf32>
      %26 = vector.extract %25[0, 0, 0] : f32 from vector<1x1x1xf32>
      %27 = vector.broadcast %26 : f32 to vector<64x1xf32>
      %28 = arith.cmpf oge, %22, %27 : vector<64x1xf32>
      %c64_i32 = arith.constant 64 : i32
      %29 = vector.broadcast %c64_i32 : i32 to vector<64x1xi32>
      %30 = arith.select %28, %10, %29 : vector<64x1xi1>, vector<64x1xi32>
      %31 = vector.shape_cast %30 : vector<64x1xi32> to vector<1x64x1xi32>
      %cst_22 = arith.constant dense<2147483647> : vector<1xi32>
      %32 = vector.multi_reduction <minsi>, %31, %cst_22 [1, 2] : vector<1x64x1xi32> to vector<1xi32>
      %33 = vector.shape_cast %32 : vector<1xi32> to vector<1x1x1xi32>
      %34 = vector.extract %33[0, 0, 0] : i32 from vector<1x1x1xi32>
      %c1_23 = arith.constant 1 : index
      %35 = arith.index_cast %arg2 : i32 to index
      %36 = memref.load %arg1[%c1_23, %35] : memref<2x32xi32, #tpu.memory_space<smem>>
      memref.store %34, %arg1[%c1_23, %35] : memref<2x32xi32, #tpu.memory_space<smem>>
      scf.yield %22, %34 : vector<64x1xf32>, i32
    }
    %c31_i32_17 = arith.constant 31 : i32
    return
  }
}

module attributes {stable_mosaic.version = 11 : i64} {
  func.func @_fps_kernel(%arg0: memref<2x32x3xf32, #tpu.memory_space<vmem>>, %arg1: memref<2x16xi32, #tpu.memory_space<smem>>) attributes {dimension_semantics = [], scalar_prefetch = 0 : i64, scratch_operands = 0 : i64, tpu.core_type = #tpu.core_type<tc>} {
    %c0_i32 = arith.constant 0 : i32
    %c0 = arith.constant 0 : index
    %c0_0 = arith.constant 0 : index
    %0 = memref.load %arg1[%c0, %c0_0] : memref<2x16xi32, #tpu.memory_space<smem>>
    memref.store %c0_i32, %arg1[%c0, %c0_0] : memref<2x16xi32, #tpu.memory_space<smem>>
    %c0_1 = arith.constant 0 : index
    %c0_2 = arith.constant 0 : index
    %c0_3 = arith.constant 0 : index
    %1 = vector.load %arg0[%c0_1, %c0_2, %c0_3] : memref<2x32x3xf32, #tpu.memory_space<vmem>>, vector<1x32x3xf32>
    %2 = vector.shape_cast %1 : vector<1x32x3xf32> to vector<32x3xf32>
    %3 = tpu.iota {dimensions = array<i32: 0>} : vector<32x1xi32>
    %cst = arith.constant 1.000000e+10 : f32
    %4 = vector.broadcast %cst : f32 to vector<32x1xf32>
    %c0_i32_4 = arith.constant 0 : i32
    %c1_i32 = arith.constant 1 : i32
    %c15_i32 = arith.constant 15 : i32
    %5 = arith.addi %c1_i32, %c15_i32 : i32
    %c1_i32_5 = arith.constant 1 : i32
    %6:2 = scf.for %arg2 = %c1_i32 to %5 step %c1_i32_5 iter_args(%arg3 = %4, %arg4 = %c0_i32_4) -> (vector<32x1xf32>, i32)  : i32 {
      %c0_18 = arith.constant 0 : index
      %14 = arith.index_cast %arg4 : i32 to index
      %c0_19 = arith.constant 0 : index
      %15 = vector.load %arg0[%c0_18, %14, %c0_19] : memref<2x32x3xf32, #tpu.memory_space<vmem>>, vector<1x1x3xf32>
      %16 = vector.shape_cast %15 : vector<1x1x3xf32> to vector<1x3xf32>
      %17 = vector.broadcast %16 : vector<1x3xf32> to vector<32x3xf32>
      %18 = arith.subf %2, %17 : vector<32x3xf32>
      %19 = arith.mulf %18, %18 : vector<32x3xf32>
      %cst_20 = arith.constant dense<0.000000e+00> : vector<32xf32>
      %20 = vector.multi_reduction <add>, %19, %cst_20 [1] : vector<32x3xf32> to vector<32xf32>
      %21 = vector.shape_cast %20 : vector<32xf32> to vector<32x1xf32>
      %22 = arith.minimumf %arg3, %21 : vector<32x1xf32>
      %23 = vector.shape_cast %22 : vector<32x1xf32> to vector<1x32x1xf32>
      %cst_21 = arith.constant dense<0xFF800000> : vector<1xf32>
      %24 = vector.multi_reduction <maximumf>, %23, %cst_21 [1, 2] : vector<1x32x1xf32> to vector<1xf32>
      %25 = vector.shape_cast %24 : vector<1xf32> to vector<1x1x1xf32>
      %26 = vector.extract %25[0, 0, 0] : f32 from vector<1x1x1xf32>
      %27 = vector.broadcast %26 : f32 to vector<32x1xf32>
      %28 = arith.cmpf oge, %22, %27 : vector<32x1xf32>
      %c32_i32 = arith.constant 32 : i32
      %29 = vector.broadcast %c32_i32 : i32 to vector<32x1xi32>
      %30 = arith.select %28, %3, %29 : vector<32x1xi1>, vector<32x1xi32>
      %31 = vector.shape_cast %30 : vector<32x1xi32> to vector<1x32x1xi32>
      %cst_22 = arith.constant dense<2147483647> : vector<1xi32>
      %32 = vector.multi_reduction <minsi>, %31, %cst_22 [1, 2] : vector<1x32x1xi32> to vector<1xi32>
      %33 = vector.shape_cast %32 : vector<1xi32> to vector<1x1x1xi32>
      %34 = vector.extract %33[0, 0, 0] : i32 from vector<1x1x1xi32>
      %c0_23 = arith.constant 0 : index
      %35 = arith.index_cast %arg2 : i32 to index
      %36 = memref.load %arg1[%c0_23, %35] : memref<2x16xi32, #tpu.memory_space<smem>>
      memref.store %34, %arg1[%c0_23, %35] : memref<2x16xi32, #tpu.memory_space<smem>>
      scf.yield %22, %34 : vector<32x1xf32>, i32
    }
    %c15_i32_6 = arith.constant 15 : i32
    %c0_i32_7 = arith.constant 0 : i32
    %c1 = arith.constant 1 : index
    %c0_8 = arith.constant 0 : index
    %7 = memref.load %arg1[%c1, %c0_8] : memref<2x16xi32, #tpu.memory_space<smem>>
    memref.store %c0_i32_7, %arg1[%c1, %c0_8] : memref<2x16xi32, #tpu.memory_space<smem>>
    %c1_9 = arith.constant 1 : index
    %c0_10 = arith.constant 0 : index
    %c0_11 = arith.constant 0 : index
    %8 = vector.load %arg0[%c1_9, %c0_10, %c0_11] : memref<2x32x3xf32, #tpu.memory_space<vmem>>, vector<1x32x3xf32>
    %9 = vector.shape_cast %8 : vector<1x32x3xf32> to vector<32x3xf32>
    %10 = tpu.iota {dimensions = array<i32: 0>} : vector<32x1xi32>
    %cst_12 = arith.constant 1.000000e+10 : f32
    %11 = vector.broadcast %cst_12 : f32 to vector<32x1xf32>
    %c0_i32_13 = arith.constant 0 : i32
    %c1_i32_14 = arith.constant 1 : i32
    %c15_i32_15 = arith.constant 15 : i32
    %12 = arith.addi %c1_i32_14, %c15_i32_15 : i32
    %c1_i32_16 = arith.constant 1 : i32
    %13:2 = scf.for %arg2 = %c1_i32_14 to %12 step %c1_i32_16 iter_args(%arg3 = %11, %arg4 = %c0_i32_13) -> (vector<32x1xf32>, i32)  : i32 {
      %c1_18 = arith.constant 1 : index
      %14 = arith.index_cast %arg4 : i32 to index
      %c0_19 = arith.constant 0 : index
      %15 = vector.load %arg0[%c1_18, %14, %c0_19] : memref<2x32x3xf32, #tpu.memory_space<vmem>>, vector<1x1x3xf32>
      %16 = vector.shape_cast %15 : vector<1x1x3xf32> to vector<1x3xf32>
      %17 = vector.broadcast %16 : vector<1x3xf32> to vector<32x3xf32>
      %18 = arith.subf %9, %17 : vector<32x3xf32>
      %19 = arith.mulf %18, %18 : vector<32x3xf32>
      %cst_20 = arith.constant dense<0.000000e+00> : vector<32xf32>
      %20 = vector.multi_reduction <add>, %19, %cst_20 [1] : vector<32x3xf32> to vector<32xf32>
      %21 = vector.shape_cast %20 : vector<32xf32> to vector<32x1xf32>
      %22 = arith.minimumf %arg3, %21 : vector<32x1xf32>
      %23 = vector.shape_cast %22 : vector<32x1xf32> to vector<1x32x1xf32>
      %cst_21 = arith.constant dense<0xFF800000> : vector<1xf32>
      %24 = vector.multi_reduction <maximumf>, %23, %cst_21 [1, 2] : vector<1x32x1xf32> to vector<1xf32>
      %25 = vector.shape_cast %24 : vector<1xf32> to vector<1x1x1xf32>
      %26 = vector.extract %25[0, 0, 0] : f32 from vector<1x1x1xf32>
      %27 = vector.broadcast %26 : f32 to vector<32x1xf32>
      %28 = arith.cmpf oge, %22, %27 : vector<32x1xf32>
      %c32_i32 = arith.constant 32 : i32
      %29 = vector.broadcast %c32_i32 : i32 to vector<32x1xi32>
      %30 = arith.select %28, %10, %29 : vector<32x1xi1>, vector<32x1xi32>
      %31 = vector.shape_cast %30 : vector<32x1xi32> to vector<1x32x1xi32>
      %cst_22 = arith.constant dense<2147483647> : vector<1xi32>
      %32 = vector.multi_reduction <minsi>, %31, %cst_22 [1, 2] : vector<1x32x1xi32> to vector<1xi32>
      %33 = vector.shape_cast %32 : vector<1xi32> to vector<1x1x1xi32>
      %34 = vector.extract %33[0, 0, 0] : i32 from vector<1x1x1xi32>
      %c1_23 = arith.constant 1 : index
      %35 = arith.index_cast %arg2 : i32 to index
      %36 = memref.load %arg1[%c1_23, %35] : memref<2x16xi32, #tpu.memory_space<smem>>
      memref.store %34, %arg1[%c1_23, %35] : memref<2x16xi32, #tpu.memory_space<smem>>
      scf.yield %22, %34 : vector<32x1xf32>, i32
    }
    %c15_i32_17 = arith.constant 15 : i32
    return
  }
}

module attributes {stable_mosaic.version = 11 : i64} {
  func.func @_encoder_level_kernel(%arg0: memref<6x512xf32, #tpu.memory_space<vmem>>, %arg1: memref<16x6xf32, #tpu.memory_space<vmem>>, %arg2: memref<32x16xf32, #tpu.memory_space<vmem>>, %arg3: memref<64x32xf32, #tpu.memory_space<vmem>>, %arg4: memref<32x1xf32, #tpu.memory_space<vmem>>, %arg5: memref<32x32xf32, #tpu.memory_space<vmem>>, %arg6: memref<32x1xf32, #tpu.memory_space<vmem>>, %arg7: memref<32x64xf32, #tpu.memory_space<vmem>>) attributes {dimension_semantics = [], scalar_prefetch = 0 : i64, scratch_operands = 0 : i64, tpu.core_type = #tpu.core_type<tc>} {
    %c0 = arith.constant 0 : index
    %c0_0 = arith.constant 0 : index
    %0 = vector.load %arg0[%c0, %c0_0] : memref<6x512xf32, #tpu.memory_space<vmem>>, vector<6x512xf32>
    %c0_1 = arith.constant 0 : index
    %c0_2 = arith.constant 0 : index
    %1 = vector.load %arg1[%c0_1, %c0_2] : memref<16x6xf32, #tpu.memory_space<vmem>>, vector<16x6xf32>
    %cst = arith.constant dense<0.000000e+00> : vector<16x512xf32>
    %2 = tpu.matmul %1, %0, %cst {dimension_numbers = #tpu.dot_dimension_numbers<[1], [0], [0], [1], [0, 0, 1, 1], [], []>} : vector<16x6xf32>, vector<6x512xf32>, vector<16x512xf32> -> vector<16x512xf32>
    %cst_3 = arith.constant 0.000000e+00 : f32
    %3 = vector.broadcast %cst_3 : f32 to vector<16x512xf32>
    %4 = arith.maximumf %2, %3 : vector<16x512xf32>
    %c0_4 = arith.constant 0 : index
    %c0_5 = arith.constant 0 : index
    %5 = vector.load %arg2[%c0_4, %c0_5] : memref<32x16xf32, #tpu.memory_space<vmem>>, vector<32x16xf32>
    %cst_6 = arith.constant dense<0.000000e+00> : vector<32x512xf32>
    %6 = tpu.matmul %5, %4, %cst_6 {dimension_numbers = #tpu.dot_dimension_numbers<[1], [0], [0], [1], [0, 0, 1, 1], [], []>} : vector<32x16xf32>, vector<16x512xf32>, vector<32x512xf32> -> vector<32x512xf32>
    %cst_7 = arith.constant 0.000000e+00 : f32
    %7 = vector.broadcast %cst_7 : f32 to vector<32x512xf32>
    %8 = arith.maximumf %6, %7 : vector<32x512xf32>
    %9 = vector.extract_strided_slice %8 {offsets = [0, 0], sizes = [32, 64], strides = [1, 1]} : vector<32x512xf32> to vector<32x64xf32>
    %10 = vector.extract_strided_slice %8 {offsets = [0, 64], sizes = [32, 64], strides = [1, 1]} : vector<32x512xf32> to vector<32x64xf32>
    %11 = arith.maximumf %9, %10 : vector<32x64xf32>
    %12 = vector.extract_strided_slice %8 {offsets = [0, 128], sizes = [32, 64], strides = [1, 1]} : vector<32x512xf32> to vector<32x64xf32>
    %13 = arith.maximumf %11, %12 : vector<32x64xf32>
    %14 = vector.extract_strided_slice %8 {offsets = [0, 192], sizes = [32, 64], strides = [1, 1]} : vector<32x512xf32> to vector<32x64xf32>
    %15 = arith.maximumf %13, %14 : vector<32x64xf32>
    %16 = vector.extract_strided_slice %8 {offsets = [0, 256], sizes = [32, 64], strides = [1, 1]} : vector<32x512xf32> to vector<32x64xf32>
    %17 = arith.maximumf %15, %16 : vector<32x64xf32>
    %18 = vector.extract_strided_slice %8 {offsets = [0, 320], sizes = [32, 64], strides = [1, 1]} : vector<32x512xf32> to vector<32x64xf32>
    %19 = arith.maximumf %17, %18 : vector<32x64xf32>
    %20 = vector.extract_strided_slice %8 {offsets = [0, 384], sizes = [32, 64], strides = [1, 1]} : vector<32x512xf32> to vector<32x64xf32>
    %21 = arith.maximumf %19, %20 : vector<32x64xf32>
    %22 = vector.extract_strided_slice %8 {offsets = [0, 448], sizes = [32, 64], strides = [1, 1]} : vector<32x512xf32> to vector<32x64xf32>
    %23 = arith.maximumf %21, %22 : vector<32x64xf32>
    %c0_8 = arith.constant 0 : index
    %c0_9 = arith.constant 0 : index
    %24 = vector.load %arg3[%c0_8, %c0_9] : memref<64x32xf32, #tpu.memory_space<vmem>>, vector<64x32xf32>
    %cst_10 = arith.constant dense<0.000000e+00> : vector<64x64xf32>
    %25 = tpu.matmul %24, %23, %cst_10 {dimension_numbers = #tpu.dot_dimension_numbers<[1], [0], [0], [1], [0, 0, 1, 1], [], []>} : vector<64x32xf32>, vector<32x64xf32>, vector<64x64xf32> -> vector<64x64xf32>
    %c0_11 = arith.constant 0 : index
    %c0_12 = arith.constant 0 : index
    %26 = vector.load %arg4[%c0_11, %c0_12] : memref<32x1xf32, #tpu.memory_space<vmem>>, vector<32x1xf32>
    %27 = vector.extract_strided_slice %25 {offsets = [0, 0], sizes = [32, 32], strides = [1, 1]} : vector<64x64xf32> to vector<32x32xf32>
    %28 = vector.extract_strided_slice %25 {offsets = [32, 0], sizes = [32, 32], strides = [1, 1]} : vector<64x64xf32> to vector<32x32xf32>
    %29 = vector.broadcast %26 : vector<32x1xf32> to vector<32x32xf32>
    %30 = arith.addf %28, %29 : vector<32x32xf32>
    %cst_13 = arith.constant dense<0.000000e+00> : vector<32x32xf32>
    %31 = tpu.matmul %27, %27, %cst_13 {dimension_numbers = #tpu.dot_dimension_numbers<[0], [0], [1], [1], [0, 1, 1, 1], [], []>} : vector<32x32xf32>, vector<32x32xf32>, vector<32x32xf32> -> vector<32x32xf32>
    %cst_14 = arith.constant dense<0xFF800000> : vector<32xf32>
    %32 = vector.multi_reduction <maximumf>, %31, %cst_14 [1] : vector<32x32xf32> to vector<32xf32>
    %33 = vector.shape_cast %32 : vector<32xf32> to vector<32x1xf32>
    %34 = vector.broadcast %33 : vector<32x1xf32> to vector<32x32xf32>
    %35 = arith.subf %31, %34 : vector<32x32xf32>
    %36 = math.exp %35 : vector<32x32xf32>
    %cst_15 = arith.constant dense<0.000000e+00> : vector<32xf32>
    %37 = vector.multi_reduction <add>, %36, %cst_15 [1] : vector<32x32xf32> to vector<32xf32>
    %38 = vector.shape_cast %37 : vector<32xf32> to vector<32x1xf32>
    %39 = tpu.reciprocal %38 {approx = true} : vector<32x1xf32> -> vector<32x1xf32>
    %40 = vector.broadcast %39 : vector<32x1xf32> to vector<32x32xf32>
    %41 = arith.mulf %36, %40 : vector<32x32xf32>
    %cst_16 = arith.constant dense<0.000000e+00> : vector<32xf32>
    %42 = vector.multi_reduction <add>, %41, %cst_16 [0] : vector<32x32xf32> to vector<32xf32>
    %43 = vector.shape_cast %42 : vector<32xf32> to vector<1x32xf32>
    %cst_17 = arith.constant 9.99999971E-10 : f32
    %44 = vector.broadcast %cst_17 : f32 to vector<1x32xf32>
    %45 = arith.addf %44, %43 : vector<1x32xf32>
    %46 = vector.broadcast %45 : vector<1x32xf32> to vector<32x32xf32>
    %47 = arith.divf %41, %46 : vector<32x32xf32>
    %cst_18 = arith.constant dense<0.000000e+00> : vector<32x32xf32>
    %48 = tpu.matmul %30, %47, %cst_18 {dimension_numbers = #tpu.dot_dimension_numbers<[1], [0], [0], [1], [0, 0, 1, 1], [], []>} : vector<32x32xf32>, vector<32x32xf32>, vector<32x32xf32> -> vector<32x32xf32>
    %49 = vector.extract_strided_slice %25 {offsets = [0, 32], sizes = [32, 32], strides = [1, 1]} : vector<64x64xf32> to vector<32x32xf32>
    %50 = vector.extract_strided_slice %25 {offsets = [32, 32], sizes = [32, 32], strides = [1, 1]} : vector<64x64xf32> to vector<32x32xf32>
    %51 = vector.broadcast %26 : vector<32x1xf32> to vector<32x32xf32>
    %52 = arith.addf %50, %51 : vector<32x32xf32>
    %cst_19 = arith.constant dense<0.000000e+00> : vector<32x32xf32>
    %53 = tpu.matmul %49, %49, %cst_19 {dimension_numbers = #tpu.dot_dimension_numbers<[0], [0], [1], [1], [0, 1, 1, 1], [], []>} : vector<32x32xf32>, vector<32x32xf32>, vector<32x32xf32> -> vector<32x32xf32>
    %cst_20 = arith.constant dense<0xFF800000> : vector<32xf32>
    %54 = vector.multi_reduction <maximumf>, %53, %cst_20 [1] : vector<32x32xf32> to vector<32xf32>
    %55 = vector.shape_cast %54 : vector<32xf32> to vector<32x1xf32>
    %56 = vector.broadcast %55 : vector<32x1xf32> to vector<32x32xf32>
    %57 = arith.subf %53, %56 : vector<32x32xf32>
    %58 = math.exp %57 : vector<32x32xf32>
    %cst_21 = arith.constant dense<0.000000e+00> : vector<32xf32>
    %59 = vector.multi_reduction <add>, %58, %cst_21 [1] : vector<32x32xf32> to vector<32xf32>
    %60 = vector.shape_cast %59 : vector<32xf32> to vector<32x1xf32>
    %61 = tpu.reciprocal %60 {approx = true} : vector<32x1xf32> -> vector<32x1xf32>
    %62 = vector.broadcast %61 : vector<32x1xf32> to vector<32x32xf32>
    %63 = arith.mulf %58, %62 : vector<32x32xf32>
    %cst_22 = arith.constant dense<0.000000e+00> : vector<32xf32>
    %64 = vector.multi_reduction <add>, %63, %cst_22 [0] : vector<32x32xf32> to vector<32xf32>
    %65 = vector.shape_cast %64 : vector<32xf32> to vector<1x32xf32>
    %cst_23 = arith.constant 9.99999971E-10 : f32
    %66 = vector.broadcast %cst_23 : f32 to vector<1x32xf32>
    %67 = arith.addf %66, %65 : vector<1x32xf32>
    %68 = vector.broadcast %67 : vector<1x32xf32> to vector<32x32xf32>
    %69 = arith.divf %63, %68 : vector<32x32xf32>
    %cst_24 = arith.constant dense<0.000000e+00> : vector<32x32xf32>
    %70 = tpu.matmul %52, %69, %cst_24 {dimension_numbers = #tpu.dot_dimension_numbers<[1], [0], [0], [1], [0, 0, 1, 1], [], []>} : vector<32x32xf32>, vector<32x32xf32>, vector<32x32xf32> -> vector<32x32xf32>
    %71 = tpu.concatenate %48, %70 in 1 : vector<32x32xf32>, vector<32x32xf32> -> vector<32x64xf32>
    %c0_25 = arith.constant 0 : index
    %c0_26 = arith.constant 0 : index
    %72 = vector.load %arg5[%c0_25, %c0_26] : memref<32x32xf32, #tpu.memory_space<vmem>>, vector<32x32xf32>
    %73 = arith.subf %23, %71 : vector<32x64xf32>
    %cst_27 = arith.constant dense<0.000000e+00> : vector<32x64xf32>
    %74 = tpu.matmul %72, %73, %cst_27 {dimension_numbers = #tpu.dot_dimension_numbers<[1], [0], [0], [1], [0, 0, 1, 1], [], []>} : vector<32x32xf32>, vector<32x64xf32>, vector<32x64xf32> -> vector<32x64xf32>
    %c0_28 = arith.constant 0 : index
    %c0_29 = arith.constant 0 : index
    %75 = vector.load %arg6[%c0_28, %c0_29] : memref<32x1xf32, #tpu.memory_space<vmem>>, vector<32x1xf32>
    %76 = vector.broadcast %75 : vector<32x1xf32> to vector<32x64xf32>
    %77 = arith.addf %74, %76 : vector<32x64xf32>
    %cst_30 = arith.constant 0.000000e+00 : f32
    %78 = vector.broadcast %cst_30 : f32 to vector<32x64xf32>
    %79 = arith.maximumf %77, %78 : vector<32x64xf32>
    %80 = arith.addf %23, %79 : vector<32x64xf32>
    %c0_31 = arith.constant 0 : index
    %c0_32 = arith.constant 0 : index
    %81 = vector.load %arg7[%c0_31, %c0_32] : memref<32x64xf32, #tpu.memory_space<vmem>>, vector<32x64xf32>
    tpu.vector_store %arg7[%c0_31, %c0_32], %80 {strides = array<i32>} : memref<32x64xf32, #tpu.memory_space<vmem>>, vector<32x64xf32>,
    return
  }
}

module attributes {stable_mosaic.version = 11 : i64} {
  func.func @_encoder_level_kernel(%arg0: memref<35x256xf32, #tpu.memory_space<vmem>>, %arg1: memref<32x35xf32, #tpu.memory_space<vmem>>, %arg2: memref<32x32xf32, #tpu.memory_space<vmem>>, %arg3: memref<64x32xf32, #tpu.memory_space<vmem>>, %arg4: memref<32x1xf32, #tpu.memory_space<vmem>>, %arg5: memref<32x32xf32, #tpu.memory_space<vmem>>, %arg6: memref<32x1xf32, #tpu.memory_space<vmem>>, %arg7: memref<32x32xf32, #tpu.memory_space<vmem>>) attributes {dimension_semantics = [], scalar_prefetch = 0 : i64, scratch_operands = 0 : i64, tpu.core_type = #tpu.core_type<tc>} {
    %c0 = arith.constant 0 : index
    %c0_0 = arith.constant 0 : index
    %0 = vector.load %arg0[%c0, %c0_0] : memref<35x256xf32, #tpu.memory_space<vmem>>, vector<35x256xf32>
    %c0_1 = arith.constant 0 : index
    %c0_2 = arith.constant 0 : index
    %1 = vector.load %arg1[%c0_1, %c0_2] : memref<32x35xf32, #tpu.memory_space<vmem>>, vector<32x35xf32>
    %cst = arith.constant dense<0.000000e+00> : vector<32x256xf32>
    %2 = tpu.matmul %1, %0, %cst {dimension_numbers = #tpu.dot_dimension_numbers<[1], [0], [0], [1], [0, 0, 1, 1], [], []>} : vector<32x35xf32>, vector<35x256xf32>, vector<32x256xf32> -> vector<32x256xf32>
    %cst_3 = arith.constant 0.000000e+00 : f32
    %3 = vector.broadcast %cst_3 : f32 to vector<32x256xf32>
    %4 = arith.maximumf %2, %3 : vector<32x256xf32>
    %c0_4 = arith.constant 0 : index
    %c0_5 = arith.constant 0 : index
    %5 = vector.load %arg2[%c0_4, %c0_5] : memref<32x32xf32, #tpu.memory_space<vmem>>, vector<32x32xf32>
    %cst_6 = arith.constant dense<0.000000e+00> : vector<32x256xf32>
    %6 = tpu.matmul %5, %4, %cst_6 {dimension_numbers = #tpu.dot_dimension_numbers<[1], [0], [0], [1], [0, 0, 1, 1], [], []>} : vector<32x32xf32>, vector<32x256xf32>, vector<32x256xf32> -> vector<32x256xf32>
    %cst_7 = arith.constant 0.000000e+00 : f32
    %7 = vector.broadcast %cst_7 : f32 to vector<32x256xf32>
    %8 = arith.maximumf %6, %7 : vector<32x256xf32>
    %9 = vector.extract_strided_slice %8 {offsets = [0, 0], sizes = [32, 32], strides = [1, 1]} : vector<32x256xf32> to vector<32x32xf32>
    %10 = vector.extract_strided_slice %8 {offsets = [0, 32], sizes = [32, 32], strides = [1, 1]} : vector<32x256xf32> to vector<32x32xf32>
    %11 = arith.maximumf %9, %10 : vector<32x32xf32>
    %12 = vector.extract_strided_slice %8 {offsets = [0, 64], sizes = [32, 32], strides = [1, 1]} : vector<32x256xf32> to vector<32x32xf32>
    %13 = arith.maximumf %11, %12 : vector<32x32xf32>
    %14 = vector.extract_strided_slice %8 {offsets = [0, 96], sizes = [32, 32], strides = [1, 1]} : vector<32x256xf32> to vector<32x32xf32>
    %15 = arith.maximumf %13, %14 : vector<32x32xf32>
    %16 = vector.extract_strided_slice %8 {offsets = [0, 128], sizes = [32, 32], strides = [1, 1]} : vector<32x256xf32> to vector<32x32xf32>
    %17 = arith.maximumf %15, %16 : vector<32x32xf32>
    %18 = vector.extract_strided_slice %8 {offsets = [0, 160], sizes = [32, 32], strides = [1, 1]} : vector<32x256xf32> to vector<32x32xf32>
    %19 = arith.maximumf %17, %18 : vector<32x32xf32>
    %20 = vector.extract_strided_slice %8 {offsets = [0, 192], sizes = [32, 32], strides = [1, 1]} : vector<32x256xf32> to vector<32x32xf32>
    %21 = arith.maximumf %19, %20 : vector<32x32xf32>
    %22 = vector.extract_strided_slice %8 {offsets = [0, 224], sizes = [32, 32], strides = [1, 1]} : vector<32x256xf32> to vector<32x32xf32>
    %23 = arith.maximumf %21, %22 : vector<32x32xf32>
    %c0_8 = arith.constant 0 : index
    %c0_9 = arith.constant 0 : index
    %24 = vector.load %arg3[%c0_8, %c0_9] : memref<64x32xf32, #tpu.memory_space<vmem>>, vector<64x32xf32>
    %cst_10 = arith.constant dense<0.000000e+00> : vector<64x32xf32>
    %25 = tpu.matmul %24, %23, %cst_10 {dimension_numbers = #tpu.dot_dimension_numbers<[1], [0], [0], [1], [0, 0, 1, 1], [], []>} : vector<64x32xf32>, vector<32x32xf32>, vector<64x32xf32> -> vector<64x32xf32>
    %c0_11 = arith.constant 0 : index
    %c0_12 = arith.constant 0 : index
    %26 = vector.load %arg4[%c0_11, %c0_12] : memref<32x1xf32, #tpu.memory_space<vmem>>, vector<32x1xf32>
    %27 = vector.extract_strided_slice %25 {offsets = [0, 0], sizes = [32, 16], strides = [1, 1]} : vector<64x32xf32> to vector<32x16xf32>
    %28 = vector.extract_strided_slice %25 {offsets = [32, 0], sizes = [32, 16], strides = [1, 1]} : vector<64x32xf32> to vector<32x16xf32>
    %29 = vector.broadcast %26 : vector<32x1xf32> to vector<32x16xf32>
    %30 = arith.addf %28, %29 : vector<32x16xf32>
    %cst_13 = arith.constant dense<0.000000e+00> : vector<16x16xf32>
    %31 = tpu.matmul %27, %27, %cst_13 {dimension_numbers = #tpu.dot_dimension_numbers<[0], [0], [1], [1], [0, 1, 1, 1], [], []>} : vector<32x16xf32>, vector<32x16xf32>, vector<16x16xf32> -> vector<16x16xf32>
    %cst_14 = arith.constant dense<0xFF800000> : vector<16xf32>
    %32 = vector.multi_reduction <maximumf>, %31, %cst_14 [1] : vector<16x16xf32> to vector<16xf32>
    %33 = vector.shape_cast %32 : vector<16xf32> to vector<16x1xf32>
    %34 = vector.broadcast %33 : vector<16x1xf32> to vector<16x16xf32>
    %35 = arith.subf %31, %34 : vector<16x16xf32>
    %36 = math.exp %35 : vector<16x16xf32>
    %cst_15 = arith.constant dense<0.000000e+00> : vector<16xf32>
    %37 = vector.multi_reduction <add>, %36, %cst_15 [1] : vector<16x16xf32> to vector<16xf32>
    %38 = vector.shape_cast %37 : vector<16xf32> to vector<16x1xf32>
    %39 = tpu.reciprocal %38 {approx = true} : vector<16x1xf32> -> vector<16x1xf32>
    %40 = vector.broadcast %39 : vector<16x1xf32> to vector<16x16xf32>
    %41 = arith.mulf %36, %40 : vector<16x16xf32>
    %cst_16 = arith.constant dense<0.000000e+00> : vector<16xf32>
    %42 = vector.multi_reduction <add>, %41, %cst_16 [0] : vector<16x16xf32> to vector<16xf32>
    %43 = vector.shape_cast %42 : vector<16xf32> to vector<1x16xf32>
    %cst_17 = arith.constant 9.99999971E-10 : f32
    %44 = vector.broadcast %cst_17 : f32 to vector<1x16xf32>
    %45 = arith.addf %44, %43 : vector<1x16xf32>
    %46 = vector.broadcast %45 : vector<1x16xf32> to vector<16x16xf32>
    %47 = arith.divf %41, %46 : vector<16x16xf32>
    %cst_18 = arith.constant dense<0.000000e+00> : vector<32x16xf32>
    %48 = tpu.matmul %30, %47, %cst_18 {dimension_numbers = #tpu.dot_dimension_numbers<[1], [0], [0], [1], [0, 0, 1, 1], [], []>} : vector<32x16xf32>, vector<16x16xf32>, vector<32x16xf32> -> vector<32x16xf32>
    %49 = vector.extract_strided_slice %25 {offsets = [0, 16], sizes = [32, 16], strides = [1, 1]} : vector<64x32xf32> to vector<32x16xf32>
    %50 = vector.extract_strided_slice %25 {offsets = [32, 16], sizes = [32, 16], strides = [1, 1]} : vector<64x32xf32> to vector<32x16xf32>
    %51 = vector.broadcast %26 : vector<32x1xf32> to vector<32x16xf32>
    %52 = arith.addf %50, %51 : vector<32x16xf32>
    %cst_19 = arith.constant dense<0.000000e+00> : vector<16x16xf32>
    %53 = tpu.matmul %49, %49, %cst_19 {dimension_numbers = #tpu.dot_dimension_numbers<[0], [0], [1], [1], [0, 1, 1, 1], [], []>} : vector<32x16xf32>, vector<32x16xf32>, vector<16x16xf32> -> vector<16x16xf32>
    %cst_20 = arith.constant dense<0xFF800000> : vector<16xf32>
    %54 = vector.multi_reduction <maximumf>, %53, %cst_20 [1] : vector<16x16xf32> to vector<16xf32>
    %55 = vector.shape_cast %54 : vector<16xf32> to vector<16x1xf32>
    %56 = vector.broadcast %55 : vector<16x1xf32> to vector<16x16xf32>
    %57 = arith.subf %53, %56 : vector<16x16xf32>
    %58 = math.exp %57 : vector<16x16xf32>
    %cst_21 = arith.constant dense<0.000000e+00> : vector<16xf32>
    %59 = vector.multi_reduction <add>, %58, %cst_21 [1] : vector<16x16xf32> to vector<16xf32>
    %60 = vector.shape_cast %59 : vector<16xf32> to vector<16x1xf32>
    %61 = tpu.reciprocal %60 {approx = true} : vector<16x1xf32> -> vector<16x1xf32>
    %62 = vector.broadcast %61 : vector<16x1xf32> to vector<16x16xf32>
    %63 = arith.mulf %58, %62 : vector<16x16xf32>
    %cst_22 = arith.constant dense<0.000000e+00> : vector<16xf32>
    %64 = vector.multi_reduction <add>, %63, %cst_22 [0] : vector<16x16xf32> to vector<16xf32>
    %65 = vector.shape_cast %64 : vector<16xf32> to vector<1x16xf32>
    %cst_23 = arith.constant 9.99999971E-10 : f32
    %66 = vector.broadcast %cst_23 : f32 to vector<1x16xf32>
    %67 = arith.addf %66, %65 : vector<1x16xf32>
    %68 = vector.broadcast %67 : vector<1x16xf32> to vector<16x16xf32>
    %69 = arith.divf %63, %68 : vector<16x16xf32>
    %cst_24 = arith.constant dense<0.000000e+00> : vector<32x16xf32>
    %70 = tpu.matmul %52, %69, %cst_24 {dimension_numbers = #tpu.dot_dimension_numbers<[1], [0], [0], [1], [0, 0, 1, 1], [], []>} : vector<32x16xf32>, vector<16x16xf32>, vector<32x16xf32> -> vector<32x16xf32>
    %71 = tpu.concatenate %48, %70 in 1 : vector<32x16xf32>, vector<32x16xf32> -> vector<32x32xf32>
    %c0_25 = arith.constant 0 : index
    %c0_26 = arith.constant 0 : index
    %72 = vector.load %arg5[%c0_25, %c0_26] : memref<32x32xf32, #tpu.memory_space<vmem>>, vector<32x32xf32>
    %73 = arith.subf %23, %71 : vector<32x32xf32>
    %cst_27 = arith.constant dense<0.000000e+00> : vector<32x32xf32>
    %74 = tpu.matmul %72, %73, %cst_27 {dimension_numbers = #tpu.dot_dimension_numbers<[1], [0], [0], [1], [0, 0, 1, 1], [], []>} : vector<32x32xf32>, vector<32x32xf32>, vector<32x32xf32> -> vector<32x32xf32>
    %c0_28 = arith.constant 0 : index
    %c0_29 = arith.constant 0 : index
    %75 = vector.load %arg6[%c0_28, %c0_29] : memref<32x1xf32, #tpu.memory_space<vmem>>, vector<32x1xf32>
    %76 = vector.broadcast %75 : vector<32x1xf32> to vector<32x32xf32>
    %77 = arith.addf %74, %76 : vector<32x32xf32>
    %cst_30 = arith.constant 0.000000e+00 : f32
    %78 = vector.broadcast %cst_30 : f32 to vector<32x32xf32>
    %79 = arith.maximumf %77, %78 : vector<32x32xf32>
    %80 = arith.addf %23, %79 : vector<32x32xf32>
    %c0_31 = arith.constant 0 : index
    %c0_32 = arith.constant 0 : index
    %81 = vector.load %arg7[%c0_31, %c0_32] : memref<32x32xf32, #tpu.memory_space<vmem>>, vector<32x32xf32>
    tpu.vector_store %arg7[%c0_31, %c0_32], %80 {strides = array<i32>} : memref<32x32xf32, #tpu.memory_space<vmem>>, vector<32x32xf32>,
    return
  }
}

module attributes {stable_mosaic.version = 11 : i64} {
  func.func @_decoder_level_kernel(%arg0: memref<64x64xf32, #tpu.memory_space<vmem>>, %arg1: memref<32x64xf32, #tpu.memory_space<vmem>>, %arg2: memref<32x8xf32, #tpu.memory_space<vmem>>, %arg3: memref<32x8xf32, #tpu.memory_space<vmem>>, %arg4: memref<32x64xf32, #tpu.memory_space<vmem>>, %arg5: memref<2x32x8xf32, #tpu.memory_space<vmem>>) attributes {dimension_semantics = [], scalar_prefetch = 0 : i64, scratch_operands = 0 : i64, tpu.core_type = #tpu.core_type<tc>} {
    %c0 = arith.constant 0 : index
    %c0_0 = arith.constant 0 : index
    %0 = vector.load %arg0[%c0, %c0_0] : memref<64x64xf32, #tpu.memory_space<vmem>>, vector<64x64xf32>
    %c0_1 = arith.constant 0 : index
    %c0_2 = arith.constant 0 : index
    %1 = vector.load %arg1[%c0_1, %c0_2] : memref<32x64xf32, #tpu.memory_space<vmem>>, vector<32x64xf32>
    %cst = arith.constant dense<0.000000e+00> : vector<32x64xf32>
    %2 = tpu.matmul %1, %0, %cst {dimension_numbers = #tpu.dot_dimension_numbers<[1], [0], [0], [1], [0, 0, 1, 1], [], []>} : vector<32x64xf32>, vector<64x64xf32>, vector<32x64xf32> -> vector<32x64xf32>
    %cst_3 = arith.constant 0.000000e+00 : f32
    %3 = vector.broadcast %cst_3 : f32 to vector<32x64xf32>
    %4 = arith.maximumf %2, %3 : vector<32x64xf32>
    %c0_4 = arith.constant 0 : index
    %c0_5 = arith.constant 0 : index
    %5 = vector.load %arg4[%c0_4, %c0_5] : memref<32x64xf32, #tpu.memory_space<vmem>>, vector<32x64xf32>
    tpu.vector_store %arg4[%c0_4, %c0_5], %4 {strides = array<i32>} : memref<32x64xf32, #tpu.memory_space<vmem>>, vector<32x64xf32>,
    %c0_6 = arith.constant 0 : index
    %c0_7 = arith.constant 0 : index
    %6 = vector.load %arg2[%c0_6, %c0_7] : memref<32x8xf32, #tpu.memory_space<vmem>>, vector<32x8xf32>
    %c0_8 = arith.constant 0 : index
    %c0_9 = arith.constant 0 : index
    %7 = vector.load %arg3[%c0_8, %c0_9] : memref<32x8xf32, #tpu.memory_space<vmem>>, vector<32x8xf32>
    %8 = vector.extract_strided_slice %4 {offsets = [0, 0], sizes = [32, 32], strides = [1, 1]} : vector<32x64xf32> to vector<32x32xf32>
    %cst_10 = arith.constant dense<0.000000e+00> : vector<32x8xf32>
    %9 = tpu.matmul %8, %6, %cst_10 {dimension_numbers = #tpu.dot_dimension_numbers<[0], [0], [1], [1], [0, 1, 1, 1], [], []>} : vector<32x32xf32>, vector<32x8xf32>, vector<32x8xf32> -> vector<32x8xf32>
    %cst_11 = arith.constant dense<0xFF800000> : vector<32xf32>
    %10 = vector.multi_reduction <maximumf>, %9, %cst_11 [1] : vector<32x8xf32> to vector<32xf32>
    %11 = vector.shape_cast %10 : vector<32xf32> to vector<32x1xf32>
    %12 = vector.broadcast %11 : vector<32x1xf32> to vector<32x8xf32>
    %13 = arith.subf %9, %12 : vector<32x8xf32>
    %14 = math.exp %13 : vector<32x8xf32>
    %cst_12 = arith.constant dense<0.000000e+00> : vector<32xf32>
    %15 = vector.multi_reduction <add>, %14, %cst_12 [1] : vector<32x8xf32> to vector<32xf32>
    %16 = vector.shape_cast %15 : vector<32xf32> to vector<32x1xf32>
    %17 = tpu.reciprocal %16 {approx = true} : vector<32x1xf32> -> vector<32x1xf32>
    %18 = vector.broadcast %17 : vector<32x1xf32> to vector<32x8xf32>
    %19 = arith.mulf %14, %18 : vector<32x8xf32>
    %cst_13 = arith.constant dense<0.000000e+00> : vector<8xf32>
    %20 = vector.multi_reduction <add>, %19, %cst_13 [0] : vector<32x8xf32> to vector<8xf32>
    %21 = vector.shape_cast %20 : vector<8xf32> to vector<1x8xf32>
    %cst_14 = arith.constant dense<0.000000e+00> : vector<32x8xf32>
    %22 = tpu.matmul %8, %19, %cst_14 {dimension_numbers = #tpu.dot_dimension_numbers<[1], [0], [0], [1], [0, 0, 1, 1], [], []>} : vector<32x32xf32>, vector<32x8xf32>, vector<32x8xf32> -> vector<32x8xf32>
    %23 = vector.broadcast %21 : vector<1x8xf32> to vector<32x8xf32>
    %24 = arith.mulf %23, %7 : vector<32x8xf32>
    %25 = arith.subf %22, %24 : vector<32x8xf32>
    %26 = arith.mulf %25, %25 : vector<32x8xf32>
    %cst_15 = arith.constant dense<0.000000e+00> : vector<8xf32>
    %27 = vector.multi_reduction <add>, %26, %cst_15 [0] : vector<32x8xf32> to vector<8xf32>
    %28 = vector.shape_cast %27 : vector<8xf32> to vector<1x8xf32>
    %cst_16 = arith.constant 1.000000e-24 : f32
    %29 = vector.broadcast %cst_16 : f32 to vector<1x8xf32>
    %30 = arith.maximumf %28, %29 : vector<1x8xf32>
    %31 = math.rsqrt %30 : vector<1x8xf32>
    %32 = vector.broadcast %31 : vector<1x8xf32> to vector<32x8xf32>
    %33 = arith.mulf %25, %32 : vector<32x8xf32>
    %c0_17 = arith.constant 0 : index
    %c0_18 = arith.constant 0 : index
    %c0_19 = arith.constant 0 : index
    %34 = vector.load %arg5[%c0_17, %c0_18, %c0_19] : memref<2x32x8xf32, #tpu.memory_space<vmem>>, vector<1x32x8xf32>
    %35 = vector.shape_cast %34 : vector<1x32x8xf32> to vector<32x8xf32>
    %36 = vector.shape_cast %33 : vector<32x8xf32> to vector<1x32x8xf32>
    tpu.vector_store %arg5[%c0_17, %c0_18, %c0_19], %36 {strides = array<i32>} : memref<2x32x8xf32, #tpu.memory_space<vmem>>, vector<1x32x8xf32>,
    %37 = vector.extract_strided_slice %4 {offsets = [0, 32], sizes = [32, 32], strides = [1, 1]} : vector<32x64xf32> to vector<32x32xf32>
    %cst_20 = arith.constant dense<0.000000e+00> : vector<32x8xf32>
    %38 = tpu.matmul %37, %6, %cst_20 {dimension_numbers = #tpu.dot_dimension_numbers<[0], [0], [1], [1], [0, 1, 1, 1], [], []>} : vector<32x32xf32>, vector<32x8xf32>, vector<32x8xf32> -> vector<32x8xf32>
    %cst_21 = arith.constant dense<0xFF800000> : vector<32xf32>
    %39 = vector.multi_reduction <maximumf>, %38, %cst_21 [1] : vector<32x8xf32> to vector<32xf32>
    %40 = vector.shape_cast %39 : vector<32xf32> to vector<32x1xf32>
    %41 = vector.broadcast %40 : vector<32x1xf32> to vector<32x8xf32>
    %42 = arith.subf %38, %41 : vector<32x8xf32>
    %43 = math.exp %42 : vector<32x8xf32>
    %cst_22 = arith.constant dense<0.000000e+00> : vector<32xf32>
    %44 = vector.multi_reduction <add>, %43, %cst_22 [1] : vector<32x8xf32> to vector<32xf32>
    %45 = vector.shape_cast %44 : vector<32xf32> to vector<32x1xf32>
    %46 = tpu.reciprocal %45 {approx = true} : vector<32x1xf32> -> vector<32x1xf32>
    %47 = vector.broadcast %46 : vector<32x1xf32> to vector<32x8xf32>
    %48 = arith.mulf %43, %47 : vector<32x8xf32>
    %cst_23 = arith.constant dense<0.000000e+00> : vector<8xf32>
    %49 = vector.multi_reduction <add>, %48, %cst_23 [0] : vector<32x8xf32> to vector<8xf32>
    %50 = vector.shape_cast %49 : vector<8xf32> to vector<1x8xf32>
    %cst_24 = arith.constant dense<0.000000e+00> : vector<32x8xf32>
    %51 = tpu.matmul %37, %48, %cst_24 {dimension_numbers = #tpu.dot_dimension_numbers<[1], [0], [0], [1], [0, 0, 1, 1], [], []>} : vector<32x32xf32>, vector<32x8xf32>, vector<32x8xf32> -> vector<32x8xf32>
    %52 = vector.broadcast %50 : vector<1x8xf32> to vector<32x8xf32>
    %53 = arith.mulf %52, %7 : vector<32x8xf32>
    %54 = arith.subf %51, %53 : vector<32x8xf32>
    %55 = arith.mulf %54, %54 : vector<32x8xf32>
    %cst_25 = arith.constant dense<0.000000e+00> : vector<8xf32>
    %56 = vector.multi_reduction <add>, %55, %cst_25 [0] : vector<32x8xf32> to vector<8xf32>
    %57 = vector.shape_cast %56 : vector<8xf32> to vector<1x8xf32>
    %cst_26 = arith.constant 1.000000e-24 : f32
    %58 = vector.broadcast %cst_26 : f32 to vector<1x8xf32>
    %59 = arith.maximumf %57, %58 : vector<1x8xf32>
    %60 = math.rsqrt %59 : vector<1x8xf32>
    %61 = vector.broadcast %60 : vector<1x8xf32> to vector<32x8xf32>
    %62 = arith.mulf %54, %61 : vector<32x8xf32>
    %c1 = arith.constant 1 : index
    %c0_27 = arith.constant 0 : index
    %c0_28 = arith.constant 0 : index
    %63 = vector.load %arg5[%c1, %c0_27, %c0_28] : memref<2x32x8xf32, #tpu.memory_space<vmem>>, vector<1x32x8xf32>
    %64 = vector.shape_cast %63 : vector<1x32x8xf32> to vector<32x8xf32>
    %65 = vector.shape_cast %62 : vector<32x8xf32> to vector<1x32x8xf32>
    tpu.vector_store %arg5[%c1, %c0_27, %c0_28], %65 {strides = array<i32>} : memref<2x32x8xf32, #tpu.memory_space<vmem>>, vector<1x32x8xf32>,
    return
  }
}

module attributes {stable_mosaic.version = 11 : i64} {
  func.func @_decoder_level_kernel(%arg0: memref<35x128xf32, #tpu.memory_space<vmem>>, %arg1: memref<32x35xf32, #tpu.memory_space<vmem>>, %arg2: memref<32x8xf32, #tpu.memory_space<vmem>>, %arg3: memref<32x8xf32, #tpu.memory_space<vmem>>, %arg4: memref<32x128xf32, #tpu.memory_space<vmem>>, %arg5: memref<2x32x8xf32, #tpu.memory_space<vmem>>) attributes {dimension_semantics = [], scalar_prefetch = 0 : i64, scratch_operands = 0 : i64, tpu.core_type = #tpu.core_type<tc>} {
    %c0 = arith.constant 0 : index
    %c0_0 = arith.constant 0 : index
    %0 = vector.load %arg0[%c0, %c0_0] : memref<35x128xf32, #tpu.memory_space<vmem>>, vector<35x128xf32>
    %c0_1 = arith.constant 0 : index
    %c0_2 = arith.constant 0 : index
    %1 = vector.load %arg1[%c0_1, %c0_2] : memref<32x35xf32, #tpu.memory_space<vmem>>, vector<32x35xf32>
    %cst = arith.constant dense<0.000000e+00> : vector<32x128xf32>
    %2 = tpu.matmul %1, %0, %cst {dimension_numbers = #tpu.dot_dimension_numbers<[1], [0], [0], [1], [0, 0, 1, 1], [], []>} : vector<32x35xf32>, vector<35x128xf32>, vector<32x128xf32> -> vector<32x128xf32>
    %cst_3 = arith.constant 0.000000e+00 : f32
    %3 = vector.broadcast %cst_3 : f32 to vector<32x128xf32>
    %4 = arith.maximumf %2, %3 : vector<32x128xf32>
    %c0_4 = arith.constant 0 : index
    %c0_5 = arith.constant 0 : index
    %5 = vector.load %arg4[%c0_4, %c0_5] : memref<32x128xf32, #tpu.memory_space<vmem>>, vector<32x128xf32>
    tpu.vector_store %arg4[%c0_4, %c0_5], %4 {strides = array<i32>} : memref<32x128xf32, #tpu.memory_space<vmem>>, vector<32x128xf32>,
    %c0_6 = arith.constant 0 : index
    %c0_7 = arith.constant 0 : index
    %6 = vector.load %arg2[%c0_6, %c0_7] : memref<32x8xf32, #tpu.memory_space<vmem>>, vector<32x8xf32>
    %c0_8 = arith.constant 0 : index
    %c0_9 = arith.constant 0 : index
    %7 = vector.load %arg3[%c0_8, %c0_9] : memref<32x8xf32, #tpu.memory_space<vmem>>, vector<32x8xf32>
    %8 = vector.extract_strided_slice %4 {offsets = [0, 0], sizes = [32, 64], strides = [1, 1]} : vector<32x128xf32> to vector<32x64xf32>
    %cst_10 = arith.constant dense<0.000000e+00> : vector<64x8xf32>
    %9 = tpu.matmul %8, %6, %cst_10 {dimension_numbers = #tpu.dot_dimension_numbers<[0], [0], [1], [1], [0, 1, 1, 1], [], []>} : vector<32x64xf32>, vector<32x8xf32>, vector<64x8xf32> -> vector<64x8xf32>
    %cst_11 = arith.constant dense<0xFF800000> : vector<64xf32>
    %10 = vector.multi_reduction <maximumf>, %9, %cst_11 [1] : vector<64x8xf32> to vector<64xf32>
    %11 = vector.shape_cast %10 : vector<64xf32> to vector<64x1xf32>
    %12 = vector.broadcast %11 : vector<64x1xf32> to vector<64x8xf32>
    %13 = arith.subf %9, %12 : vector<64x8xf32>
    %14 = math.exp %13 : vector<64x8xf32>
    %cst_12 = arith.constant dense<0.000000e+00> : vector<64xf32>
    %15 = vector.multi_reduction <add>, %14, %cst_12 [1] : vector<64x8xf32> to vector<64xf32>
    %16 = vector.shape_cast %15 : vector<64xf32> to vector<64x1xf32>
    %17 = tpu.reciprocal %16 {approx = true} : vector<64x1xf32> -> vector<64x1xf32>
    %18 = vector.broadcast %17 : vector<64x1xf32> to vector<64x8xf32>
    %19 = arith.mulf %14, %18 : vector<64x8xf32>
    %cst_13 = arith.constant dense<0.000000e+00> : vector<8xf32>
    %20 = vector.multi_reduction <add>, %19, %cst_13 [0] : vector<64x8xf32> to vector<8xf32>
    %21 = vector.shape_cast %20 : vector<8xf32> to vector<1x8xf32>
    %cst_14 = arith.constant dense<0.000000e+00> : vector<32x8xf32>
    %22 = tpu.matmul %8, %19, %cst_14 {dimension_numbers = #tpu.dot_dimension_numbers<[1], [0], [0], [1], [0, 0, 1, 1], [], []>} : vector<32x64xf32>, vector<64x8xf32>, vector<32x8xf32> -> vector<32x8xf32>
    %23 = vector.broadcast %21 : vector<1x8xf32> to vector<32x8xf32>
    %24 = arith.mulf %23, %7 : vector<32x8xf32>
    %25 = arith.subf %22, %24 : vector<32x8xf32>
    %26 = arith.mulf %25, %25 : vector<32x8xf32>
    %cst_15 = arith.constant dense<0.000000e+00> : vector<8xf32>
    %27 = vector.multi_reduction <add>, %26, %cst_15 [0] : vector<32x8xf32> to vector<8xf32>
    %28 = vector.shape_cast %27 : vector<8xf32> to vector<1x8xf32>
    %cst_16 = arith.constant 1.000000e-24 : f32
    %29 = vector.broadcast %cst_16 : f32 to vector<1x8xf32>
    %30 = arith.maximumf %28, %29 : vector<1x8xf32>
    %31 = math.rsqrt %30 : vector<1x8xf32>
    %32 = vector.broadcast %31 : vector<1x8xf32> to vector<32x8xf32>
    %33 = arith.mulf %25, %32 : vector<32x8xf32>
    %c0_17 = arith.constant 0 : index
    %c0_18 = arith.constant 0 : index
    %c0_19 = arith.constant 0 : index
    %34 = vector.load %arg5[%c0_17, %c0_18, %c0_19] : memref<2x32x8xf32, #tpu.memory_space<vmem>>, vector<1x32x8xf32>
    %35 = vector.shape_cast %34 : vector<1x32x8xf32> to vector<32x8xf32>
    %36 = vector.shape_cast %33 : vector<32x8xf32> to vector<1x32x8xf32>
    tpu.vector_store %arg5[%c0_17, %c0_18, %c0_19], %36 {strides = array<i32>} : memref<2x32x8xf32, #tpu.memory_space<vmem>>, vector<1x32x8xf32>,
    %37 = vector.extract_strided_slice %4 {offsets = [0, 64], sizes = [32, 64], strides = [1, 1]} : vector<32x128xf32> to vector<32x64xf32>
    %cst_20 = arith.constant dense<0.000000e+00> : vector<64x8xf32>
    %38 = tpu.matmul %37, %6, %cst_20 {dimension_numbers = #tpu.dot_dimension_numbers<[0], [0], [1], [1], [0, 1, 1, 1], [], []>} : vector<32x64xf32>, vector<32x8xf32>, vector<64x8xf32> -> vector<64x8xf32>
    %cst_21 = arith.constant dense<0xFF800000> : vector<64xf32>
    %39 = vector.multi_reduction <maximumf>, %38, %cst_21 [1] : vector<64x8xf32> to vector<64xf32>
    %40 = vector.shape_cast %39 : vector<64xf32> to vector<64x1xf32>
    %41 = vector.broadcast %40 : vector<64x1xf32> to vector<64x8xf32>
    %42 = arith.subf %38, %41 : vector<64x8xf32>
    %43 = math.exp %42 : vector<64x8xf32>
    %cst_22 = arith.constant dense<0.000000e+00> : vector<64xf32>
    %44 = vector.multi_reduction <add>, %43, %cst_22 [1] : vector<64x8xf32> to vector<64xf32>
    %45 = vector.shape_cast %44 : vector<64xf32> to vector<64x1xf32>
    %46 = tpu.reciprocal %45 {approx = true} : vector<64x1xf32> -> vector<64x1xf32>
    %47 = vector.broadcast %46 : vector<64x1xf32> to vector<64x8xf32>
    %48 = arith.mulf %43, %47 : vector<64x8xf32>
    %cst_23 = arith.constant dense<0.000000e+00> : vector<8xf32>
    %49 = vector.multi_reduction <add>, %48, %cst_23 [0] : vector<64x8xf32> to vector<8xf32>
    %50 = vector.shape_cast %49 : vector<8xf32> to vector<1x8xf32>
    %cst_24 = arith.constant dense<0.000000e+00> : vector<32x8xf32>
    %51 = tpu.matmul %37, %48, %cst_24 {dimension_numbers = #tpu.dot_dimension_numbers<[1], [0], [0], [1], [0, 0, 1, 1], [], []>} : vector<32x64xf32>, vector<64x8xf32>, vector<32x8xf32> -> vector<32x8xf32>
    %52 = vector.broadcast %50 : vector<1x8xf32> to vector<32x8xf32>
    %53 = arith.mulf %52, %7 : vector<32x8xf32>
    %54 = arith.subf %51, %53 : vector<32x8xf32>
    %55 = arith.mulf %54, %54 : vector<32x8xf32>
    %cst_25 = arith.constant dense<0.000000e+00> : vector<8xf32>
    %56 = vector.multi_reduction <add>, %55, %cst_25 [0] : vector<32x8xf32> to vector<8xf32>
    %57 = vector.shape_cast %56 : vector<8xf32> to vector<1x8xf32>
    %cst_26 = arith.constant 1.000000e-24 : f32
    %58 = vector.broadcast %cst_26 : f32 to vector<1x8xf32>
    %59 = arith.maximumf %57, %58 : vector<1x8xf32>
    %60 = math.rsqrt %59 : vector<1x8xf32>
    %61 = vector.broadcast %60 : vector<1x8xf32> to vector<32x8xf32>
    %62 = arith.mulf %54, %61 : vector<32x8xf32>
    %c1 = arith.constant 1 : index
    %c0_27 = arith.constant 0 : index
    %c0_28 = arith.constant 0 : index
    %63 = vector.load %arg5[%c1, %c0_27, %c0_28] : memref<2x32x8xf32, #tpu.memory_space<vmem>>, vector<1x32x8xf32>
    %64 = vector.shape_cast %63 : vector<1x32x8xf32> to vector<32x8xf32>
    %65 = vector.shape_cast %62 : vector<32x8xf32> to vector<1x32x8xf32>
    tpu.vector_store %arg5[%c1, %c0_27, %c0_28], %65 {strides = array<i32>} : memref<2x32x8xf32, #tpu.memory_space<vmem>>, vector<1x32x8xf32>,
    return
  }
}

</mosaic_0001>

<bundles_post_ra>
// kernel: neg.7
= control target key start
LH: loop header
LB: loop body
LE: loop exit
PB: predicated region body
PF: predicated region fallthrough
CT: control target
= control target key end

     0   :  { %s72_s0 = inlined_call_operand.vmem [shape: f32[2,16,32], index: 0, kind: input, shape index: {}]   ;;  %s73_s1 = inlined_call_operand.vmem [shape: f32[2,16,32], index: 1, kind: output, shape index: {}]  }
   0x1   :  { %v2_v0 = vld [vmem:[%s72_s0] sm:$0xff]  ;;  %v32_v1 = vld [vmem:[%s72_s0 + $0x10] sm:$0xff]  ;;  %v34_v2 = vld [vmem:[%s72_s0 + $0x8] sm:$0xff] }
   0x2   :  { %v5_v3 = vxor.u32 2147483648, %v2_v0  ;;  %v12_v4 = vxor.u32 2147483648, %v32_v1  ;;  %v20_v5 = vxor.u32 2147483648, %v34_v2  ;;  %v36_v6 = vld [vmem:[%s72_s0 + $0x18] sm:$0xff] }
   0x3   :  { %v28_v7 = vxor.u32 2147483648, %v36_v6 }
   0x4   :  { %7 = vst [vmem:[%s73_s1] sm:$0xff] %v5_v3  ;;  %33 = vst [vmem:[%s73_s1 + $0x10] sm:$0xff] %v12_v4 }
   0x5   :  { %35 = vst [vmem:[%s73_s1 + $0x8] sm:$0xff] %v20_v5  ;;  %37 = vst [vmem:[%s73_s1 + $0x18] sm:$0xff] %v28_v7 }

// kernel: network_forward.6
= control target key start
LH: loop header
LB: loop body
LE: loop exit
PB: predicated region body
PF: predicated region fallthrough
CT: control target
= control target key end

     0   :  { %6 = vsyncpa [#allocation3], 0  ;;  %v19_v2 = vlaneseq  ;;  %s744_s10 = smov 0   ;;  %s820_s23 = smov 0   ;;  %v822_v17 = vmov 1e+10   ;;  %s1097_s0 = inlined_call_operand.vmem [shape: f32[2,64,3], index: 0, kind: input, shape index: {}]   ;;  %s1098_s1 = inlined_call_operand.vmem [shape: s32[2,32], index: 1, kind: output, shape index: {}]  }
   0x1   :  { %v759_v0 = vld [vmem:[%s1097_s0] sm:$0xff]  ;;  %v764_v1 = vld [vmem:[%s1097_s0 + $0x8] sm:$0xff]  ;;  %10 = sst [smem:[#allocation2]] %s744_s10  ;;  %v770_v3 = vld [vmem:[%s1097_s0 + $0x10] sm:$0xff]  ;;  %v824_v18 = vmov 1e+10  }
   0x2   :  { %v775_v4 = vld [vmem:[%s1097_s0 + $0x18] sm:$0xff]  ;;  %v780_v5 = vld [vmem:[%s1097_s0 + $0x20] sm:$0xff]  ;;  %v785_v6 = vld [vmem:[%s1097_s0 + $0x28] sm:$0xff]  ;;  %v797_v9 = vshrl.u32 %v19_v2, 7  ;;  %v826_v19 = vmov 1e+10  }
   0x3   :  { %v790_v7 = vld [vmem:[%s1097_s0 + $0x30] sm:$0xff]  ;;  %v795_v8 = vld [vmem:[%s1097_s0 + $0x38] sm:$0xff]  ;;  %v828_v20 = vmov 1e+10   ;;  %v830_v21 = vmov 1e+10  }
   0x4   :  { %v800_v10 = vadd.s32 8, %v797_v9  ;;  %v803_v11 = vadd.s32 16, %v797_v9  ;;  %v806_v12 = vadd.s32 24, %v797_v9  ;;  %v809_v13 = vadd.s32 32, %v797_v9  ;;  %s838_s24 = smov 1  }
   0x5   :  { %v812_v14 = vadd.s32 40, %v797_v9  ;;  %v815_v15 = vadd.s32 48, %v797_v9  ;;  %v818_v16 = vadd.s32 56, %v797_v9  ;;  %v832_v22 = vmov 1e+10  }
   0x6   :  { %v834_v23 = vmov 1e+10   ;;  %v836_v24 = vmov 1e+10  }
   0x7 LB: > { %s43_s27 = scalar_lea.vmem %s1097_s0, %s666_s23  ;;  %vm65_vm0 = vcmask 23552   ;;  %s153_s29 = scalar_lea.smem [#allocation2], %s702_s24  ;;  %s702_s24 = sphi %s838_s24, %s33_s24   ;;  %v698_v24 = vphi %v836_v24, %v875_v24   ;;  %v694_v23 = vphi %v834_v23, %v877_v23   ;;  %v690_v22 = vphi %v832_v22, %v879_v22   ;;  %v686_v21 = vphi %v830_v21, %v881_v21   ;;  %v682_v20 = vphi %v828_v20, %v873_v20   ;;  %v678_v19 = vphi %v826_v19, %v871_v19   ;;  %v674_v18 = vphi %v824_v18, %v96_v18   ;;  %v670_v17 = vphi %v822_v17, %v97_v17   ;;  %s666_s23 = sphi %s820_s23, %s403_s23  }
   0x8   : > { %v388_v25 = vld [vmem:[%s43_s27] ss:$0 sm:$0xff]  ;;  %s33_s24 = sadd.s32 1, %s702_s24  }
   0x9   : > { %v51_v26 = vsub.f32 %v770_v3, %v388_v25  ;;  %v49_v27 = vsub.f32 %v759_v0, %v388_v25  ;;  %v52_v28 = vsub.f32 %v775_v4, %v388_v25  ;;  %v50_v29 = vsub.f32 %v764_v1, %v388_v25  ;;  %p30_p0 = scmp.ge.s32.totalorder %s33_s24, 32  }
   0xa   : > { %v54_v30 = vsub.f32 %v785_v6, %v388_v25  ;;  %v53_v31 = vsub.f32 %v780_v5, %v388_v25  ;;  %v56_v38 = vsub.f32 %v795_v8, %v388_v25  ;;  %v55_v39 = vsub.f32 %v790_v7, %v388_v25  ;;  %v950_v0 = vld [vmem:[%s1097_s0 + $0x58] sm:$0xff] (%p30_p0)  ;;  %v955_v1 = vld [vmem:[%s1097_s0 + $0x60] sm:$0xff] (%p30_p0)  ;;  %v960_v3 = vld [vmem:[%s1097_s0 + $0x68] sm:$0xff] (%p30_p0)  ;;  %s972_s17 = smov (%p30_p0), 0   ;;  %s990_s18 = smov (%p30_p0), 1  }
   0xb   : > { %v59_v32 = vmul.f32 %v51_v26, %v51_v26  ;;  %v57_v33 = vmul.f32 %v49_v27, %v49_v27  ;;  %v60_v34 = vmul.f32 %v52_v28, %v52_v28  ;;  %v58_v35 = vmul.f32 %v50_v29, %v50_v29  ;;  %v965_v4 = vld [vmem:[%s1097_s0 + $0x70] sm:$0xff] (%p30_p0)  ;;  %v970_v5 = vld [vmem:[%s1097_s0 + $0x78] sm:$0xff] (%p30_p0) }
   0xc   : > { %v62_v42 = vmul.f32 %v54_v30, %v54_v30  ;;  %v61_v43 = vmul.f32 %v53_v31, %v53_v31  ;;  %v64_v46 = vmul.f32 %v56_v38, %v56_v38  ;;  %v63_v47 = vmul.f32 %v55_v39, %v55_v39 }
   0xd   : > { %v72_v36 = vsel %vm65_vm0, %v59_v32, 0.0  ;;  %v66_v37 = vsel %vm65_vm0, %v57_v33, 0.0  ;;  %v75_v40 = vsel %vm65_vm0, %v60_v34, 0.0  ;;  %v69_v41 = vsel %vm65_vm0, %v58_v35, 0.0 }
   0xe   : > { %73 = vadd.xlane.f32.xlu1 %v72_v36  ;;  %67 = vadd.xlane.f32.xlu0 %v66_v37  ;;  %v81_v44 = vsel %vm65_vm0, %v62_v42, 0.0  ;;  %v78_v45 = vsel %vm65_vm0, %v61_v43, 0.0  ;;  %v87_v48 = vsel %vm65_vm0, %v64_v46, 0.0  ;;  %v84_v49 = vsel %vm65_vm0, %v63_v47, 0.0 }
   0xf   :  { %v974_v6 = vmov (%p30_p0), 1e+10   ;;  %v976_v7 = vmov (%p30_p0), 1e+10   ;;  %v978_v8 = vmov (%p30_p0), 1e+10  }
  0x12   : > { %76 = vadd.xlane.f32.xlu1 %v75_v40  ;;  %70 = vadd.xlane.f32.xlu0 %v69_v41 }
  0x16   : > { %82 = vadd.xlane.f32.xlu1 %v81_v44  ;;  %79 = vadd.xlane.f32.xlu0 %v78_v45 }
  0x1a   : > { %88 = vadd.xlane.f32.xlu1 %v87_v48  ;;  %85 = vadd.xlane.f32.xlu0 %v84_v49 }
  0x97   : > { %v74_v50 = vpop.xlane.xlu1 %73  ;;  %v68_v51 = vpop.xlane.xlu0 %67 }
  0x98   : > { %v875_v24 = vmin.f32 %v698_v24, %v68_v51   ;;  %v879_v22 = vmin.f32 %v690_v22, %v74_v50  }
  0x9b   : > { %v77_v52 = vpop.xlane.xlu1 %76  ;;  %v71_v53 = vpop.xlane.xlu0 %70 }
  0x9c   : > { %v877_v23 = vmin.f32 %v694_v23, %v71_v53   ;;  %v881_v21 = vmin.f32 %v686_v21, %v77_v52   ;;  %v935_v53 = vld [vmem:[%s1097_s0 + $0x40] sm:$0xff] (%p30_p0) }
  0x9f   : > { %v83_v54 = vpop.xlane.xlu1 %82  ;;  %v80_v55 = vpop.xlane.xlu0 %79 }
  0xa0   : > { %v871_v19 = vmin.f32 %v678_v19, %v83_v54   ;;  %v873_v20 = vmin.f32 %v682_v20, %v80_v55   ;;  %v940_v54 = vld [vmem:[%s1097_s0 + $0x48] sm:$0xff] (%p30_p0)  ;;  %v945_v55 = vld [vmem:[%s1097_s0 + $0x50] sm:$0xff] (%p30_p0) }
  0xa2   : > { %v99_v58 = vmax.f32 %v877_v23, %v871_v19  ;;  %v98_v59 = vmax.f32 %v875_v24, %v873_v20 }
  0xa3   : > { %v89_v56 = vpop.xlane.xlu1 %88  ;;  %v86_v57 = vpop.xlane.xlu0 %85 }
  0xa4   : > { %v97_v17 = vmin.f32 %v670_v17, %v89_v56   ;;  %v96_v18 = vmin.f32 %v674_v18, %v86_v57   ;;  %v102_v62 = vmax.f32 %v98_v59, %v99_v58 }
  0xa6   : > { %v101_v60 = vmax.f32 %v881_v21, %v97_v17  ;;  %v100_v61 = vmax.f32 %v879_v22, %v96_v18 }
  0xa8   : > { %v103_v63 = vmax.f32 %v100_v61, %v101_v60 }
  0xaa   : > { %v104_v2 = vmax.f32 %v102_v62, %v103_v63 }
  0xac   : > { %v105_v25 = vrot.slane %v104_v2, 4 }
  0xae   : > { %v106_v26 = vmax.f32 %v104_v2, %v105_v25 }
  0xb0   : > { %v107_v27 = vrot.slane %v106_v26, 2 }
  0xb2   : > { %v108_v28 = vmax.f32 %v106_v26, %v107_v27 }
  0xb4   : > { %v109_v29 = vrot.slane %v108_v28, 1 }
  0xb6   : > { %v110_v30 = vmax.f32 %v108_v28, %v109_v29 }
  0xb8   : > { %400 = vpush %v110_v30 }
  0xe9   : > { %s401_s28 = spop %400 }
  0xea   : > { %v112_v31 = vstv %s401_s28 }
  0xeb   : > { %vm113_vm1 = vcmp.ge.f32.partialorder %v875_v24, %v112_v31  ;;  %vm114_vm2 = vcmp.ge.f32.partialorder %v877_v23, %v112_v31  ;;  %vm115_vm3 = vcmp.ge.f32.partialorder %v879_v22, %v112_v31  ;;  %vm116_vm4 = vcmp.ge.f32.partialorder %v881_v21, %v112_v31 }
  0xec   : > { %vm117_vm5 = vcmp.ge.f32.partialorder %v873_v20, %v112_v31  ;;  %vm118_vm6 = vcmp.ge.f32.partialorder %v871_v19, %v112_v31  ;;  %vm119_vm7 = vcmp.ge.f32.partialorder %v96_v18, %v112_v31  ;;  %vm120_vm8 = vcmp.ge.f32.partialorder %v97_v17, %v112_v31 }
  0xed   : > { %v121_v32 = vsel %vm113_vm1, %v797_v9, 64  ;;  %v122_v33 = vsel %vm114_vm2, %v800_v10, 64  ;;  %v123_v34 = vsel %vm115_vm3, %v803_v11, 64  ;;  %v124_v35 = vsel %vm116_vm4, %v806_v12, 64 }
  0xee   : > { %v125_v36 = vsel %vm117_vm5, %v809_v13, 64  ;;  %v126_v37 = vsel %vm118_vm6, %v812_v14, 64  ;;  %v127_v38 = vsel %vm119_vm7, %v815_v15, 64  ;;  %v128_v39 = vsel %vm120_vm8, %v818_v16, 64 }
  0xef   : > { %vm129_vm9 = vcmp.lt.s32.totalorder %v121_v32, %v125_v36  ;;  %vm131_vm10 = vcmp.lt.s32.totalorder %v122_v33, %v126_v37  ;;  %vm133_vm11 = vcmp.lt.s32.totalorder %v123_v34, %v127_v38  ;;  %vm135_vm12 = vcmp.lt.s32.totalorder %v124_v35, %v128_v39 }
  0xf0   : > { %v130_v40 = vsel %vm129_vm9, %v121_v32, %v125_v36  ;;  %v132_v41 = vsel %vm131_vm10, %v122_v33, %v126_v37  ;;  %v134_v42 = vsel %vm133_vm11, %v123_v34, %v127_v38  ;;  %v136_v43 = vsel %vm135_vm12, %v124_v35, %v128_v39 }
  0xf1   : > { %vm137_vm13 = vcmp.lt.s32.totalorder %v130_v40, %v132_v41  ;;  %vm139_vm14 = vcmp.lt.s32.totalorder %v134_v42, %v136_v43  ;;  %v980_v17 = vmov (%p30_p0), 1e+10   ;;  %v982_v18 = vmov (%p30_p0), 1e+10  }
  0xf2   : > { %v138_v44 = vsel %vm137_vm13, %v130_v40, %v132_v41  ;;  %v140_v45 = vsel %vm139_vm14, %v134_v42, %v136_v43  ;;  %v984_v19 = vmov (%p30_p0), 1e+10   ;;  %v986_v20 = vmov (%p30_p0), 1e+10  }
  0xf3   : > { %vm141_vm15 = vcmp.lt.s32.totalorder %v138_v44, %v140_v45  ;;  %v988_v21 = vmov (%p30_p0), 1e+10  }
  0xf4   : > { %v142_v46 = vsel %vm141_vm15, %v138_v44, %v140_v45 }
  0xf5   : > { %v143_v47 = vrot.slane %v142_v46, 4 }
  0xf7   : > { %vm144_vm1 = vcmp.lt.s32.totalorder %v142_v46, %v143_v47 }
  0xf8   : > { %v145_v48 = vsel %vm144_vm1, %v142_v46, %v143_v47 }
  0xf9   : > { %v146_v49 = vrot.slane %v145_v48, 2 }
  0xfb   : > { %vm147_vm2 = vcmp.lt.s32.totalorder %v145_v48, %v146_v49 }
  0xfc   : > { %v148_v50 = vsel %vm147_vm2, %v145_v48, %v146_v49 }
  0xfd   : > { %v149_v51 = vrot.slane %v148_v50, 1 }
  0xff   : > { %vm150_vm3 = vcmp.lt.s32.totalorder %v148_v50, %v149_v51 }
 0x100   : > { %v151_v52 = vsel %vm150_vm3, %v148_v50, %v149_v51 }
 0x101   : > { %402 = vpush %v151_v52 }
 0x12f   :  { %32 = sbr.rel (!%p30_p0) target bundleno = 7 (0x7), region = 45 }
 0x132   : > { %s403_s23 = spop %402  }
 0x133   : > { %154 = sst [smem:[%s153_s29]] %s403_s23 }
 0x134   :  { %156 = sst [smem:[#allocation2 + $0x80]] %s744_s10 }
 0x135 LB: > { %s318_s21 = scalar_lea.vmem %s1097_s0, %s706_s17  ;;  %s292_s23 = sshra.s32 %s742_s18, 7  ;;  %s742_s18 = sphi %s990_s18, %s171_s18   ;;  %v738_v21 = vphi %v988_v21, %v1027_v21   ;;  %v734_v20 = vphi %v986_v20, %v1029_v20   ;;  %v730_v19 = vphi %v984_v19, %v1031_v19   ;;  %v726_v18 = vphi %v982_v18, %v1033_v18   ;;  %v722_v17 = vphi %v980_v17, %v1025_v17   ;;  %v718_v8 = vphi %v978_v8, %v1023_v8   ;;  %v714_v7 = vphi %v976_v7, %v1041_v7   ;;  %v710_v6 = vphi %v974_v6, %v1039_v6   ;;  %s706_s17 = sphi %s972_s17, %s407_s17  }
 0x136   : > { %v398_v22 = vld [vmem:[%s318_s21 + $0x40] ss:$0 sm:$0xff]  ;;  %s297_s24 = sand.u32 127, %s742_s18  ;;  %s399_s25 = sshll.u32 %s292_s23, 7 }
 0x137   : > { %v190_v23 = vsub.f32 %v945_v55, %v398_v22  ;;  %v188_v24 = vsub.f32 %v935_v53, %v398_v22  ;;  %v191_v56 = vsub.f32 %v950_v0, %v398_v22  ;;  %v189_v57 = vsub.f32 %v940_v54, %v398_v22  ;;  %s321_s26 = sadd.s32 %s399_s25, %s297_s24  ;;  %s171_s18 = sadd.s32 1, %s742_s18  }
 0x138   : > { %v193_v58 = vsub.f32 %v960_v3, %v398_v22  ;;  %v192_v59 = vsub.f32 %v955_v1, %v398_v22  ;;  %v195_v26 = vsub.f32 %v970_v5, %v398_v22  ;;  %v194_v27 = vsub.f32 %v965_v4, %v398_v22  ;;  %s322_s27 = scalar_lea.smem [#allocation2], %s321_s26  ;;  %p168_p1 = scmp.ge.s32.totalorder %s171_s18, 32  }
 0x139   : > { %v198_v60 = vmul.f32 %v190_v23, %v190_v23  ;;  %v196_v61 = vmul.f32 %v188_v24, %v188_v24  ;;  %v199_v62 = vmul.f32 %v191_v56, %v191_v56  ;;  %v197_v63 = vmul.f32 %v189_v57, %v189_v57  ;;  %s323_s28 = scalar_lea.smem %s322_s27, 128 [#allocation2]  ;;  %s307_s2 = sshll.u32 (%p168_p1), %s1098_s1, 4  ;;  %s308_s2 = int_to_ptr.vmem [resolvable:$true] %s307_s2 }
 0x13a   : > { %v201_v30 = vmul.f32 %v193_v58, %v193_v58  ;;  %v200_v31 = vmul.f32 %v192_v59, %v192_v59  ;;  %v203_v34 = vmul.f32 %v195_v26, %v195_v26  ;;  %v202_v35 = vmul.f32 %v194_v27, %v194_v27  ;;  %s570_s3 = scalar_lea.vmem (%p168_p1), %s308_s2, 32  ;;  %p575_p3 = scmp.lt.s32.totalorder (%p168_p1), %s308_s2, %s308_s2 }
 0x13b   : > { %v211_v2 = vsel %vm65_vm0, %v198_v60, 0.0  ;;  %v205_v25 = vsel %vm65_vm0, %v196_v61, 0.0  ;;  %v214_v28 = vsel %vm65_vm0, %v199_v62, 0.0  ;;  %v208_v29 = vsel %vm65_vm0, %v197_v63, 0.0  ;;  %p571_p2 = scmp.ne.s32.totalorder (%p168_p1), %s308_s2, %s570_s3  ;;  %p576_p4 = scmp.lt.s32.totalorder (%p168_p1), %s570_s3, %s570_s3 }
 0x13c   : > { %212 = vadd.xlane.f32.xlu1 %v211_v2  ;;  %206 = vadd.xlane.f32.xlu0 %v205_v25  ;;  %v220_v32 = vsel %vm65_vm0, %v201_v30, 0.0  ;;  %v217_v33 = vsel %vm65_vm0, %v200_v31, 0.0  ;;  %v226_v36 = vsel %vm65_vm0, %v203_v34, 0.0  ;;  %v223_v37 = vsel %vm65_vm0, %v202_v35, 0.0 }
 0x13d   :  { %p577_p5 = por (%p168_p1), %p576_p4, %p575_p3 }
 0x13f   :  { %p578_p6 = pnand (%p168_p1), %p577_p5, %p571_p2 }
 0x140   : > { %215 = vadd.xlane.f32.xlu1 %v214_v28  ;;  %209 = vadd.xlane.f32.xlu0 %v208_v29 }
 0x144   : > { %221 = vadd.xlane.f32.xlu1 %v220_v32  ;;  %218 = vadd.xlane.f32.xlu0 %v217_v33 }
 0x148   : > { %227 = vadd.xlane.f32.xlu1 %v226_v36  ;;  %224 = vadd.xlane.f32.xlu0 %v223_v37 }
 0x1c5   : > { %v213_v38 = vpop.xlane.xlu1 %212  ;;  %v207_v39 = vpop.xlane.xlu0 %206 }
 0x1c6   : > { %v1027_v21 = vmin.f32 %v738_v21, %v207_v39   ;;  %v1031_v19 = vmin.f32 %v730_v19, %v213_v38  }
 0x1c9   : > { %v216_v40 = vpop.xlane.xlu1 %215  ;;  %v210_v41 = vpop.xlane.xlu0 %209 }
 0x1ca   : > { %v1029_v20 = vmin.f32 %v734_v20, %v210_v41   ;;  %v1033_v18 = vmin.f32 %v726_v18, %v216_v40  }
 0x1cd   : > { %v222_v42 = vpop.xlane.xlu1 %221  ;;  %v219_v43 = vpop.xlane.xlu0 %218 }
 0x1ce   : > { %v1023_v8 = vmin.f32 %v718_v8, %v222_v42   ;;  %v1025_v17 = vmin.f32 %v722_v17, %v219_v43  }
 0x1d0   : > { %v238_v46 = vmax.f32 %v1029_v20, %v1023_v8  ;;  %v237_v47 = vmax.f32 %v1027_v21, %v1025_v17 }
 0x1d1   : > { %v228_v44 = vpop.xlane.xlu1 %227  ;;  %v225_v45 = vpop.xlane.xlu0 %224 }
 0x1d2   : > { %v1039_v6 = vmin.f32 %v710_v6, %v228_v44   ;;  %v1041_v7 = vmin.f32 %v714_v7, %v225_v45   ;;  %v241_v50 = vmax.f32 %v237_v47, %v238_v46 }
 0x1d4   : > { %v240_v48 = vmax.f32 %v1033_v18, %v1039_v6  ;;  %v239_v49 = vmax.f32 %v1031_v19, %v1041_v7 }
 0x1d6   : > { %v242_v51 = vmax.f32 %v239_v49, %v240_v48 }
 0x1d8   : > { %v243_v52 = vmax.f32 %v241_v50, %v242_v51 }
 0x1da   : > { %v244_v22 = vrot.slane %v243_v52, 4 }
 0x1dc   : > { %v245_v23 = vmax.f32 %v243_v52, %v244_v22 }
 0x1de   : > { %v246_v24 = vrot.slane %v245_v23, 2 }
 0x1e0   : > { %v247_v56 = vmax.f32 %v245_v23, %v246_v24 }
 0x1e2   : > { %v248_v57 = vrot.slane %v247_v56, 1 }
 0x1e4   : > { %v249_v58 = vmax.f32 %v247_v56, %v248_v57 }
 0x1e6   : > { %404 = vpush %v249_v58 }
 0x217   : > { %s405_s22 = spop %404 }
 0x218   : > { %v251_v59 = vstv %s405_s22 }
 0x219   : > { %vm252_vm4 = vcmp.ge.f32.partialorder %v1027_v21, %v251_v59  ;;  %vm253_vm5 = vcmp.ge.f32.partialorder %v1029_v20, %v251_v59  ;;  %vm254_vm6 = vcmp.ge.f32.partialorder %v1031_v19, %v251_v59  ;;  %vm255_vm7 = vcmp.ge.f32.partialorder %v1033_v18, %v251_v59 }
 0x21a   : > { %vm256_vm8 = vcmp.ge.f32.partialorder %v1025_v17, %v251_v59  ;;  %vm257_vm9 = vcmp.ge.f32.partialorder %v1023_v8, %v251_v59  ;;  %vm258_vm10 = vcmp.ge.f32.partialorder %v1041_v7, %v251_v59  ;;  %vm259_vm11 = vcmp.ge.f32.partialorder %v1039_v6, %v251_v59 }
 0x21b   : > { %v260_v60 = vsel %vm252_vm4, %v797_v9, 64  ;;  %v261_v61 = vsel %vm253_vm5, %v800_v10, 64  ;;  %v262_v62 = vsel %vm254_vm6, %v803_v11, 64  ;;  %v263_v63 = vsel %vm255_vm7, %v806_v12, 64 }
 0x21c   : > { %v264_v2 = vsel %vm256_vm8, %v809_v13, 64  ;;  %v265_v25 = vsel %vm257_vm9, %v812_v14, 64  ;;  %v266_v26 = vsel %vm258_vm10, %v815_v15, 64  ;;  %v267_v27 = vsel %vm259_vm11, %v818_v16, 64 }
 0x21d   : > { %vm268_vm12 = vcmp.lt.s32.totalorder %v260_v60, %v264_v2  ;;  %vm270_vm13 = vcmp.lt.s32.totalorder %v261_v61, %v265_v25  ;;  %vm272_vm14 = vcmp.lt.s32.totalorder %v262_v62, %v266_v26  ;;  %vm274_vm15 = vcmp.lt.s32.totalorder %v263_v63, %v267_v27 }
 0x21e   : > { %v269_v28 = vsel %vm268_vm12, %v260_v60, %v264_v2  ;;  %v271_v29 = vsel %vm270_vm13, %v261_v61, %v265_v25  ;;  %v273_v30 = vsel %vm272_vm14, %v262_v62, %v266_v26  ;;  %v275_v31 = vsel %vm274_vm15, %v263_v63, %v267_v27 }
 0x21f   : > { %vm276_vm1 = vcmp.lt.s32.totalorder %v269_v28, %v271_v29  ;;  %vm278_vm2 = vcmp.lt.s32.totalorder %v273_v30, %v275_v31 }
 0x220   : > { %v277_v32 = vsel %vm276_vm1, %v269_v28, %v271_v29  ;;  %v279_v33 = vsel %vm278_vm2, %v273_v30, %v275_v31 }
 0x221   : > { %vm280_vm3 = vcmp.lt.s32.totalorder %v277_v32, %v279_v33 }
 0x222   : > { %v281_v34 = vsel %vm280_vm3, %v277_v32, %v279_v33 }
 0x223   : > { %v282_v35 = vrot.slane %v281_v34, 4 }
 0x225   : > { %vm283_vm4 = vcmp.lt.s32.totalorder %v281_v34, %v282_v35 }
 0x226   : > { %v284_v36 = vsel %vm283_vm4, %v281_v34, %v282_v35 }
 0x227   : > { %v285_v37 = vrot.slane %v284_v36, 2 }
 0x229   : > { %vm286_vm5 = vcmp.lt.s32.totalorder %v284_v36, %v285_v37 }
 0x22a   : > { %v287_v38 = vsel %vm286_vm5, %v284_v36, %v285_v37 }
 0x22b   : > { %v288_v39 = vrot.slane %v287_v38, 1 }
 0x22d   : > { %vm289_vm6 = vcmp.lt.s32.totalorder %v287_v38, %v288_v39 }
 0x22e   : > { %v290_v40 = vsel %vm289_vm6, %v287_v38, %v288_v39 }
 0x22f   : > { %406 = vpush %v290_v40 }
 0x25d   :  { %170 = sbr.rel (!%p168_p1) target bundleno = 309 (0x135), region = 56 }
 0x260   : > { %s407_s17 = spop %406  }
 0x261   : > { %300 = sst [smem:[%s323_s28]] %s407_s17 }
 0x262   :  { %581 = shalt.err (!%p578_p6)
}
 0x263   :  { %s745_s4 = smov [#allocation2]  }
 0x264   :  { %310 = dma.smem_to_vmem %s745_s4, 32, %s308_s2, [#allocation3]  }
 0x265   :  { %662 = dma.done.wait [#allocation3], 32  }
 0x266   :  { %663 = vsyncadd [#allocation3], 4294967264 }
 0x267   :  { %314 = sfence }
 0x268   :  { %315 = vsyncpa [#allocation3], 1 }

// kernel: network_forward.8
= control target key start
LH: loop header
LB: loop body
LE: loop exit
PB: predicated region body
PF: predicated region fallthrough
CT: control target
= control target key end

     0   :  { %6 = vsyncpa [#allocation3], 0  ;;  %v15_v2 = vlaneseq  ;;  %s480_s10 = smov 0   ;;  %s524_s15 = smov 0   ;;  %v526_v9 = vmov 1e+10   ;;  %s647_s0 = inlined_call_operand.vmem [shape: f32[2,32,3], index: 0, kind: input, shape index: {}]   ;;  %s648_s1 = inlined_call_operand.vmem [shape: s32[2,16], index: 1, kind: output, shape index: {}]  }
   0x1   :  { %v495_v0 = vld [vmem:[%s647_s0] sm:$0xff]  ;;  %v500_v1 = vld [vmem:[%s647_s0 + $0x8] sm:$0xff]  ;;  %10 = sst [smem:[#allocation2]] %s480_s10  ;;  %v506_v3 = vld [vmem:[%s647_s0 + $0x10] sm:$0xff]  ;;  %v528_v10 = vmov 1e+10  }
   0x2   :  { %v511_v4 = vld [vmem:[%s647_s0 + $0x18] sm:$0xff]  ;;  %v513_v5 = vshrl.u32 %v15_v2, 7  ;;  %v530_v11 = vmov 1e+10   ;;  %v532_v12 = vmov 1e+10  }
   0x3   :  { %s534_s16 = smov 1  }
   0x4   :  { %v516_v6 = vadd.s32 8, %v513_v5  ;;  %v519_v7 = vadd.s32 16, %v513_v5  ;;  %v522_v8 = vadd.s32 24, %v513_v5 }
   0x5 LB: > { %s31_s19 = scalar_lea.vmem %s647_s0, %s434_s15  ;;  %vm45_vm0 = vcmask 23552   ;;  %s97_s21 = scalar_lea.smem [#allocation2], %s454_s16  ;;  %s454_s16 = sphi %s534_s16, %s25_s16   ;;  %v450_v12 = vphi %v532_v12, %v58_v12   ;;  %v446_v11 = vphi %v530_v11, %v59_v11   ;;  %v442_v10 = vphi %v528_v10, %v60_v10   ;;  %v438_v9 = vphi %v526_v9, %v61_v9   ;;  %s434_s15 = sphi %s524_s15, %s267_s15  }
   0x6   : > { %v256_v13 = vld [vmem:[%s31_s19] ss:$0 sm:$0xff]  ;;  %s25_s16 = sadd.s32 1, %s454_s16  }
   0x7   : > { %v39_v14 = vsub.f32 %v506_v3, %v256_v13  ;;  %v37_v15 = vsub.f32 %v495_v0, %v256_v13  ;;  %v40_v16 = vsub.f32 %v511_v4, %v256_v13  ;;  %v38_v17 = vsub.f32 %v500_v1, %v256_v13  ;;  %p22_p0 = scmp.ge.s32.totalorder %s25_s16, 16  }
   0x8   :  { %v577_v53 = vld [vmem:[%s647_s0 + $0x20] sm:$0xff] (%p22_p0)  ;;  %v582_v54 = vld [vmem:[%s647_s0 + $0x28] sm:$0xff] (%p22_p0)  ;;  %v587_v55 = vld [vmem:[%s647_s0 + $0x30] sm:$0xff] (%p22_p0)  ;;  %s594_s30 = smov (%p22_p0), 0   ;;  %v596_v57 = vmov (%p22_p0), 1e+10  }
   0x9   : > { %v43_v18 = vmul.f32 %v39_v14, %v39_v14  ;;  %v41_v19 = vmul.f32 %v37_v15, %v37_v15  ;;  %v44_v20 = vmul.f32 %v40_v16, %v40_v16  ;;  %v42_v21 = vmul.f32 %v38_v17, %v38_v17  ;;  %v592_v56 = vld [vmem:[%s647_s0 + $0x38] sm:$0xff] (%p22_p0)  ;;  %s604_s2 = smov (%p22_p0), 1  }
   0xa   :  { %v598_v58 = vmov (%p22_p0), 1e+10   ;;  %v600_v59 = vmov (%p22_p0), 1e+10   ;;  %v602_v60 = vmov (%p22_p0), 1e+10  }
   0xb   : > { %v52_v22 = vsel %vm45_vm0, %v43_v18, 0.0  ;;  %v46_v23 = vsel %vm45_vm0, %v41_v19, 0.0  ;;  %v55_v24 = vsel %vm45_vm0, %v44_v20, 0.0  ;;  %v49_v25 = vsel %vm45_vm0, %v42_v21, 0.0 }
   0xc   : > { %53 = vadd.xlane.f32.xlu1 %v52_v22  ;;  %47 = vadd.xlane.f32.xlu0 %v46_v23 }
  0x10   : > { %56 = vadd.xlane.f32.xlu1 %v55_v24  ;;  %50 = vadd.xlane.f32.xlu0 %v49_v25 }
  0x95   : > { %v54_v26 = vpop.xlane.xlu1 %53  ;;  %v48_v27 = vpop.xlane.xlu0 %47 }
  0x96   : > { %v60_v10 = vmin.f32 %v442_v10, %v54_v26   ;;  %v58_v12 = vmin.f32 %v450_v12, %v48_v27  }
  0x99   : > { %v57_v28 = vpop.xlane.xlu1 %56  ;;  %v51_v29 = vpop.xlane.xlu0 %50 }
  0x9a   : > { %v61_v9 = vmin.f32 %v438_v9, %v57_v28   ;;  %v59_v11 = vmin.f32 %v446_v11, %v51_v29  }
  0x9c   : > { %v63_v30 = vmax.f32 %v60_v10, %v61_v9  ;;  %v62_v31 = vmax.f32 %v58_v12, %v59_v11 }
  0x9e   : > { %v64_v32 = vmax.f32 %v62_v31, %v63_v30 }
  0xa0   : > { %v65_v33 = vrot.slane %v64_v32, 4 }
  0xa2   : > { %v66_v34 = vmax.f32 %v64_v32, %v65_v33 }
  0xa4   : > { %v67_v35 = vrot.slane %v66_v34, 2 }
  0xa6   : > { %v68_v36 = vmax.f32 %v66_v34, %v67_v35 }
  0xa8   : > { %v69_v37 = vrot.slane %v68_v36, 1 }
  0xaa   : > { %v70_v38 = vmax.f32 %v68_v36, %v69_v37 }
  0xac   : > { %264 = vpush %v70_v38 }
  0xdd   : > { %s265_s20 = spop %264 }
  0xde   : > { %v72_v39 = vstv %s265_s20 }
  0xdf   : > { %vm73_vm1 = vcmp.ge.f32.partialorder %v58_v12, %v72_v39  ;;  %vm74_vm2 = vcmp.ge.f32.partialorder %v59_v11, %v72_v39  ;;  %vm75_vm3 = vcmp.ge.f32.partialorder %v60_v10, %v72_v39  ;;  %vm76_vm4 = vcmp.ge.f32.partialorder %v61_v9, %v72_v39 }
  0xe0   : > { %v77_v40 = vsel %vm73_vm1, %v513_v5, 32  ;;  %v78_v41 = vsel %vm74_vm2, %v516_v6, 32  ;;  %v79_v42 = vsel %vm75_vm3, %v519_v7, 32  ;;  %v80_v43 = vsel %vm76_vm4, %v522_v8, 32 }
  0xe1   : > { %vm81_vm5 = vcmp.lt.s32.totalorder %v77_v40, %v78_v41  ;;  %vm83_vm6 = vcmp.lt.s32.totalorder %v79_v42, %v80_v43 }
  0xe2   : > { %v82_v44 = vsel %vm81_vm5, %v77_v40, %v78_v41  ;;  %v84_v45 = vsel %vm83_vm6, %v79_v42, %v80_v43 }
  0xe3   : > { %vm85_vm7 = vcmp.lt.s32.totalorder %v82_v44, %v84_v45 }
  0xe4   : > { %v86_v46 = vsel %vm85_vm7, %v82_v44, %v84_v45 }
  0xe5   : > { %v87_v47 = vrot.slane %v86_v46, 4 }
  0xe7   : > { %vm88_vm8 = vcmp.lt.s32.totalorder %v86_v46, %v87_v47 }
  0xe8   : > { %v89_v48 = vsel %vm88_vm8, %v86_v46, %v87_v47 }
  0xe9   : > { %v90_v49 = vrot.slane %v89_v48, 2 }
  0xeb   : > { %vm91_vm9 = vcmp.lt.s32.totalorder %v89_v48, %v90_v49 }
  0xec   : > { %v92_v50 = vsel %vm91_vm9, %v89_v48, %v90_v49 }
  0xed   : > { %v93_v51 = vrot.slane %v92_v50, 1 }
  0xef   : > { %vm94_vm10 = vcmp.lt.s32.totalorder %v92_v50, %v93_v51 }
  0xf0   : > { %v95_v52 = vsel %vm94_vm10, %v92_v50, %v93_v51 }
  0xf1   : > { %266 = vpush %v95_v52 }
 0x11f   :  { %24 = sbr.rel (!%p22_p0) target bundleno = 5 (0x5), region = 45 }
 0x122   : > { %s267_s15 = spop %266  }
 0x123   : > { %98 = sst [smem:[%s97_s21]] %s267_s15 }
 0x124   :  { %100 = sst [smem:[#allocation2 + $0x80]] %s480_s10 }
 0x125 LB: > { %s210_s5 = scalar_lea.vmem %s647_s0, %s458_s30  ;;  %s184_s7 = sshra.s32 %s478_s2, 7  ;;  %s478_s2 = sphi %s604_s2, %s111_s2   ;;  %v474_v60 = vphi %v602_v60, %v145_v60   ;;  %v470_v59 = vphi %v600_v59, %v146_v59   ;;  %v466_v58 = vphi %v598_v58, %v147_v58   ;;  %v462_v57 = vphi %v596_v57, %v148_v57   ;;  %s458_s30 = sphi %s594_s30, %s271_s30  }
 0x126   : > { %v262_v61 = vld [vmem:[%s210_s5 + $0x20] ss:$0 sm:$0xff]  ;;  %s189_s8 = sand.u32 127, %s478_s2  ;;  %s263_s9 = sshll.u32 %s184_s7, 7 }
 0x127   : > { %v126_v62 = vsub.f32 %v587_v55, %v262_v61  ;;  %v124_v63 = vsub.f32 %v577_v53, %v262_v61  ;;  %v127_v0 = vsub.f32 %v592_v56, %v262_v61  ;;  %v125_v1 = vsub.f32 %v582_v54, %v262_v61  ;;  %s213_s10 = sadd.s32 %s263_s9, %s189_s8  ;;  %s111_s2 = sadd.s32 1, %s478_s2  }
 0x128   : > { %s214_s11 = scalar_lea.smem [#allocation2], %s213_s10  ;;  %p108_p1 = scmp.ge.s32.totalorder %s111_s2, 16  }
 0x129   : > { %v130_v2 = vmul.f32 %v126_v62, %v126_v62  ;;  %v128_v3 = vmul.f32 %v124_v63, %v124_v63  ;;  %v131_v4 = vmul.f32 %v127_v0, %v127_v0  ;;  %v129_v9 = vmul.f32 %v125_v1, %v125_v1  ;;  %s215_s12 = scalar_lea.smem %s214_s11, 128 [#allocation2]  ;;  %s199_s15 = sshll.u32 (%p108_p1), %s648_s1, 4  ;;  %s200_s15 = int_to_ptr.vmem [resolvable:$true] %s199_s15 }
 0x12a   :  { %s370_s16 = scalar_lea.vmem (%p108_p1), %s200_s15, 32  ;;  %p375_p3 = scmp.lt.s32.totalorder (%p108_p1), %s200_s15, %s200_s15 }
 0x12b   : > { %v139_v10 = vsel %vm45_vm0, %v130_v2, 0.0  ;;  %v133_v11 = vsel %vm45_vm0, %v128_v3, 0.0  ;;  %v142_v12 = vsel %vm45_vm0, %v131_v4, 0.0  ;;  %v136_v13 = vsel %vm45_vm0, %v129_v9, 0.0  ;;  %p371_p2 = scmp.ne.s32.totalorder (%p108_p1), %s200_s15, %s370_s16  ;;  %p376_p4 = scmp.lt.s32.totalorder (%p108_p1), %s370_s16, %s370_s16 }
 0x12c   : > { %140 = vadd.xlane.f32.xlu1 %v139_v10  ;;  %134 = vadd.xlane.f32.xlu0 %v133_v11 }
 0x12d   :  { %p377_p5 = por (%p108_p1), %p376_p4, %p375_p3 }
 0x12f   :  { %p378_p6 = pnand (%p108_p1), %p377_p5, %p371_p2 }
 0x130   : > { %143 = vadd.xlane.f32.xlu1 %v142_v12  ;;  %137 = vadd.xlane.f32.xlu0 %v136_v13 }
 0x1b5   : > { %v141_v14 = vpop.xlane.xlu1 %140  ;;  %v135_v15 = vpop.xlane.xlu0 %134 }
 0x1b6   : > { %v147_v58 = vmin.f32 %v466_v58, %v141_v14   ;;  %v145_v60 = vmin.f32 %v474_v60, %v135_v15  }
 0x1b9   : > { %v144_v16 = vpop.xlane.xlu1 %143  ;;  %v138_v17 = vpop.xlane.xlu0 %137 }
 0x1ba   : > { %v148_v57 = vmin.f32 %v462_v57, %v144_v16   ;;  %v146_v59 = vmin.f32 %v470_v59, %v138_v17  }
 0x1bc   : > { %v150_v18 = vmax.f32 %v147_v58, %v148_v57  ;;  %v149_v19 = vmax.f32 %v145_v60, %v146_v59 }
 0x1be   : > { %v151_v20 = vmax.f32 %v149_v19, %v150_v18 }
 0x1c0   : > { %v152_v21 = vrot.slane %v151_v20, 4 }
 0x1c2   : > { %v153_v22 = vmax.f32 %v151_v20, %v152_v21 }
 0x1c4   : > { %v154_v23 = vrot.slane %v153_v22, 2 }
 0x1c6   : > { %v155_v24 = vmax.f32 %v153_v22, %v154_v23 }
 0x1c8   : > { %v156_v25 = vrot.slane %v155_v24, 1 }
 0x1ca   : > { %v157_v26 = vmax.f32 %v155_v24, %v156_v25 }
 0x1cc   : > { %268 = vpush %v157_v26 }
 0x1fd   : > { %s269_s6 = spop %268 }
 0x1fe   : > { %v159_v27 = vstv %s269_s6 }
 0x1ff   : > { %vm160_vm11 = vcmp.ge.f32.partialorder %v145_v60, %v159_v27  ;;  %vm161_vm12 = vcmp.ge.f32.partialorder %v146_v59, %v159_v27  ;;  %vm162_vm13 = vcmp.ge.f32.partialorder %v147_v58, %v159_v27  ;;  %vm163_vm14 = vcmp.ge.f32.partialorder %v148_v57, %v159_v27 }
 0x200   : > { %v164_v28 = vsel %vm160_vm11, %v513_v5, 32  ;;  %v165_v29 = vsel %vm161_vm12, %v516_v6, 32  ;;  %v166_v30 = vsel %vm162_vm13, %v519_v7, 32  ;;  %v167_v31 = vsel %vm163_vm14, %v522_v8, 32 }
 0x201   : > { %vm168_vm15 = vcmp.lt.s32.totalorder %v164_v28, %v165_v29  ;;  %vm170_vm1 = vcmp.lt.s32.totalorder %v166_v30, %v167_v31 }
 0x202   : > { %v169_v32 = vsel %vm168_vm15, %v164_v28, %v165_v29  ;;  %v171_v33 = vsel %vm170_vm1, %v166_v30, %v167_v31 }
 0x203   : > { %vm172_vm2 = vcmp.lt.s32.totalorder %v169_v32, %v171_v33 }
 0x204   : > { %v173_v34 = vsel %vm172_vm2, %v169_v32, %v171_v33 }
 0x205   : > { %v174_v35 = vrot.slane %v173_v34, 4 }
 0x207   : > { %vm175_vm3 = vcmp.lt.s32.totalorder %v173_v34, %v174_v35 }
 0x208   : > { %v176_v36 = vsel %vm175_vm3, %v173_v34, %v174_v35 }
 0x209   : > { %v177_v37 = vrot.slane %v176_v36, 2 }
 0x20b   : > { %vm178_vm4 = vcmp.lt.s32.totalorder %v176_v36, %v177_v37 }
 0x20c   : > { %v179_v38 = vsel %vm178_vm4, %v176_v36, %v177_v37 }
 0x20d   : > { %v180_v39 = vrot.slane %v179_v38, 1 }
 0x20f   : > { %vm181_vm5 = vcmp.lt.s32.totalorder %v179_v38, %v180_v39 }
 0x210   : > { %v182_v40 = vsel %vm181_vm5, %v179_v38, %v180_v39 }
 0x211   : > { %270 = vpush %v182_v40 }
 0x23f   :  { %110 = sbr.rel (!%p108_p1) target bundleno = 293 (0x125), region = 56 }
 0x242   : > { %s271_s30 = spop %270  }
 0x243   : > { %192 = sst [smem:[%s215_s12]] %s271_s30 }
 0x244   :  { %381 = shalt.err (!%p378_p6)
}
 0x245   :  { %s481_s17 = smov [#allocation2]  }
 0x246   :  { %202 = dma.smem_to_vmem %s481_s17, 32, %s200_s15, [#allocation3]  }
 0x247   :  { %430 = dma.done.wait [#allocation3], 32  }
 0x248   :  { %431 = vsyncadd [#allocation3], 4294967264 }
 0x249   :  { %206 = sfence }
 0x24a   :  { %207 = vsyncpa [#allocation3], 1 }

// kernel: neg.6
= control target key start
LH: loop header
LB: loop body
LE: loop exit
PB: predicated region body
PF: predicated region fallthrough
CT: control target
= control target key end

     0   :  { %s136_s0 = inlined_call_operand.vmem [shape: f32[2,32,64], index: 0, kind: input, shape index: {}]   ;;  %s137_s1 = inlined_call_operand.vmem [shape: f32[2,32,64], index: 1, kind: output, shape index: {}]  }
   0x1   :  { %v2_v0 = vld [vmem:[%s136_s0] sm:$0xff]  ;;  %v66_v2 = vld [vmem:[%s136_s0 + $0x8] sm:$0xff]  ;;  %v70_v7 = vld [vmem:[%s136_s0 + $0x10] sm:$0xff] }
   0x2   :  { %v64_v1 = vld [vmem:[%s136_s0 + $0x20] sm:$0xff]  ;;  %v5_v3 = vxor.u32 2147483648, %v2_v0  ;;  %v20_v5 = vxor.u32 2147483648, %v66_v2  ;;  %v68_v6 = vld [vmem:[%s136_s0 + $0x28] sm:$0xff]  ;;  %v72_v8 = vld [vmem:[%s136_s0 + $0x30] sm:$0xff]  ;;  %v36_v10 = vxor.u32 2147483648, %v70_v7 }
   0x3   :  { %v12_v4 = vxor.u32 2147483648, %v64_v1  ;;  %v28_v9 = vxor.u32 2147483648, %v68_v6  ;;  %v44_v11 = vxor.u32 2147483648, %v72_v8  ;;  %v74_v12 = vld [vmem:[%s136_s0 + $0x18] sm:$0xff] }
   0x4   :  { %v76_v13 = vld [vmem:[%s136_s0 + $0x38] sm:$0xff]  ;;  %7 = vst [vmem:[%s137_s1] sm:$0xff] %v5_v3  ;;  %67 = vst [vmem:[%s137_s1 + $0x8] sm:$0xff] %v20_v5  ;;  %v52_v14 = vxor.u32 2147483648, %v74_v12 }
   0x5   :  { %65 = vst [vmem:[%s137_s1 + $0x20] sm:$0xff] %v12_v4  ;;  %v60_v15 = vxor.u32 2147483648, %v76_v13  ;;  %69 = vst [vmem:[%s137_s1 + $0x28] sm:$0xff] %v28_v9 }
   0x6   :  { %71 = vst [vmem:[%s137_s1 + $0x10] sm:$0xff] %v36_v10  ;;  %73 = vst [vmem:[%s137_s1 + $0x30] sm:$0xff] %v44_v11 }
   0x7   :  { %75 = vst [vmem:[%s137_s1 + $0x18] sm:$0xff] %v52_v14  ;;  %77 = vst [vmem:[%s137_s1 + $0x38] sm:$0xff] %v60_v15 }

// kernel: network_forward.7
= control target key start
LH: loop header
LB: loop body
LE: loop exit
PB: predicated region body
PF: predicated region fallthrough
CT: control target
= control target key end

     0   :  { %vm39_vm0 = vcmask 1045504   ;;  %v1678_v2 = vmov 0.0   ;;  %vm32_vm1 = vcmask 48128   ;;  %vm218_vm2 = vcmask 130048   ;;  %s1679_s19 = smov 64   ;;  %s1680_s27 = smov 96   ;;  %s2006_s0 = inlined_call_operand.vmem [shape: f32[6,512], index: 0, kind: input, shape index: {}]   ;;  %s2007_s1 = inlined_call_operand.vmem [shape: f32[16,6], index: 1, kind: input, shape index: {}]   ;;  %s2008_s2 = inlined_call_operand.vmem [shape: f32[32,16], index: 2, kind: input, shape index: {}]   ;;  %s2009_s3 = inlined_call_operand.vmem [shape: f32[64,32], index: 3, kind: input, shape index: {}]   ;;  %s2010_s4 = inlined_call_operand.vmem [shape: f32[32,1], index: 4, kind: input, shape index: {}]   ;;  %s2011_s6 = inlined_call_operand.vmem [shape: f32[32,1], index: 6, kind: input, shape index: {}]   ;;  %s2012_s5 = inlined_call_operand.vmem [shape: f32[32,32], index: 5, kind: input, shape index: {}]   ;;  %s2013_s7 = inlined_call_operand.vmem [shape: f32[32,64], index: 7, kind: output, shape index: {}]  }
   0x1   :  { %v27_v0 = vld [vmem:[%s2006_s0 + $0x8] sm:$0x3f]  ;;  %v26_v1 = vld [vmem:[%s2006_s0] sm:$0x3f]  ;;  %116 = vmatprep.mubr.f32.mxu0 %v1678_v2  ;;  %122 = vmatprep.mubr.f32.mxu1 %v1678_v2  ;;  %v29_v5 = vld [vmem:[%s2006_s0 + $0x18] sm:$0x3f] }
   0x2   :  { %v30_v3 = vld [vmem:[%s2007_s1] sm:$0xff]  ;;  %1447 = vmatprep.subr.msk.mxu0 %vm39_vm0, %v27_v0  ;;  %1633 = vmatprep.subr.msk.mxu1 %vm39_vm0, %v27_v0  ;;  %v31_v4 = vld [vmem:[%s2007_s1 + $0x8] sm:$0xff]  ;;  %v28_v6 = vld [vmem:[%s2006_s0 + $0x10] sm:$0x3f]  ;;  %vm525_vm3 = vcmask 261120   ;;  %vm1438_vm4 = vcmask 523264  }
   0x3   :  { %1448 = vmatpush1.msk.msra.mxu0 %vm39_vm0, %v26_v1  ;;  %1634 = vmatpush1.msk.msra.mxu1 %vm39_vm0, %v26_v1  ;;  %v214_v17 = vld [vmem:[%s2008_s2] sm:$0xff]  ;;  %v215_v21 = vld [vmem:[%s2008_s2 + $0x8] sm:$0xff]  ;;  %v216_v25 = vld [vmem:[%s2008_s2 + $0x10] sm:$0xff] }
   0x4   :  { %1449 = vmatmul.mubr.msk.f32.vlgmr.msra.gmra.mxu0 %vm32_vm1, %v30_v3  ;;  %1450 = vmatmul.mubr.msk.f32.vlgmr.msra.gmra.mxu1 %vm32_vm1, %v31_v4  ;;  %v217_v26 = vld [vmem:[%s2008_s2 + $0x18] sm:$0xff]  ;;  %v517_v54 = vld [vmem:[%s2009_s3] sm:$0xff] }
   0x5   :  { %1451 = vmatprep.subr.msk.mxu1 %vm39_vm0, %v29_v5  ;;  %193 = vmatprep.mubr.f32.mxu1 %v1678_v2 }
   0x6   :  { %1452 = vmatpush1.msk.msra.mxu1 %vm39_vm0, %v28_v6  ;;  %295 = vmatprep.mubr.f32.mxu0 %v1678_v2 }
   0x8   :  { %1453 = vmatmul.mubr.msk.f32.vlgmr.msra.gmra.mxu1 %vm32_vm1, %v30_v3 }
   0x9   :  { %199 = vmatprep.mubr.f32.mxu1 %v1678_v2 }
   0xc   :  { %1454 = vmatmul.mubr.msk.f32.gmra.mxu1 %vm32_vm1, %v31_v4 }
   0xd   :  { %384 = vmatprep.mubr.f32.mxu1 %v1678_v2 }
  0xc4   :  { %v118_v7 = vpop.f32.mrf.mxu0  ;;  %v124_v8 = vpop.f32.mrf.mxu1 }
  0xc5   :  { %v210_v12 = vmax.f32 %v124_v8, 0.0  ;;  %v206_v15 = vmax.f32 %v118_v7, 0.0 }
  0xc6   :  { %v120_v9 = vpop.f32.mrf.mxu0  ;;  %v126_v10 = vpop.f32.mrf.mxu1 }
  0xc7   :  { %v211_v11 = vmax.f32 %v126_v10, 0.0  ;;  %v207_v14 = vmax.f32 %v120_v9, 0.0 }
  0xc8   :  { %v195_v13 = vpop.f32.mrf.mxu1 }
  0xc9   :  { %259 = vmatprep.subr.mxu0 %v211_v11  ;;  %v208_v24 = vmax.f32 %v195_v13, 0.0 }
  0xca   :  { %v197_v16 = vpop.f32.mrf.mxu1  ;;  %260 = vmatpush1.msra.mxu0 %v210_v12 }
  0xcb   :  { %261 = vmatprep.subr.mxu0 %v207_v14  ;;  %v209_v23 = vmax.f32 %v197_v16, 0.0 }
  0xcc   :  { %v201_v18 = vpop.f32.mrf.mxu1  ;;  %262 = vmatpush1.msra.mxu0 %v206_v15 }
  0xcd   :  { %1455 = vmatmul.mubr.msk.f32.vlgmr.msra.gmra.mxu0 %vm218_vm2, %v214_v17  ;;  %v212_v19 = vmax.f32 %v201_v18, 0.0 }
  0xce   :  { %v203_v20 = vpop.f32.mrf.mxu1  ;;  %301 = vmatprep.mubr.f32.mxu0 %v1678_v2 }
  0xcf   :  { %v213_v22 = vmax.f32 %v203_v20, 0.0 }
  0xd1   :  { %1456 = vmatmul.mubr.msk.f32.gmra.mxu0 %vm218_vm2, %v215_v21  ;;  %348 = vmatprep.subr.mxu1 %v213_v22 }
  0xd2   :  { %349 = vmatpush1.msra.mxu1 %v212_v19  ;;  %307 = vmatprep.mubr.f32.mxu0 %v1678_v2 }
  0xd3   :  { %350 = vmatprep.subr.mxu1 %v209_v23 }
  0xd4   :  { %351 = vmatpush1.msra.mxu1 %v208_v24 }
  0xd5   :  { %1457 = vmatmul.mubr.msk.f32.gmra.mxu0 %vm218_vm2, %v216_v25  ;;  %1459 = vmatmul.mubr.msk.f32.vlgmr.msra.gmra.mxu1 %vm218_vm2, %v214_v17 }
  0xd6   :  { %313 = vmatprep.mubr.f32.mxu0 %v1678_v2  ;;  %390 = vmatprep.mubr.f32.mxu1 %v1678_v2 }
  0xd9   :  { %1458 = vmatmul.mubr.msk.f32.gmra.mxu0 %vm218_vm2, %v217_v26  ;;  %1460 = vmatmul.mubr.msk.f32.gmra.mxu1 %vm218_vm2, %v215_v21 }
  0xda   :  { %396 = vmatprep.mubr.f32.mxu1 %v1678_v2  ;;  %1551 = vmatprep.mubr.msk.f32.mxu0 %vm525_vm3, %v517_v54 }
  0xdd   :  { %1461 = vmatmul.mubr.msk.f32.gmra.mxu1 %vm218_vm2, %v216_v25 }
  0xde   :  { %402 = vmatprep.mubr.f32.mxu1 %v1678_v2 }
  0xe1   :  { %1462 = vmatmul.mubr.msk.f32.gmra.mxu1 %vm218_vm2, %v217_v26 }
 0x18d   :  { %v1783_v27 = vpop.f32.mrf.mxu0 }
 0x18e   :  { %v409_v28 = vmax.f32 %v1783_v27, 0.0 }
 0x18f   :  { %v1786_v29 = vpop.f32.mrf.mxu0 }
 0x190   :  { %429 = vrot.lane.b32.xlu0 %v409_v28, %s1679_s19  ;;  %v410_v49 = vmax.f32 %v1786_v29, 0.0 }
 0x191   :  { %v303_v30 = vpop.f32.mrf.mxu0 }
 0x192   :  { %v413_v31 = vmax.f32 %v303_v30, 0.0 }
 0x193   :  { %v305_v32 = vpop.f32.mrf.mxu0 }
 0x194   :  { %v414_v33 = vmax.f32 %v305_v32, 0.0  ;;  %431 = vrot.lane.b32.xlu1 %v413_v31, %s1679_s19 }
 0x195   :  { %v309_v34 = vpop.f32.mrf.mxu0  ;;  %v1790_v35 = vpop.f32.mrf.mxu1 }
 0x196   :  { %455 = vrot.lane.b32.xlu0 %v414_v33, %s1679_s19  ;;  %v417_v38 = vmax.f32 %v309_v34, 0.0  ;;  %v411_v52 = vmax.f32 %v1790_v35, 0.0 }
 0x197   :  { %v311_v36 = vpop.f32.mrf.mxu0  ;;  %v1793_v37 = vpop.f32.mrf.mxu1 }
 0x198   :  { %v418_v39 = vmax.f32 %v311_v36, 0.0  ;;  %v412_v59 = vmax.f32 %v1793_v37, 0.0 }
 0x199   :  { %v315_v40 = vpop.f32.mrf.mxu0  ;;  %v1795_v41 = vpop.f32.mrf.mxu1 }
 0x19a   :  { %433 = vrot.lane.b32.xlu0 %v417_v38, %s1679_s19  ;;  %457 = vrot.lane.b32.xlu1 %v418_v39, %s1679_s19  ;;  %v421_v44 = vmax.f32 %v315_v40, 0.0  ;;  %v415_v55 = vmax.f32 %v1795_v41, 0.0  ;;  %v518_v40 = vld [vmem:[%s2009_s3 + $0x8] sm:$0xff]  ;;  %v519_v41 = vld [vmem:[%s2009_s3 + $0x10] sm:$0xff] }
 0x19b   :  { %v317_v42 = vpop.f32.mrf.mxu0  ;;  %v1799_v43 = vpop.f32.mrf.mxu1 }
 0x19c   :  { %v422_v45 = vmax.f32 %v317_v42, 0.0  ;;  %v416_v57 = vmax.f32 %v1799_v43, 0.0  ;;  %v520_v42 = vld [vmem:[%s2009_s3 + $0x18] sm:$0xff] }
 0x19d   :  { %v398_v46 = vpop.f32.mrf.mxu1 }
 0x19e   :  { %v419_v47 = vmax.f32 %v398_v46, 0.0  ;;  %435 = vrot.lane.b32.xlu0 %v421_v44, %s1679_s19  ;;  %459 = vrot.lane.b32.xlu1 %v422_v45, %s1679_s19 }
 0x19f   :  { %v400_v48 = vpop.f32.mrf.mxu1 }
 0x1a0   :  { %v420_v58 = vmax.f32 %v400_v48, 0.0  ;;  %v522_v48 = vld [vmem:[%s2009_s3 + $0x28] sm:$0xff] }
 0x1a1   :  { %v404_v50 = vpop.f32.mrf.mxu1 }
 0x1a2   :  { %v423_v51 = vmax.f32 %v404_v50, 0.0  ;;  %453 = vrot.lane.b32.xlu0 %v410_v49, %s1679_s19  ;;  %481 = vrot.lane.b32.xlu1 %v419_v47, %s1679_s19  ;;  %v524_v50 = vld [vmem:[%s2009_s3 + $0x38] sm:$0xff] }
 0x1a3   :  { %v406_v53 = vpop.f32.mrf.mxu1 }
 0x1a4   :  { %v424_v56 = vmax.f32 %v406_v53, 0.0 }
 0x1a6   :  { %477 = vrot.lane.b32.xlu0 %v411_v52, %s1679_s19  ;;  %483 = vrot.lane.b32.xlu1 %v423_v51, %s1679_s19 }
 0x1aa   :  { %479 = vrot.lane.b32.xlu0 %v415_v55, %s1679_s19  ;;  %507 = vrot.lane.b32.xlu1 %v424_v56, %s1679_s19 }
 0x1ae   :  { %503 = vrot.lane.b32.xlu0 %v416_v57, %s1679_s19  ;;  %505 = vrot.lane.b32.xlu1 %v420_v58, %s1679_s19 }
 0x1b2   :  { %501 = vrot.lane.b32.xlu1 %v412_v59, %s1679_s19 }
 0x202   :  { %v430_v60 = vpop.permute.xlu0 %429 }
 0x203   :  { %v441_v6 = vmax.f32 %v409_v28, %v430_v60 }
 0x205   :  { %v445_v14 = vmax.f32 %v441_v6, %v410_v49  ;;  %v523_v49 = vld [vmem:[%s2009_s3 + $0x30] sm:$0xff] }
 0x206   :  { %v432_v61 = vpop.permute.xlu1 %431 }
 0x207   :  { %v442_v2 = vmax.f32 %v413_v31, %v432_v61 }
 0x208   :  { %v456_v62 = vpop.permute.xlu0 %455 }
 0x209   :  { %v446_v8 = vmax.f32 %v442_v2, %v414_v33 }
 0x20b   :  { %v466_v15 = vmax.f32 %v446_v8, %v456_v62 }
 0x20c   :  { %v434_v63 = vpop.permute.xlu0 %433  ;;  %v458_v0 = vpop.permute.xlu1 %457 }
 0x20d   :  { %v443_v1 = vmax.f32 %v417_v38, %v434_v63  ;;  %v470_v24 = vmax.f32 %v466_v15, %v415_v55  ;;  %v1681_v63 = vmov 0  }
 0x20f   :  { %v447_v3 = vmax.f32 %v443_v1, %v418_v39 }
 0x210   :  { %v436_v4 = vpop.permute.xlu0 %435  ;;  %v460_v5 = vpop.permute.xlu1 %459 }
 0x211   :  { %v444_v7 = vmax.f32 %v421_v44, %v436_v4  ;;  %v467_v9 = vmax.f32 %v447_v3, %v458_v0 }
 0x213   :  { %v448_v10 = vmax.f32 %v444_v7, %v422_v45  ;;  %v471_v17 = vmax.f32 %v467_v9, %v419_v47  ;;  %v521_v47 = vld [vmem:[%s2009_s3 + $0x20] sm:$0xff] }
 0x214   :  { %v454_v11 = vpop.permute.xlu0 %453  ;;  %v482_v12 = vpop.permute.xlu1 %481 }
 0x215   :  { %v468_v13 = vmax.f32 %v448_v10, %v460_v5  ;;  %v465_v16 = vmax.f32 %v445_v14, %v454_v11  ;;  %v491_v22 = vmax.f32 %v471_v17, %v482_v12 }
 0x217   :  { %v472_v18 = vmax.f32 %v468_v13, %v423_v51  ;;  %v469_v23 = vmax.f32 %v465_v16, %v411_v52  ;;  %v495_v32 = vmax.f32 %v491_v22, %v420_v58 }
 0x218   :  { %v478_v19 = vpop.permute.xlu0 %477  ;;  %v484_v20 = vpop.permute.xlu1 %483 }
 0x219   :  { %v492_v21 = vmax.f32 %v472_v18, %v484_v20  ;;  %v489_v30 = vmax.f32 %v469_v23, %v478_v19  ;;  %v655_v18 = vld [vmem:[%s2010_s4] sm:$0xff] }
 0x21b   :  { %v496_v25 = vmax.f32 %v492_v21, %v424_v56  ;;  %v493_v37 = vmax.f32 %v489_v30, %v412_v59 }
 0x21c   :  { %v480_v26 = vpop.permute.xlu0 %479  ;;  %v508_v27 = vpop.permute.xlu1 %507 }
 0x21d   :  { %v490_v28 = vmax.f32 %v470_v24, %v480_v26  ;;  %v1821_v29 = vmax.f32 %v496_v25, %v508_v27 }
 0x21f   :  { %1543 = vmatprep.subr.mxu0 %v1821_v29  ;;  %v494_v31 = vmax.f32 %v490_v28, %v416_v57 }
 0x220   :  { %v504_v33 = vpop.permute.xlu0 %503  ;;  %v506_v34 = vpop.permute.xlu1 %505  ;;  %1544 = vmatpush3.msra.mxu0 %v1821_v29 }
 0x221   :  { %v1825_v35 = vmax.f32 %v495_v32, %v506_v34  ;;  %v1827_v36 = vmax.f32 %v494_v31, %v504_v33 }
 0x223   :  { %1545 = vmatprep.subr.mxu0 %v1825_v35 }
 0x224   :  { %v502_v38 = vpop.permute.xlu1 %501  ;;  %1546 = vmatpush3.msra.mxu0 %v1825_v35 }
 0x225   :  { %v1831_v39 = vmax.f32 %v493_v37, %v502_v38  ;;  %1547 = vmatprep.subr.mxu0 %v1827_v36 }
 0x226   :  { %1548 = vmatpush3.msra.mxu0 %v1827_v36 }
 0x227   :  { %1549 = vmatprep.subr.mxu0 %v1831_v39 }
 0x228   :  { %1550 = vmatpush3.msra.mxu0 %v1831_v39 }
 0x229   :  { %1552 = vmatmul.mubr.msk.f32.vlgmr.msra.gmra.mxu0 %vm525_vm3, %v518_v40 }
 0x22a   :  { %1554 = vmatprep.mubr.msk.f32.mxu0 %vm525_vm3, %v519_v41 }
 0x22d   :  { %1555 = vmatmul.mubr.msk.f32.gmra.mxu0 %vm525_vm3, %v520_v42 }
 0x22e   :  { %1557 = vmatprep.mubr.msk.f32.mxu0 %vm525_vm3, %v521_v47 }
 0x231   :  { %1558 = vmatmul.mubr.msk.f32.gmra.mxu0 %vm525_vm3, %v522_v48 }
 0x232   :  { %1560 = vmatprep.mubr.msk.f32.mxu0 %vm525_vm3, %v523_v49 }
 0x235   :  { %1561 = vmatmul.mubr.msk.f32.gmra.mxu0 %vm525_vm3, %v524_v50 }
 0x2e9   :  { %v1553_v43 = vpop.f32.mrf.mxu0 }
 0x2ea   :  { %978 = vrot.lane.b32.xlu1 %v1553_v43, %s1680_s27 }
 0x2eb   :  { %v616_v44 = vpop.f32.mrf.mxu0 }
 0x2ec   :  { %976 = vrot.lane.b32.xlu0 %v616_v44, %s1680_s27 }
 0x2ed   :  { %v1556_v45 = vpop.f32.mrf.mxu0 }
 0x2ee   :  { %982 = vrot.lane.b32.xlu1 %v1556_v45, %s1680_s27  ;;  %1563 = vmatprep.subr.mxu1 %v1556_v45 }
 0x2ef   :  { %v626_v46 = vpop.f32.mrf.mxu0  ;;  %1564 = vmatpush3.msra.mxu1 %v1556_v45 }
 0x2f0   :  { %980 = vrot.lane.b32.xlu0 %v626_v46, %s1680_s27  ;;  %1565 = vmatprep.subr.mxu1 %v626_v46 }
 0x2f1   :  { %1566 = vmatpush3.msra.mxu1 %v626_v46  ;;  %v1881_v8 = vpop.f32.mrf.mxu0 }
 0x2f2   :  { %1567 = vmatprep.subr.mxu1 %v1553_v43 }
 0x2f3   :  { %1568 = vmatpush3.msra.mxu1 %v1553_v43  ;;  %v636_v9 = vpop.f32.mrf.mxu0 }
 0x2f4   :  { %1569 = vmatprep.subr.mxu1 %v616_v44 }
 0x2f5   :  { %1570 = vmatpush3.msra.mxu1 %v616_v44  ;;  %v1883_v10 = vpop.f32.mrf.mxu0 }
 0x2f7   :  { %v1885_v11 = vpop.f32.mrf.mxu0 }
 0x30e   :  { %683 = vxpose.xlu0.b32.start [1/4] (short) (narrow) %v616_v44, 32 }
 0x312   :  { %684 = vxpose.xlu0.b32.cont [2/4] (short) (narrow) %v1553_v43, 32 }
 0x316   :  { %685 = vxpose.xlu0.b32.cont [3/4] (short) (narrow) %v626_v46, 32 }
 0x31a   :  { %686 = vxpose.xlu0.b32.end [4/4] (short) (narrow) %v1556_v45, 32 }
 0x343   :  { %1641 = vset.pattern.permute.xlu0 %v1681_v63 }
 0x35c   :  { %v979_v51 = vpop.permute.xlu1 %978 }
 0x35e   :  { %v977_v52 = vpop.permute.xlu0 %976 }
 0x35f   :  { %988 = vxpose.xlu1.b32.start [1/4] (short) (narrow) %v977_v52, 32 }
 0x360   :  { %v983_v53 = vpop.permute.xlu1 %982 }
 0x361   :  { %1591 = vmatprep.subr.mxu0 %v983_v53 }
 0x362   :  { %1592 = vmatpush3.msra.mxu0 %v983_v53  ;;  %v981_v54 = vpop.permute.xlu0 %980 }
 0x363   :  { %989 = vxpose.xlu1.b32.cont [2/4] (short) (narrow) %v979_v51, 32  ;;  %1593 = vmatprep.subr.mxu0 %v981_v54 }
 0x364   :  { %1594 = vmatpush3.msra.mxu0 %v981_v54 }
 0x365   :  { %1595 = vmatprep.subr.mxu0 %v979_v51 }
 0x366   :  { %1596 = vmatpush3.msra.mxu0 %v979_v51 }
 0x367   :  { %1597 = vmatprep.subr.mxu0 %v977_v52  ;;  %990 = vxpose.xlu1.b32.cont [3/4] (short) (narrow) %v981_v54, 32 }
 0x368   :  { %1598 = vmatpush3.msra.mxu0 %v977_v52 }
 0x36b   :  { %991 = vxpose.xlu1.b32.end [4/4] (short) (narrow) %v983_v53, 32 }
 0x389   :  { %1640 = vset.pattern.permute.xlu1 %v1681_v63  ;;  %v656_v63 = vld [vmem:[%s2010_s4 + $0x8] sm:$0xff] }
 0x38a   :  { %v699_v55 = vpop.trf.xlu0 }
 0x38b   :  { %1571 = vmatprep.mubr.msk.f32.mxu1 %vm525_vm3, %v699_v55 }
 0x38e   :  { %v700_v56 = vpop.trf.xlu0 }
 0x38f   :  { %1572 = vmatmul.mubr.msk.f32.vlgmr.msra.gmra.mxu1 %vm525_vm3, %v700_v56 }
 0x392   :  { %v701_v57 = vpop.trf.xlu0 }
 0x393   :  { %1574 = vmatprep.mubr.msk.f32.mxu1 %vm525_vm3, %v701_v57 }
 0x396   :  { %v702_v58 = vpop.trf.xlu0 }
 0x397   :  { %1575 = vmatmul.mubr.msk.f32.gmra.mxu1 %vm525_vm3, %v702_v58 }
 0x3db   :  { %v1004_v59 = vpop.trf.xlu1 }
 0x3dc   :  { %1599 = vmatprep.mubr.msk.f32.mxu0 %vm525_vm3, %v1004_v59 }
 0x3df   :  { %v1005_v60 = vpop.trf.xlu1 }
 0x3e0   :  { %1600 = vmatmul.mubr.msk.f32.vlgmr.msra.gmra.mxu0 %vm525_vm3, %v1005_v60 }
 0x3e3   :  { %v1006_v61 = vpop.trf.xlu1 }
 0x3e4   :  { %1602 = vmatprep.mubr.msk.f32.mxu0 %vm525_vm3, %v1006_v61 }
 0x3e7   :  { %v1007_v62 = vpop.trf.xlu1 }
 0x3e8   :  { %1603 = vmatmul.mubr.msk.f32.gmra.mxu0 %vm525_vm3, %v1007_v62  ;;  %v657_v62 = vld [vmem:[%s2010_s4 + $0x10] sm:$0xff] }
 0x44f   :  { %v1573_v0 = vpop.f32.mrf.mxu1 }
 0x450   :  { %v815_v1 = vsel %vm525_vm3, %v1573_v0, -inf }
 0x451   :  { %816 = vmax.xlane.f32.xlu1 %v815_v1  ;;  %v793_v2 = vpop.f32.mrf.mxu1 }
 0x452   :  { %v812_v3 = vsel %vm525_vm3, %v793_v2, -inf }
 0x453   :  { %813 = vmax.xlane.f32.xlu0 %v812_v3 }
 0x457   :  { %v1576_v4 = vpop.f32.mrf.mxu1 }
 0x458   :  { %v821_v7 = vsel %vm525_vm3, %v1576_v4, -inf }
 0x459   :  { %v803_v5 = vpop.f32.mrf.mxu1 }
 0x45a   :  { %v818_v6 = vsel %vm525_vm3, %v803_v5, -inf }
 0x45b   :  { %819 = vmax.xlane.f32.xlu0 %v818_v6 }
 0x45f   :  { %822 = vmax.xlane.f32.xlu0 %v821_v7 }
 0x4a0   :  { %v1601_v12 = vpop.f32.mrf.mxu0 }
 0x4a1   :  { %v1120_v13 = vsel %vm525_vm3, %v1601_v12, -inf }
 0x4a2   :  { %1121 = vmax.xlane.f32.xlu0 %v1120_v13  ;;  %v1098_v14 = vpop.f32.mrf.mxu0 }
 0x4a3   :  { %v1117_v15 = vsel %vm525_vm3, %v1098_v14, -inf }
 0x4a4   :  { %1118 = vmax.xlane.f32.xlu1 %v1117_v15 }
 0x4a8   :  { %v1604_v16 = vpop.f32.mrf.mxu0 }
 0x4a9   :  { %v1126_v17 = vsel %vm525_vm3, %v1604_v16, -inf }
 0x4aa   :  { %1127 = vmax.xlane.f32.xlu0 %v1126_v17  ;;  %v1108_v19 = vpop.f32.mrf.mxu0 }
 0x4ab   :  { %v1123_v20 = vsel %vm525_vm3, %v1108_v19, -inf }
 0x4b5   :  { %661 = vperm.xlu1 %1640, %v655_v18  }
 0x4d9   :  { %1124 = vmax.xlane.f32.xlu1 %v1123_v20 }
 0x4da   :  { %v817_v21 = vpop.xlane.xlu1 %816 }
 0x4db   :  { %v825_v22 = vsub.f32 %v1573_v0, %v817_v21 }
 0x4dc   :  { %v814_v23 = vpop.xlane.xlu0 %813 }
 0x4dd   :  { %v830_v24 = vmul.f32 1.442695, %v825_v22  ;;  %v824_v25 = vsub.f32 %v793_v2, %v814_v23 }
 0x4df   :  { %1642 = vpow2.f32 %v830_v24  ;;  %v828_v26 = vmul.f32 1.442695, %v824_v25 }
 0x4e1   :  { %1644 = vpow2.f32 %v828_v26 }
 0x4e4   :  { %v820_v27 = vpop.xlane.xlu0 %819 }
 0x4e5   :  { %v826_v28 = vsub.f32 %v803_v5, %v820_v27 }
 0x4e7   :  { %v832_v30 = vmul.f32 1.442695, %v826_v28 }
 0x4e8   :  { %v823_v31 = vpop.xlane.xlu0 %822 }
 0x4e9   :  { %1646 = vpow2.f32 %v832_v30  ;;  %v827_v32 = vsub.f32 %v1576_v4, %v823_v31 }
 0x4eb   :  { %v834_v33 = vmul.f32 1.442695, %v827_v32 }
 0x4ec   :  { %v1643_v34 = vpop.eup %1642 }
 0x4ed   :  { %1648 = vpow2.f32 %v834_v33  ;;  %v839_v37 = vsel %vm525_vm3, %v1643_v34, 0.0 }
 0x4ee   :  { %v1645_v38 = vpop.eup %1644  ;;  %840 = vadd.xlane.f32.xlu0 %v839_v37 }
 0x4ef   :  { %v836_v40 = vsel %vm525_vm3, %v1645_v38, 0.0 }
 0x4f0   :  { %837 = vadd.xlane.f32.xlu1 %v836_v40 }
 0x4f6   :  { %v1647_v41 = vpop.eup %1646 }
 0x4f7   :  { %v842_v42 = vsel %vm525_vm3, %v1647_v41, 0.0 }
 0x4f8   :  { %843 = vadd.xlane.f32.xlu1 %v842_v42 }
 0x4fa   :  { %v1649_v43 = vpop.eup %1648 }
 0x4fb   :  { %v845_v44 = vsel %vm525_vm3, %v1649_v43, 0.0 }
 0x4fc   :  { %846 = vadd.xlane.f32.xlu0 %v845_v44 }
 0x52b   :  { %v1122_v45 = vpop.xlane.xlu0 %1121 }
 0x52c   :  { %v1130_v46 = vsub.f32 %v1601_v12, %v1122_v45 }
 0x52d   :  { %v1119_v47 = vpop.xlane.xlu1 %1118 }
 0x52e   :  { %v1135_v48 = vmul.f32 1.442695, %v1130_v46  ;;  %v1129_v49 = vsub.f32 %v1098_v14, %v1119_v47 }
 0x530   :  { %1650 = vpow2.f32 %v1135_v48  ;;  %v1133_v50 = vmul.f32 1.442695, %v1129_v49 }
 0x531   :  { %v662_v51 = vpop.permute.xlu1 %661 }
 0x532   :  { %1652 = vpow2.f32 %v1133_v50  ;;  %v679_v52 = vadd.f32 %v662_v51, %v636_v9  ;;  %v658_v9 = vld [vmem:[%s2010_s4 + $0x18] sm:$0xff]  ;;  %s1682_s4 = smov 32  }
 0x533   :  { %v1128_v53 = vpop.xlane.xlu0 %1127 }
 0x534   :  { %v1132_v54 = vsub.f32 %v1604_v16, %v1128_v53  ;;  %1585 = vmatprep.mubr.msk.f32.mxu1 %vm525_vm3, %v679_v52 }
 0x536   :  { %v1139_v55 = vmul.f32 1.442695, %v1132_v54 }
 0x538   :  { %1654 = vpow2.f32 %v1139_v55 }
 0x53d   :  { %v1899_v56 = vpop.eup %1650 }
 0x53e   :  { %v1144_v57 = vsel %vm525_vm3, %v1899_v56, 0.0 }
 0x53f   :  { %v1903_v58 = vpop.eup %1652  ;;  %1145 = vadd.xlane.f32.xlu0 %v1144_v57 }
 0x540   :  { %v1141_v59 = vsel %vm525_vm3, %v1903_v58, 0.0 }
 0x541   :  { %1142 = vadd.xlane.f32.xlu1 %v1141_v59 }
 0x545   :  { %v1907_v60 = vpop.eup %1654 }
 0x546   :  { %v1150_v61 = vsel %vm525_vm3, %v1907_v60, 0.0 }
 0x547   :  { %1151 = vadd.xlane.f32.xlu0 %v1150_v61 }
 0x552   :  { %671 = vperm.xlu1 %1640, %v657_v62  }
 0x55d   :  { %666 = vperm.xlu0 %1641, %v656_v63  }
 0x562   :  { %v1125_v0 = vpop.xlane.xlu1 %1124 }
 0x563   :  { %v1131_v1 = vsub.f32 %v1108_v19, %v1125_v0 }
 0x565   :  { %v1137_v2 = vmul.f32 1.442695, %v1131_v1 }
 0x567   :  { %1656 = vpow2.f32 %v1137_v2 }
 0x574   :  { %v1917_v3 = vpop.eup %1656 }
 0x575   :  { %v1147_v4 = vsel %vm525_vm3, %v1917_v3, 0.0 }
 0x576   :  { %1148 = vadd.xlane.f32.xlu1 %v1147_v4 }
 0x577   :  { %v841_v6 = vpop.xlane.xlu0 %840 }
 0x579   :  { %v838_v5 = vpop.xlane.xlu1 %837 }
 0x57a   :  { %1658 = vrcp.f32 %v838_v5 }
 0x57b   :  { %1660 = vrcp.f32 %v841_v6 }
 0x581   :  { %v844_v7 = vpop.xlane.xlu1 %843 }
 0x582   :  { %1662 = vrcp.f32 %v844_v7 }
 0x585   :  { %v847_v12 = vpop.xlane.xlu0 %846 }
 0x586   :  { %1664 = vrcp.f32 %v847_v12 }
 0x587   :  { %676 = vperm.xlu1 %1640, %v658_v9   ;;  %v1659_v13 = vpop.eup %1658 }
 0x588   :  { %v1661_v14 = vpop.eup %1660  ;;  %v852_v15 = vmul.f32 %v1659_v13, %v1645_v38 }
 0x589   :  { %v853_v16 = vmul.f32 %v1661_v14, %v1643_v34 }
 0x58a   :  { %v856_v19 = vsel %vm525_vm3, %v852_v15, 0.0 }
 0x58b   :  { %1180 = vrot.lane.b32.xlu1 %v679_v52, %s1680_s27  ;;  %v857_v20 = vsel %vm525_vm3, %v853_v16, 0.0 }
 0x58c   :  { %v858_v23 = vadd.f32 %v857_v20, %v856_v19 }
 0x58f   :  { %v1663_v17 = vpop.eup %1662 }
 0x590   :  { %v854_v18 = vmul.f32 %v1663_v17, %v1647_v41 }
 0x592   :  { %v859_v21 = vsel %vm525_vm3, %v854_v18, 0.0 }
 0x593   :  { %v1665_v22 = vpop.eup %1664  ;;  %v860_v25 = vadd.f32 %v859_v21, %v858_v23 }
 0x594   :  { %v855_v24 = vmul.f32 %v1665_v22, %v1649_v43 }
 0x596   :  { %v861_v26 = vsel %vm525_vm3, %v855_v24, 0.0 }
 0x597   :  { %v862_v27 = vadd.f32 %v861_v26, %v860_v25  ;;  %v1309_v26 = vld [vmem:[%s2011_s6] sm:$0xff] }
 0x599   :  { %v863_v28 = vrot.slane %v862_v27, 4 }
 0x59b   :  { %v864_v30 = vadd.f32 %v863_v28, %v862_v27  ;;  %v1311_v27 = vld [vmem:[%s2011_s6 + $0x10] sm:$0xff] }
 0x59d   :  { %v865_v31 = vrot.slane %v864_v30, 2 }
 0x59f   :  { %v866_v32 = vadd.f32 %v865_v31, %v864_v30  ;;  %v1301_v30 = vld [vmem:[%s2012_s5] sm:$0xff] }
 0x5a0   :  { %1627 = vmatprep.mubr.msk.f32.mxu0 %vm525_vm3, %v1301_v30 }
 0x5a1   :  { %v867_v33 = vrot.slane %v866_v32, 1 }
 0x5a3   :  { %v868_v34 = vadd.f32 %v867_v33, %v866_v32  ;;  %v1310_v33 = vld [vmem:[%s2011_s6 + $0x8] sm:$0xff] }
 0x5a5   :  { %v869_v37 = vadd.f32 1e-09, %v868_v34  ;;  %v1312_v34 = vld [vmem:[%s2011_s6 + $0x18] sm:$0xff] }
 0x5a7   :  { %1666 = vrcp.f32 %v869_v37 }
 0x5b4   :  { %v1667_v38 = vpop.eup %1666 }
 0x5b5   :  { %v874_v40 = vmul.f32 %v1667_v38, %v855_v24  ;;  %v873_v41 = vmul.f32 %v1667_v38, %v854_v18  ;;  %v872_v42 = vmul.f32 %v1667_v38, %v853_v16  ;;  %v871_v43 = vmul.f32 %v1667_v38, %v852_v15 }
 0x5b7   :  { %1577 = vmatprep.subr.mxu1 %v874_v40 }
 0x5b8   :  { %1578 = vmatpush3.msra.mxu1 %v874_v40 }
 0x5b9   :  { %1579 = vmatprep.subr.mxu1 %v873_v41 }
 0x5ba   :  { %1580 = vmatpush3.msra.mxu1 %v873_v41 }
 0x5bb   :  { %1581 = vmatprep.subr.mxu1 %v872_v42 }
 0x5bc   :  { %1582 = vmatpush3.msra.mxu1 %v872_v42 }
 0x5bd   :  { %1583 = vmatprep.subr.mxu1 %v871_v43 }
 0x5be   :  { %1584 = vmatpush3.msra.mxu1 %v871_v43 }
 0x5c8   :  { %v1146_v44 = vpop.xlane.xlu0 %1145 }
 0x5ca   :  { %v1143_v45 = vpop.xlane.xlu1 %1142 }
 0x5cb   :  { %1668 = vrcp.f32 %v1143_v45 }
 0x5cc   :  { %1670 = vrcp.f32 %v1146_v44 }
 0x5ce   :  { %v672_v47 = vpop.permute.xlu1 %671 }
 0x5cf   :  { %v681_v50 = vadd.f32 %v672_v47, %v1885_v11 }
 0x5d0   :  { %v1152_v46 = vpop.xlane.xlu0 %1151 }
 0x5d1   :  { %1672 = vrcp.f32 %v1152_v46 }
 0x5d8   :  { %v667_v48 = vpop.permute.xlu0 %666  ;;  %v1669_v54 = vpop.eup %1668 }
 0x5d9   :  { %v680_v49 = vadd.f32 %v1881_v8, %v667_v48  ;;  %v1671_v8 = vpop.eup %1670  ;;  %v1157_v55 = vmul.f32 %v1669_v54, %v1903_v58 }
 0x5da   :  { %v1158_v57 = vmul.f32 %v1671_v8, %v1899_v56 }
 0x5db   :  { %1182 = vrot.lane.b32.xlu1 %v680_v49, %s1680_s27  ;;  %1586 = vmatmul.mubr.msk.f32.vlgmr.msra.gmra.mxu1 %vm525_vm3, %v680_v49  ;;  %v1161_v61 = vsel %vm525_vm3, %v1157_v55, 0.0 }
 0x5dc   :  { %1588 = vmatprep.mubr.msk.f32.mxu1 %vm525_vm3, %v681_v50  ;;  %v1162_v0 = vsel %vm525_vm3, %v1158_v57, 0.0 }
 0x5dd   :  { %v1163_v1 = vadd.f32 %v1162_v0, %v1161_v61 }
 0x5de   :  { %v1673_v59 = vpop.eup %1672 }
 0x5df   :  { %1184 = vrot.lane.b32.xlu1 %v681_v50, %s1680_s27  ;;  %v1302_v50 = vld [vmem:[%s2012_s5 + $0x8] sm:$0xff] }
 0x5ff   :  { %v1149_v51 = vpop.xlane.xlu1 %1148 }
 0x600   :  { %1674 = vrcp.f32 %v1149_v51  ;;  %v1303_v51 = vld [vmem:[%s2012_s5 + $0x10] sm:$0xff] }
 0x603   :  { %v677_v52 = vpop.permute.xlu1 %676 }
 0x604   :  { %v682_v53 = vadd.f32 %v1883_v10, %v677_v52  ;;  %v1160_v10 = vmul.f32 %v1673_v59, %v1907_v60  ;;  %v1304_v52 = vld [vmem:[%s2012_s5 + $0x18] sm:$0xff] }
 0x606   :  { %1186 = vrot.lane.b32.xlu1 %v682_v53, %s1680_s27  ;;  %1589 = vmatmul.mubr.msk.f32.gmra.mxu1 %vm525_vm3, %v682_v53  ;;  %v1166_v58 = vsel %vm525_vm3, %v1160_v10, 0.0 }
 0x607   :  { %v1181_v11 = vpop.permute.xlu1 %1180 }
 0x608   :  { %1613 = vmatprep.mubr.msk.f32.mxu1 %vm525_vm3, %v1181_v11 }
 0x60d   :  { %v1675_v62 = vpop.eup %1674 }
 0x60e   :  { %v1159_v63 = vmul.f32 %v1675_v62, %v1917_v3 }
 0x610   :  { %v1164_v2 = vsel %vm525_vm3, %v1159_v63, 0.0 }
 0x611   :  { %v1165_v4 = vadd.f32 %v1164_v2, %v1163_v1 }
 0x613   :  { %v1167_v5 = vadd.f32 %v1166_v58, %v1165_v4 }
 0x615   :  { %v1168_v6 = vrot.slane %v1167_v5, 4 }
 0x617   :  { %v1169_v7 = vadd.f32 %v1168_v6, %v1167_v5 }
 0x619   :  { %v1170_v56 = vrot.slane %v1169_v7, 2 }
 0x61b   :  { %v1171_v9 = vadd.f32 %v1170_v56, %v1169_v7 }
 0x61d   :  { %v1172_v12 = vrot.slane %v1171_v9, 1 }
 0x61f   :  { %v1173_v13 = vadd.f32 %v1172_v12, %v1171_v9 }
 0x621   :  { %v1174_v14 = vadd.f32 1e-09, %v1173_v13 }
 0x623   :  { %1676 = vrcp.f32 %v1174_v14 }
 0x630   :  { %v1677_v3 = vpop.eup %1676 }
 0x631   :  { %v1179_v15 = vmul.f32 %v1677_v3, %v1160_v10  ;;  %v1178_v60 = vmul.f32 %v1677_v3, %v1159_v63  ;;  %v1177_v16 = vmul.f32 %v1677_v3, %v1158_v57  ;;  %v1176_v17 = vmul.f32 %v1677_v3, %v1157_v55 }
 0x633   :  { %1605 = vmatprep.subr.mxu1 %v1179_v15 }
 0x634   :  { %1606 = vmatpush3.msra.mxu1 %v1179_v15 }
 0x635   :  { %1607 = vmatprep.subr.mxu1 %v1178_v60 }
 0x636   :  { %1608 = vmatpush3.msra.mxu1 %v1178_v60 }
 0x637   :  { %1609 = vmatprep.subr.mxu1 %v1177_v16 }
 0x638   :  { %1610 = vmatpush3.msra.mxu1 %v1177_v16 }
 0x639   :  { %1611 = vmatprep.subr.mxu1 %v1176_v17 }
 0x63a   :  { %1612 = vmatpush3.msra.mxu1 %v1176_v17 }
 0x64d   :  { %v1183_v18 = vpop.permute.xlu1 %1182 }
 0x64e   :  { %1614 = vmatmul.mubr.msk.f32.vlgmr.msra.gmra.mxu1 %vm525_vm3, %v1183_v18 }
 0x651   :  { %v1185_v19 = vpop.permute.xlu1 %1184 }
 0x652   :  { %1616 = vmatprep.mubr.msk.f32.mxu1 %vm525_vm3, %v1185_v19 }
 0x678   :  { %v1187_v20 = vpop.permute.xlu1 %1186 }
 0x679   :  { %1617 = vmatmul.mubr.msk.f32.gmra.mxu1 %vm525_vm3, %v1187_v20 }
 0x69b   :  { %v1587_v21 = vpop.f32.mrf.mxu1 }
 0x69d   :  { %v953_v22 = vpop.f32.mrf.mxu1 }
 0x6c6   :  { %v1590_v23 = vpop.f32.mrf.mxu1 }
 0x6c8   :  { %v963_v24 = vpop.f32.mrf.mxu1 }
 0x70e   :  { %v1615_v25 = vpop.f32.mrf.mxu1 }
 0x70f   :  { %1287 = vrot.lane.b32.xlu0 %v1615_v25, %s1682_s4 }
 0x710   :  { %v1262_v28 = vpop.f32.mrf.mxu1 }
 0x713   :  { %1315 = vperm.xlu0 %1641, %v1309_v26  }
 0x717   :  { %1325 = vperm.xlu0 %1641, %v1311_v27  }
 0x739   :  { %v1618_v31 = vpop.f32.mrf.mxu1 }
 0x73a   :  { %1291 = vrot.lane.b32.xlu1 %v1618_v31, %s1682_s4 }
 0x73b   :  { %v1272_v32 = vpop.f32.mrf.mxu1 }
 0x73e   :  { %1289 = vrot.lane.b32.xlu1 %v1272_v32, %s1682_s4 }
 0x742   :  { %1285 = vrot.lane.b32.xlu1 %v1262_v28, %s1682_s4 }
 0x746   :  { %1320 = vperm.xlu1 %1640, %v1310_v33  }
 0x74a   :  { %1330 = vperm.xlu1 %1640, %v1312_v34  }
 0x781   :  { %v1288_v40 = vpop.permute.xlu0 %1287 }
 0x782   :  { %v1298_v43 = vsel %vm525_vm3, %v1587_v21, %v1288_v40 }
 0x783   :  { %v1306_v46 = vsub.f32 %v1827_v36, %v1298_v43 }
 0x78e   :  { %v1316_v54 = vpop.permute.xlu0 %1315 }
 0x792   :  { %v1326_v1 = vpop.permute.xlu0 %1325 }
 0x7ac   :  { %v1292_v37 = vpop.permute.xlu1 %1291 }
 0x7ad   :  { %v1300_v38 = vsel %vm525_vm3, %v1590_v23, %v1292_v37 }
 0x7ae   :  { %v1308_v41 = vsub.f32 %v1821_v29, %v1300_v38 }
 0x7b0   :  { %1619 = vmatprep.subr.mxu0 %v1308_v41  ;;  %v1290_v42 = vpop.permute.xlu1 %1289 }
 0x7b1   :  { %v1299_v44 = vsel %vm525_vm3, %v963_v24, %v1290_v42  ;;  %1620 = vmatpush3.msra.mxu0 %v1308_v41 }
 0x7b2   :  { %v1307_v45 = vsub.f32 %v1825_v35, %v1299_v44 }
 0x7b4   :  { %1621 = vmatprep.subr.mxu0 %v1307_v45  ;;  %v1286_v47 = vpop.permute.xlu1 %1285 }
 0x7b5   :  { %v1297_v48 = vsel %vm525_vm3, %v953_v22, %v1286_v47  ;;  %1622 = vmatpush3.msra.mxu0 %v1307_v45 }
 0x7b6   :  { %v1305_v49 = vsub.f32 %v1831_v39, %v1297_v48  ;;  %1623 = vmatprep.subr.mxu0 %v1306_v46 }
 0x7b7   :  { %1624 = vmatpush3.msra.mxu0 %v1306_v46 }
 0x7b8   :  { %1625 = vmatprep.subr.mxu0 %v1305_v49 }
 0x7b9   :  { %1626 = vmatpush3.msra.mxu0 %v1305_v49 }
 0x7ba   :  { %1628 = vmatmul.mubr.msk.f32.vlgmr.msra.gmra.mxu0 %vm525_vm3, %v1302_v50 }
 0x7bb   :  { %1630 = vmatprep.mubr.msk.f32.mxu0 %vm525_vm3, %v1303_v51 }
 0x7be   :  { %1631 = vmatmul.mubr.msk.f32.gmra.mxu0 %vm525_vm3, %v1304_v52 }
 0x7c1   :  { %v1321_v53 = vpop.permute.xlu1 %1320 }
 0x7c5   :  { %v1331_v61 = vpop.permute.xlu1 %1330 }
 0x87a   :  { %v1629_v8 = vpop.f32.mrf.mxu0 }
 0x87b   :  { %v1417_v11 = vadd.f32 %v1629_v8, %v1321_v53 }
 0x87c   :  { %v1411_v55 = vpop.f32.mrf.mxu0 }
 0x87d   :  { %v1431_v57 = vmax.f32 %v1417_v11, 0.0  ;;  %v1412_v59 = vadd.f32 %v1411_v55, %v1316_v54 }
 0x87e   :  { %v1632_v62 = vpop.f32.mrf.mxu0 }
 0x87f   :  { %v1435_v63 = vadd.f32 %v1431_v57, %v1827_v36  ;;  %v1430_v10 = vmax.f32 %v1412_v59, 0.0  ;;  %v1427_v0 = vadd.f32 %v1632_v62, %v1331_v61 }
 0x880   :  { %v1421_v2 = vpop.f32.mrf.mxu0 }
 0x881   :  { %1440 = vst.msk [vmem:[%s2013_s7 + $0x8] sm:$0xff] %vm1438_vm4, %v1435_v63  ;;  %v1434_v4 = vadd.f32 %v1430_v10, %v1831_v39  ;;  %v1433_v58 = vmax.f32 %v1427_v0, 0.0  ;;  %v1422_v5 = vadd.f32 %v1421_v2, %v1326_v1 }
 0x883   :  { %1439 = vst.msk [vmem:[%s2013_s7] sm:$0xff] %vm1438_vm4, %v1434_v4  ;;  %v1437_v36 = vadd.f32 %v1433_v58, %v1821_v29  ;;  %v1432_v6 = vmax.f32 %v1422_v5, 0.0 }
 0x885   :  { %1442 = vst.msk [vmem:[%s2013_s7 + $0x18] sm:$0xff] %vm1438_vm4, %v1437_v36  ;;  %v1436_v7 = vadd.f32 %v1432_v6, %v1825_v35 }
 0x887   :  { %1441 = vst.msk [vmem:[%s2013_s7 + $0x10] sm:$0xff] %vm1438_vm4, %v1436_v7 }

// kernel: neg.8
= control target key start
LH: loop header
LB: loop body
LE: loop exit
PB: predicated region body
PF: predicated region fallthrough
CT: control target
= control target key end

     0   :  { %s72_s0 = inlined_call_operand.vmem [shape: f32[2,32,16], index: 0, kind: input, shape index: {}]   ;;  %s73_s1 = inlined_call_operand.vmem [shape: f32[2,32,16], index: 1, kind: output, shape index: {}]  }
   0x1   :  { %v2_v0 = vld [vmem:[%s72_s0] sm:$0xff]  ;;  %v32_v1 = vld [vmem:[%s72_s0 + $0x10] sm:$0xff]  ;;  %v34_v2 = vld [vmem:[%s72_s0 + $0x8] sm:$0xff] }
   0x2   :  { %v5_v3 = vxor.u32 2147483648, %v2_v0  ;;  %v12_v4 = vxor.u32 2147483648, %v32_v1  ;;  %v20_v5 = vxor.u32 2147483648, %v34_v2  ;;  %v36_v6 = vld [vmem:[%s72_s0 + $0x18] sm:$0xff] }
   0x3   :  { %v28_v7 = vxor.u32 2147483648, %v36_v6 }
   0x4   :  { %7 = vst [vmem:[%s73_s1] sm:$0xff] %v5_v3  ;;  %33 = vst [vmem:[%s73_s1 + $0x10] sm:$0xff] %v12_v4 }
   0x5   :  { %35 = vst [vmem:[%s73_s1 + $0x8] sm:$0xff] %v20_v5  ;;  %37 = vst [vmem:[%s73_s1 + $0x18] sm:$0xff] %v28_v7 }

// kernel: network_forward.9
= control target key start
LH: loop header
LB: loop body
LE: loop exit
PB: predicated region body
PF: predicated region fallthrough
CT: control target
= control target key end

     0   :  { %vm53_vm0 = vcmask 1042432   ;;  %v1403_v3 = vmov 0.0   ;;  %vm40_vm1 = vcmask 285696   ;;  %vm161_vm2 = vcmask 261120   ;;  %s1404_s12 = smov 64   ;;  %s1405_s13 = smov 96   ;;  %s1725_s0 = inlined_call_operand.vmem [shape: f32[35,256], index: 0, kind: input, shape index: {}]   ;;  %s1726_s1 = inlined_call_operand.vmem [shape: f32[32,35], index: 1, kind: input, shape index: {}]   ;;  %s1727_s2 = inlined_call_operand.vmem [shape: f32[32,32], index: 2, kind: input, shape index: {}]   ;;  %s1728_s3 = inlined_call_operand.vmem [shape: f32[64,32], index: 3, kind: input, shape index: {}]   ;;  %s1729_s4 = inlined_call_operand.vmem [shape: f32[32,1], index: 4, kind: input, shape index: {}]   ;;  %s1730_s5 = inlined_call_operand.vmem [shape: f32[32,32], index: 5, kind: input, shape index: {}]   ;;  %s1731_s6 = inlined_call_operand.vmem [shape: f32[32,1], index: 6, kind: input, shape index: {}]   ;;  %s1732_s7 = inlined_call_operand.vmem [shape: f32[32,32], index: 7, kind: output, shape index: {}]  }
   0x1   :  { %v35_v0 = vld [vmem:[%s1725_s0 + $0x48] sm:$0x7]  ;;  %v34_v1 = vld [vmem:[%s1725_s0 + $0x40] sm:$0x7]  ;;  %v33_v2 = vld [vmem:[%s1725_s0 + $0x38] sm:$0xff]  ;;  %124 = vmatprep.mubr.f32.mxu0 %v1403_v3  ;;  %238 = vmatprep.mubr.f32.mxu1 %v1403_v3  ;;  %s1406_s14 = smov 32  }
   0x2   :  { %1220 = vmatprep.subr.msk.mxu0 %vm53_vm0, %v35_v0  ;;  %v32_v4 = vld [vmem:[%s1725_s0 + $0x30] sm:$0xff]  ;;  %v31_v5 = vld [vmem:[%s1725_s0 + $0x28] sm:$0xff]  ;;  %v30_v6 = vld [vmem:[%s1725_s0 + $0x20] sm:$0xff]  ;;  %vm657_vm3 = vcmask 130048  }
   0x3   :  { %1221 = vmatpush1.msk.msra.mxu0 %vm53_vm0, %v34_v1  ;;  %v29_v7 = vld [vmem:[%s1725_s0 + $0x18] sm:$0xff]  ;;  %v28_v8 = vld [vmem:[%s1725_s0 + $0x10] sm:$0xff]  ;;  %v27_v9 = vld [vmem:[%s1725_s0 + $0x8] sm:$0xff] }
   0x4   :  { %84 = vmatprep.subr.mxu0 %v33_v2  ;;  %v26_v10 = vld [vmem:[%s1725_s0] sm:$0xff]  ;;  %v37_v12 = vld [vmem:[%s1726_s1 + $0x8] sm:$0xff]  ;;  %v38_v13 = vld [vmem:[%s1726_s1 + $0x10] sm:$0xff] }
   0x5   :  { %85 = vmatpush1.msra.mxu0 %v32_v4  ;;  %v36_v11 = vld [vmem:[%s1726_s1] sm:$0xff]  ;;  %v39_v14 = vld [vmem:[%s1726_s1 + $0x18] sm:$0xff]  ;;  %v158_v32 = vld [vmem:[%s1727_s2 + $0x8] sm:$0xff] }
   0x6   :  { %86 = vmatprep.subr.mxu0 %v31_v5  ;;  %v157_v31 = vld [vmem:[%s1727_s2] sm:$0xff]  ;;  %v159_v33 = vld [vmem:[%s1727_s2 + $0x10] sm:$0xff]  ;;  %v160_v34 = vld [vmem:[%s1727_s2 + $0x18] sm:$0xff] }
   0x7   :  { %87 = vmatpush1.msra.mxu0 %v30_v6  ;;  %v379_v51 = vld [vmem:[%s1728_s3] sm:$0xff] }
   0x8   :  { %88 = vmatprep.subr.mxu0 %v29_v7 }
   0x9   :  { %89 = vmatpush1.msra.mxu0 %v28_v8 }
   0xa   :  { %90 = vmatprep.subr.mxu0 %v27_v9 }
   0xb   :  { %91 = vmatpush1.msra.mxu0 %v26_v10 }
   0xc   :  { %1222 = vmatmul.mubr.msk.f32.vlgmr.msra.gmra.mxu0 %vm40_vm1, %v36_v11 }
   0xd   :  { %130 = vmatprep.mubr.f32.mxu0 %v1403_v3 }
  0x10   :  { %1223 = vmatmul.mubr.msk.f32.gmra.mxu0 %vm40_vm1, %v37_v12 }
  0x11   :  { %136 = vmatprep.mubr.f32.mxu0 %v1403_v3 }
  0x14   :  { %1224 = vmatmul.mubr.msk.f32.gmra.mxu0 %vm40_vm1, %v38_v13 }
  0x15   :  { %142 = vmatprep.mubr.f32.mxu0 %v1403_v3 }
  0x18   :  { %1225 = vmatmul.mubr.msk.f32.gmra.mxu0 %vm40_vm1, %v39_v14 }
  0xcc   :  { %v126_v15 = vpop.f32.mrf.mxu0 }
  0xcd   :  { %v149_v30 = vmax.f32 %v126_v15, 0.0 }
  0xce   :  { %v128_v16 = vpop.f32.mrf.mxu0 }
  0xcf   :  { %v150_v29 = vmax.f32 %v128_v16, 0.0 }
  0xd0   :  { %v132_v17 = vpop.f32.mrf.mxu0 }
  0xd1   :  { %v151_v28 = vmax.f32 %v132_v17, 0.0 }
  0xd2   :  { %v134_v18 = vpop.f32.mrf.mxu0 }
  0xd3   :  { %v152_v27 = vmax.f32 %v134_v18, 0.0 }
  0xd4   :  { %v138_v19 = vpop.f32.mrf.mxu0 }
  0xd5   :  { %v153_v26 = vmax.f32 %v138_v19, 0.0 }
  0xd6   :  { %v140_v20 = vpop.f32.mrf.mxu0 }
  0xd7   :  { %v154_v25 = vmax.f32 %v140_v20, 0.0 }
  0xd8   :  { %v144_v21 = vpop.f32.mrf.mxu0 }
  0xd9   :  { %v155_v24 = vmax.f32 %v144_v21, 0.0 }
  0xda   :  { %v146_v22 = vpop.f32.mrf.mxu0 }
  0xdb   :  { %v156_v23 = vmax.f32 %v146_v22, 0.0 }
  0xdd   :  { %198 = vmatprep.subr.mxu1 %v156_v23 }
  0xde   :  { %199 = vmatpush1.msra.mxu1 %v155_v24 }
  0xdf   :  { %200 = vmatprep.subr.mxu1 %v154_v25 }
  0xe0   :  { %201 = vmatpush1.msra.mxu1 %v153_v26 }
  0xe1   :  { %202 = vmatprep.subr.mxu1 %v152_v27 }
  0xe2   :  { %203 = vmatpush1.msra.mxu1 %v151_v28 }
  0xe3   :  { %204 = vmatprep.subr.mxu1 %v150_v29 }
  0xe4   :  { %205 = vmatpush1.msra.mxu1 %v149_v30 }
  0xe5   :  { %1226 = vmatmul.mubr.msk.f32.vlgmr.msra.gmra.mxu1 %vm161_vm2, %v157_v31 }
  0xe6   :  { %244 = vmatprep.mubr.f32.mxu1 %v1403_v3 }
  0xe9   :  { %1227 = vmatmul.mubr.msk.f32.gmra.mxu1 %vm161_vm2, %v158_v32 }
  0xea   :  { %250 = vmatprep.mubr.f32.mxu1 %v1403_v3 }
  0xed   :  { %1228 = vmatmul.mubr.msk.f32.gmra.mxu1 %vm161_vm2, %v159_v33 }
  0xee   :  { %256 = vmatprep.mubr.f32.mxu1 %v1403_v3 }
  0xf1   :  { %1229 = vmatmul.mubr.msk.f32.gmra.mxu1 %vm161_vm2, %v160_v34 }
  0xf2   :  { %1306 = vmatprep.mubr.msk.f32.mxu1 %vm161_vm2, %v379_v51 }
 0x1a5   :  { %v240_v35 = vpop.f32.mrf.mxu1 }
 0x1a6   :  { %v1516_v36 = vmax.f32 %v240_v35, 0.0 }
 0x1a7   :  { %v242_v37 = vpop.f32.mrf.mxu1 }
 0x1a8   :  { %291 = vrot.lane.b32.xlu1 %v1516_v36, %s1404_s12  ;;  %275 = vrot.lane.b32.xlu0 %v1516_v36, %s1405_s13  ;;  %v264_v49 = vmax.f32 %v242_v37, 0.0 }
 0x1a9   :  { %v246_v38 = vpop.f32.mrf.mxu1 }
 0x1aa   :  { %v265_v39 = vmax.f32 %v246_v38, 0.0 }
 0x1ab   :  { %v248_v40 = vpop.f32.mrf.mxu1 }
 0x1ac   :  { %307 = vrot.lane.b32.xlu0 %v1516_v36, %s1406_s14  ;;  %277 = vrot.lane.b32.xlu1 %v265_v39, %s1405_s13  ;;  %v1527_v43 = vmax.f32 %v248_v40, 0.0  ;;  %v380_v40 = vld [vmem:[%s1728_s3 + $0x8] sm:$0xff] }
 0x1ad   :  { %v252_v41 = vpop.f32.mrf.mxu1 }
 0x1ae   :  { %v267_v42 = vmax.f32 %v252_v41, 0.0  ;;  %v381_v41 = vld [vmem:[%s1728_s3 + $0x10] sm:$0xff] }
 0x1af   :  { %v254_v44 = vpop.f32.mrf.mxu1 }
 0x1b0   :  { %309 = vrot.lane.b32.xlu0 %v265_v39, %s1406_s14  ;;  %293 = vrot.lane.b32.xlu1 %v265_v39, %s1404_s12  ;;  %v268_v45 = vmax.f32 %v254_v44, 0.0  ;;  %v384_v44 = vld [vmem:[%s1728_s3 + $0x28] sm:$0xff] }
 0x1b1   :  { %v258_v46 = vpop.f32.mrf.mxu1 }
 0x1b2   :  { %v269_v47 = vmax.f32 %v258_v46, 0.0  ;;  %v386_v46 = vld [vmem:[%s1728_s3 + $0x38] sm:$0xff] }
 0x1b3   :  { %v260_v48 = vpop.f32.mrf.mxu1 }
 0x1b4   :  { %333 = vrot.lane.b32.xlu1 %v1527_v43, %s1405_s13  ;;  %279 = vrot.lane.b32.xlu0 %v267_v42, %s1405_s13  ;;  %v270_v50 = vmax.f32 %v260_v48, 0.0 }
 0x1b8   :  { %295 = vrot.lane.b32.xlu0 %v267_v42, %s1404_s12  ;;  %335 = vrot.lane.b32.xlu1 %v268_v45, %s1405_s13 }
 0x1bc   :  { %311 = vrot.lane.b32.xlu0 %v267_v42, %s1406_s14  ;;  %349 = vrot.lane.b32.xlu1 %v1527_v43, %s1404_s12 }
 0x1c0   :  { %351 = vrot.lane.b32.xlu0 %v268_v45, %s1404_s12  ;;  %297 = vrot.lane.b32.xlu1 %v269_v47, %s1404_s12 }
 0x1c4   :  { %313 = vrot.lane.b32.xlu1 %v269_v47, %s1406_s14  ;;  %281 = vrot.lane.b32.xlu0 %v269_v47, %s1405_s13 }
 0x1c8   :  { %331 = vrot.lane.b32.xlu0 %v264_v49, %s1405_s13  ;;  %337 = vrot.lane.b32.xlu1 %v270_v50, %s1405_s13 }
 0x1cc   :  { %353 = vrot.lane.b32.xlu0 %v270_v50, %s1404_s12  ;;  %369 = vrot.lane.b32.xlu1 %v270_v50, %s1406_s14 }
 0x1d0   :  { %367 = vrot.lane.b32.xlu0 %v268_v45, %s1406_s14  ;;  %347 = vrot.lane.b32.xlu1 %v264_v49, %s1404_s12 }
 0x1d4   :  { %365 = vrot.lane.b32.xlu0 %v1527_v43, %s1406_s14  ;;  %363 = vrot.lane.b32.xlu1 %v264_v49, %s1406_s14 }
 0x21a   :  { %v292_v52 = vpop.permute.xlu1 %291  ;;  %v276_v53 = vpop.permute.xlu0 %275 }
 0x21b   :  { %v287_v7 = vmax.f32 %v1516_v36, %v276_v53 }
 0x21d   :  { %v303_v14 = vmax.f32 %v287_v7, %v292_v52 }
 0x21e   :  { %v308_v54 = vpop.permute.xlu0 %307  ;;  %v278_v55 = vpop.permute.xlu1 %277 }
 0x21f   :  { %v288_v3 = vmax.f32 %v265_v39, %v278_v55  ;;  %v319_v21 = vmax.f32 %v303_v14, %v308_v54 }
 0x221   :  { %v323_v30 = vmax.f32 %v319_v21, %v264_v49 }
 0x222   :  { %v310_v56 = vpop.permute.xlu0 %309  ;;  %v294_v57 = vpop.permute.xlu1 %293 }
 0x223   :  { %v304_v8 = vmax.f32 %v288_v3, %v294_v57 }
 0x225   :  { %v320_v15 = vmax.f32 %v304_v8, %v310_v56  ;;  %v516_v8 = vld [vmem:[%s1729_s4] sm:$0xff] }
 0x226   :  { %v334_v58 = vpop.permute.xlu1 %333  ;;  %v280_v59 = vpop.permute.xlu0 %279 }
 0x227   :  { %v289_v2 = vmax.f32 %v267_v42, %v280_v59  ;;  %v324_v22 = vmax.f32 %v320_v15, %v1527_v43  ;;  %v382_v42 = vld [vmem:[%s1728_s3 + $0x18] sm:$0xff]  ;;  %v383_v43 = vld [vmem:[%s1728_s3 + $0x20] sm:$0xff] }
 0x229   :  { %v344_v28 = vmax.f32 %v324_v22, %v334_v58 }
 0x22a   :  { %v296_v60 = vpop.permute.xlu0 %295  ;;  %v336_v61 = vpop.permute.xlu1 %335 }
 0x22b   :  { %v305_v4 = vmax.f32 %v289_v2, %v296_v60 }
 0x22e   :  { %v312_v62 = vpop.permute.xlu0 %311  ;;  %v350_v63 = vpop.permute.xlu1 %349 }
 0x22f   :  { %v321_v9 = vmax.f32 %v305_v4, %v312_v62  ;;  %v360_v32 = vmax.f32 %v344_v28, %v350_v63 }
 0x231   :  { %v325_v16 = vmax.f32 %v321_v9, %v268_v45  ;;  %v385_v45 = vld [vmem:[%s1728_s3 + $0x30] sm:$0xff]  ;;  %s1407_s3 = smov 112   ;;  %v517_v9 = vld [vmem:[%s1729_s4 + $0x8] sm:$0xff] }
 0x232   :  { %v352_v0 = vpop.permute.xlu0 %351  ;;  %v298_v1 = vpop.permute.xlu1 %297 }
 0x233   :  { %v345_v23 = vmax.f32 %v325_v16, %v336_v61  ;;  %v1408_v61 = vmov 0  }
 0x234   :  { %1381 = vset.pattern.permute.xlu1 %v1408_v61 }
 0x235   :  { %v361_v29 = vmax.f32 %v345_v23, %v352_v0 }
 0x236   :  { %v314_v5 = vpop.permute.xlu1 %313  ;;  %v282_v6 = vpop.permute.xlu0 %281 }
 0x237   :  { %v290_v10 = vmax.f32 %v269_v47, %v282_v6 }
 0x239   :  { %v306_v11 = vmax.f32 %v290_v10, %v298_v1  ;;  %v518_v10 = vld [vmem:[%s1729_s4 + $0x10] sm:$0xff] }
 0x23a   :  { %v332_v12 = vpop.permute.xlu0 %331  ;;  %v338_v13 = vpop.permute.xlu1 %337 }
 0x23b   :  { %v322_v17 = vmax.f32 %v306_v11, %v314_v5  ;;  %v343_v33 = vmax.f32 %v323_v30, %v332_v12  ;;  %v519_v11 = vld [vmem:[%s1729_s4 + $0x18] sm:$0xff]  ;;  %s1409_s4 = smov 16  }
 0x23d   :  { %v326_v18 = vmax.f32 %v322_v17, %v270_v50 }
 0x23e   :  { %v354_v19 = vpop.permute.xlu0 %353  ;;  %v370_v20 = vpop.permute.xlu1 %369 }
 0x23f   :  { %v346_v24 = vmax.f32 %v326_v18, %v338_v13 }
 0x241   :  { %v362_v25 = vmax.f32 %v346_v24, %v354_v19 }
 0x242   :  { %v368_v26 = vpop.permute.xlu0 %367  ;;  %v348_v27 = vpop.permute.xlu1 %347 }
 0x243   :  { %v1556_v31 = vmax.f32 %v362_v25, %v370_v20  ;;  %v1558_v34 = vmax.f32 %v361_v29, %v368_v26  ;;  %v359_v37 = vmax.f32 %v343_v33, %v348_v27 }
 0x245   :  { %1298 = vmatprep.subr.mxu1 %v1556_v31 }
 0x246   :  { %v366_v35 = vpop.permute.xlu0 %365  ;;  %v364_v36 = vpop.permute.xlu1 %363  ;;  %1299 = vmatpush3.msra.mxu1 %v1556_v31 }
 0x247   :  { %v1562_v38 = vmax.f32 %v360_v32, %v366_v35  ;;  %1300 = vmatprep.subr.mxu1 %v1558_v34  ;;  %v1566_v39 = vmax.f32 %v359_v37, %v364_v36 }
 0x248   :  { %1301 = vmatpush3.msra.mxu1 %v1558_v34 }
 0x249   :  { %1302 = vmatprep.subr.mxu1 %v1562_v38 }
 0x24a   :  { %1303 = vmatpush3.msra.mxu1 %v1562_v38 }
 0x24b   :  { %1304 = vmatprep.subr.mxu1 %v1566_v39 }
 0x24c   :  { %1305 = vmatpush3.msra.mxu1 %v1566_v39 }
 0x24d   :  { %1307 = vmatmul.mubr.msk.f32.vlgmr.msra.gmra.mxu1 %vm161_vm2, %v380_v40 }
 0x24e   :  { %1309 = vmatprep.mubr.msk.f32.mxu1 %vm161_vm2, %v381_v41 }
 0x251   :  { %1310 = vmatmul.mubr.msk.f32.gmra.mxu1 %vm161_vm2, %v382_v42 }
 0x252   :  { %1312 = vmatprep.mubr.msk.f32.mxu1 %vm161_vm2, %v383_v43 }
 0x255   :  { %1313 = vmatmul.mubr.msk.f32.gmra.mxu1 %vm161_vm2, %v384_v44 }
 0x256   :  { %1315 = vmatprep.mubr.msk.f32.mxu1 %vm161_vm2, %v385_v45 }
 0x259   :  { %1316 = vmatmul.mubr.msk.f32.gmra.mxu1 %vm161_vm2, %v386_v46 }
 0x30d   :  { %v1308_v47 = vpop.f32.mrf.mxu1 }
 0x30f   :  { %v477_v48 = vpop.f32.mrf.mxu1 }
 0x310   :  { %544 = vxpose.xlu0.b32.start [1/4] (short) (narrow) %v477_v48, 16 }
 0x311   :  { %v1311_v49 = vpop.f32.mrf.mxu1 }
 0x312   :  { %1318 = vmatprep.subr.mxu1 %v1311_v49 }
 0x313   :  { %v487_v50 = vpop.f32.mrf.mxu1  ;;  %1319 = vmatpush3.msra.mxu1 %v1311_v49 }
 0x314   :  { %545 = vxpose.xlu0.b32.cont [2/4] (short) (narrow) %v1308_v47, 16  ;;  %1320 = vmatprep.subr.mxu1 %v487_v50 }
 0x315   :  { %1321 = vmatpush3.msra.mxu1 %v487_v50  ;;  %v1602_v53 = vpop.f32.mrf.mxu1 }
 0x316   :  { %1322 = vmatprep.subr.mxu1 %v1308_v47 }
 0x317   :  { %1323 = vmatpush3.msra.mxu1 %v1308_v47  ;;  %v497_v54 = vpop.f32.mrf.mxu1 }
 0x318   :  { %546 = vxpose.xlu0.b32.cont [3/4] (short) (narrow) %v487_v50, 16  ;;  %1324 = vmatprep.subr.mxu1 %v477_v48 }
 0x319   :  { %1325 = vmatpush3.msra.mxu1 %v477_v48  ;;  %v1604_v55 = vpop.f32.mrf.mxu1 }
 0x31b   :  { %v1606_v56 = vpop.f32.mrf.mxu1 }
 0x31c   :  { %547 = vxpose.xlu0.b32.end [4/4] (short) (narrow) %v1311_v49, 16 }
 0x38c   :  { %v560_v51 = vpop.trf.xlu0 }
 0x38d   :  { %1326 = vmatprep.mubr.msk.f32.mxu1 %vm161_vm2, %v560_v51 }
 0x390   :  { %v561_v52 = vpop.trf.xlu0 }
 0x391   :  { %1327 = vmatmul.mubr.msk.f32.vlgmr.msra.gmra.mxu1 %vm161_vm2, %v561_v52 }
 0x451   :  { %v1328_v57 = vpop.f32.mrf.mxu1 }
 0x452   :  { %v661_v60 = vsel %vm657_vm3, %v1328_v57, -inf }
 0x453   :  { %v648_v58 = vpop.f32.mrf.mxu1 }
 0x454   :  { %v658_v59 = vsel %vm657_vm3, %v648_v58, -inf }
 0x455   :  { %659 = vmax.xlane.f32.xlu1 %v658_v59 }
 0x459   :  { %662 = vmax.xlane.f32.xlu1 %v661_v60 }
 0x46a   :  { %794 = vrot.lane.b32.xlu1 %v477_v48, %s1407_s3 }
 0x46e   :  { %796 = vrot.lane.b32.xlu1 %v1308_v47, %s1407_s3 }
 0x4de   :  { %v660_v62 = vpop.xlane.xlu1 %659 }
 0x4df   :  { %v664_v63 = vsub.f32 %v648_v58, %v660_v62 }
 0x4e1   :  { %v666_v0 = vmul.f32 1.442695, %v664_v63 }
 0x4e2   :  { %v663_v1 = vpop.xlane.xlu1 %662 }
 0x4e3   :  { %1383 = vpow2.f32 %v666_v0  ;;  %v665_v2 = vsub.f32 %v1328_v57, %v663_v1 }
 0x4e5   :  { %v668_v3 = vmul.f32 1.442695, %v665_v2 }
 0x4e6   :  { %v795_v12 = vpop.permute.xlu1 %794 }
 0x4e7   :  { %1385 = vpow2.f32 %v668_v3 }
 0x4ea   :  { %v797_v13 = vpop.permute.xlu1 %796 }
 0x4f0   :  { %v1384_v4 = vpop.eup %1383 }
 0x4f1   :  { %v670_v5 = vsel %vm657_vm3, %v1384_v4, 0.0 }
 0x4f2   :  { %671 = vadd.xlane.f32.xlu1 %v670_v5 }
 0x4f4   :  { %v1386_v6 = vpop.eup %1385 }
 0x4f5   :  { %v673_v7 = vsel %vm657_vm3, %v1386_v6, 0.0 }
 0x4f6   :  { %674 = vadd.xlane.f32.xlu0 %v673_v7 }
 0x503   :  { %798 = vrot.lane.b32.xlu1 %v487_v50, %s1407_s3 }
 0x507   :  { %800 = vrot.lane.b32.xlu1 %v1311_v49, %s1407_s3 }
 0x50b   :  { %522 = vperm.xlu1 %1381, %v516_v8  }
 0x50f   :  { %527 = vperm.xlu1 %1381, %v517_v9  }
 0x513   :  { %532 = vperm.xlu1 %1381, %v518_v10  }
 0x517   :  { %537 = vperm.xlu1 %1381, %v519_v11  }
 0x523   :  { %806 = vxpose.xlu0.b32.start [1/4] (short) (narrow) %v795_v12, 16 }
 0x527   :  { %807 = vxpose.xlu0.b32.cont [2/4] (short) (narrow) %v797_v13, 16 }
 0x57b   :  { %v672_v14 = vpop.xlane.xlu1 %671 }
 0x57c   :  { %1387 = vrcp.f32 %v672_v14 }
 0x57f   :  { %v675_v15 = vpop.xlane.xlu0 %674  ;;  %v799_v16 = vpop.permute.xlu1 %798 }
 0x580   :  { %1389 = vrcp.f32 %v675_v15  ;;  %808 = vxpose.xlu0.b32.cont [3/4] (short) (narrow) %v799_v16, 16 }
 0x583   :  { %v801_v17 = vpop.permute.xlu1 %800 }
 0x584   :  { %809 = vxpose.xlu0.b32.end [4/4] (short) (narrow) %v801_v17, 16 }
 0x587   :  { %v523_v18 = vpop.permute.xlu1 %522 }
 0x588   :  { %v1628_v19 = vadd.f32 %v523_v18, %v497_v54 }
 0x589   :  { %v1388_v20 = vpop.eup %1387 }
 0x58a   :  { %1333 = vmatprep.mubr.msk.f32.mxu0 %vm657_vm3, %v1628_v19  ;;  %v678_v21 = vmul.f32 %v1388_v20, %v1384_v4 }
 0x58b   :  { %v528_v36 = vpop.permute.xlu1 %527 }
 0x58c   :  { %v680_v24 = vsel %vm657_vm3, %v678_v21, 0.0  ;;  %v541_v37 = vadd.f32 %v1602_v53, %v528_v36  ;;  %v1086_v36 = vld [vmem:[%s1731_s6 + $0x18] sm:$0xff] }
 0x58d   :  { %v1390_v22 = vpop.eup %1389 }
 0x58e   :  { %v679_v23 = vmul.f32 %v1390_v22, %v1386_v6 }
 0x58f   :  { %v533_v41 = vpop.permute.xlu1 %532 }
 0x590   :  { %v681_v25 = vsel %vm657_vm3, %v679_v23, 0.0  ;;  %v542_v44 = vadd.f32 %v533_v41, %v1606_v56 }
 0x591   :  { %v682_v26 = vadd.f32 %v681_v25, %v680_v24 }
 0x593   :  { %v683_v27 = vrot.slane %v682_v26, 4  ;;  %v538_v45 = vpop.permute.xlu1 %537 }
 0x594   :  { %v543_v46 = vadd.f32 %v1604_v55, %v538_v45 }
 0x595   :  { %v684_v28 = vadd.f32 %v683_v27, %v682_v26 }
 0x597   :  { %v685_v29 = vrot.slane %v684_v28, 2 }
 0x599   :  { %v686_v30 = vadd.f32 %v685_v29, %v684_v28  ;;  %v1075_v28 = vld [vmem:[%s1730_s5] sm:$0xff] }
 0x59b   :  { %v687_v32 = vrot.slane %v686_v30, 1 }
 0x59d   :  { %v688_v33 = vadd.f32 %v687_v32, %v686_v30  ;;  %v1083_v32 = vld [vmem:[%s1731_s6] sm:$0xff] }
 0x59f   :  { %v689_v35 = vadd.f32 1e-09, %v688_v33  ;;  %v1084_v33 = vld [vmem:[%s1731_s6 + $0x8] sm:$0xff] }
 0x5a1   :  { %1391 = vrcp.f32 %v689_v35  ;;  %v1085_v35 = vld [vmem:[%s1731_s6 + $0x10] sm:$0xff] }
 0x5ad   :  { %956 = vrot.lane.b32.xlu0 %v541_v37, %s1407_s3 }
 0x5ae   :  { %v1392_v40 = vpop.eup %1391  ;;  %1382 = vset.pattern.permute.xlu0 %v1408_v61 }
 0x5af   :  { %v692_v42 = vmul.f32 %v1392_v40, %v679_v23  ;;  %v691_v43 = vmul.f32 %v1392_v40, %v678_v21 }
 0x5b1   :  { %1329 = vmatprep.subr.mxu0 %v692_v42  ;;  %1099 = vperm.xlu0 %1382, %v1085_v35  }
 0x5b2   :  { %1330 = vmatpush3.msra.mxu0 %v692_v42 }
 0x5b3   :  { %1331 = vmatprep.subr.mxu0 %v691_v43 }
 0x5b4   :  { %1332 = vmatpush3.msra.mxu0 %v691_v43 }
 0x5b5   :  { %1334 = vmatmul.mubr.msk.f32.vlgmr.msra.gmra.mxu0 %vm657_vm3, %v541_v37  ;;  %1339 = vmatprep.subr.mxu0 %v801_v17 }
 0x5b6   :  { %1336 = vmatprep.mubr.msk.f32.mxu0 %vm657_vm3, %v542_v44  ;;  %1340 = vmatpush3.msra.mxu0 %v801_v17 }
 0x5b7   :  { %1341 = vmatprep.subr.mxu0 %v799_v16 }
 0x5b8   :  { %1342 = vmatpush3.msra.mxu0 %v799_v16 }
 0x5b9   :  { %1337 = vmatmul.mubr.msk.f32.gmra.mxu0 %vm657_vm3, %v543_v46  ;;  %1343 = vmatprep.subr.mxu0 %v797_v13 }
 0x5ba   :  { %1344 = vmatpush3.msra.mxu0 %v797_v13 }
 0x5bb   :  { %1345 = vmatprep.subr.mxu0 %v795_v12 }
 0x5bc   :  { %1346 = vmatpush3.msra.mxu0 %v795_v12 }
 0x5f4   :  { %v822_v47 = vpop.trf.xlu0 }
 0x5f5   :  { %1347 = vmatprep.mubr.msk.f32.mxu0 %vm161_vm2, %v822_v47 }
 0x5f8   :  { %v823_v48 = vpop.trf.xlu0 }
 0x5f9   :  { %1348 = vmatmul.mubr.msk.f32.vlgmr.msra.gmra.mxu0 %vm161_vm2, %v823_v48 }
 0x5fa   :  { %1368 = vmatprep.mubr.msk.f32.mxu0 %vm161_vm2, %v1075_v28 }
 0x61f   :  { %v957_v24 = vpop.permute.xlu0 %956 }
 0x675   :  { %v1643_v49 = vpop.f32.mrf.mxu0 }
 0x677   :  { %v1645_v50 = vpop.f32.mrf.mxu0 }
 0x679   :  { %v1647_v51 = vpop.f32.mrf.mxu0 }
 0x67b   :  { %v1649_v52 = vpop.f32.mrf.mxu0 }
 0x6b9   :  { %v1349_v53 = vpop.f32.mrf.mxu0 }
 0x6ba   :  { %v922_v56 = vsel %vm657_vm3, %v1349_v53, -inf }
 0x6bb   :  { %v910_v54 = vpop.f32.mrf.mxu0 }
 0x6bc   :  { %v919_v55 = vsel %vm657_vm3, %v910_v54, -inf }
 0x6bd   :  { %920 = vmax.xlane.f32.xlu1 %v919_v55 }
 0x6c1   :  { %923 = vmax.xlane.f32.xlu1 %v922_v56 }
 0x746   :  { %v921_v57 = vpop.xlane.xlu1 %920 }
 0x747   :  { %v925_v58 = vsub.f32 %v910_v54, %v921_v57 }
 0x749   :  { %v927_v59 = vmul.f32 1.442695, %v925_v58 }
 0x74a   :  { %v924_v60 = vpop.xlane.xlu1 %923 }
 0x74b   :  { %1393 = vpow2.f32 %v927_v59  ;;  %v926_v61 = vsub.f32 %v1349_v53, %v924_v60 }
 0x74d   :  { %v929_v62 = vmul.f32 1.442695, %v926_v61 }
 0x74f   :  { %1395 = vpow2.f32 %v929_v62 }
 0x758   :  { %v1394_v63 = vpop.eup %1393 }
 0x759   :  { %v931_v0 = vsel %vm657_vm3, %v1394_v63, 0.0 }
 0x75a   :  { %932 = vadd.xlane.f32.xlu1 %v931_v0 }
 0x75c   :  { %v1396_v1 = vpop.eup %1395 }
 0x75d   :  { %v934_v2 = vsel %vm657_vm3, %v1396_v1, 0.0 }
 0x75e   :  { %935 = vadd.xlane.f32.xlu1 %v934_v2 }
 0x76f   :  { %954 = vrot.lane.b32.xlu1 %v1628_v19, %s1407_s3 }
 0x773   :  { %958 = vrot.lane.b32.xlu1 %v542_v44, %s1407_s3 }
 0x777   :  { %960 = vrot.lane.b32.xlu1 %v543_v46, %s1407_s3 }
 0x7e3   :  { %v933_v3 = vpop.xlane.xlu1 %932 }
 0x7e4   :  { %1397 = vrcp.f32 %v933_v3 }
 0x7e7   :  { %v936_v4 = vpop.xlane.xlu1 %935 }
 0x7e8   :  { %1399 = vrcp.f32 %v936_v4 }
 0x7eb   :  { %v955_v5 = vpop.permute.xlu1 %954 }
 0x7ec   :  { %1354 = vmatprep.mubr.msk.f32.mxu1 %vm657_vm3, %v955_v5 }
 0x7ef   :  { %v959_v23 = vpop.permute.xlu1 %958 }
 0x7f1   :  { %v1398_v6 = vpop.eup %1397 }
 0x7f2   :  { %v939_v7 = vmul.f32 %v1398_v6, %v1394_v63  ;;  %v1100_v63 = vpop.permute.xlu0 %1099 }
 0x7f3   :  { %v961_v25 = vpop.permute.xlu1 %960 }
 0x7f4   :  { %v941_v10 = vsel %vm657_vm3, %v939_v7, 0.0 }
 0x7f5   :  { %v1400_v8 = vpop.eup %1399 }
 0x7f6   :  { %v940_v9 = vmul.f32 %v1400_v8, %v1396_v1 }
 0x7f8   :  { %v942_v11 = vsel %vm657_vm3, %v940_v9, 0.0 }
 0x7f9   :  { %v943_v12 = vadd.f32 %v942_v11, %v941_v10 }
 0x7fb   :  { %v944_v13 = vrot.slane %v943_v12, 4 }
 0x7fd   :  { %v945_v14 = vadd.f32 %v944_v13, %v943_v12 }
 0x7ff   :  { %v946_v15 = vrot.slane %v945_v14, 2 }
 0x801   :  { %v947_v16 = vadd.f32 %v946_v15, %v945_v14 }
 0x803   :  { %v948_v17 = vrot.slane %v947_v16, 1 }
 0x805   :  { %v949_v18 = vadd.f32 %v948_v17, %v947_v16 }
 0x807   :  { %v950_v19 = vadd.f32 1e-09, %v949_v18 }
 0x809   :  { %1401 = vrcp.f32 %v950_v19 }
 0x816   :  { %v1402_v20 = vpop.eup %1401 }
 0x817   :  { %v953_v21 = vmul.f32 %v1402_v20, %v940_v9  ;;  %v952_v22 = vmul.f32 %v1402_v20, %v939_v7 }
 0x819   :  { %1350 = vmatprep.subr.mxu1 %v953_v21 }
 0x81a   :  { %1351 = vmatpush3.msra.mxu1 %v953_v21 }
 0x81b   :  { %1352 = vmatprep.subr.mxu1 %v952_v22 }
 0x81c   :  { %1353 = vmatpush3.msra.mxu1 %v952_v22 }
 0x81d   :  { %1355 = vmatmul.mubr.msk.f32.vlgmr.msra.gmra.mxu1 %vm657_vm3, %v957_v24 }
 0x81e   :  { %1357 = vmatprep.mubr.msk.f32.mxu1 %vm657_vm3, %v959_v23 }
 0x821   :  { %1358 = vmatmul.mubr.msk.f32.gmra.mxu1 %vm657_vm3, %v961_v25 }
 0x8dd   :  { %v1356_v26 = vpop.f32.mrf.mxu1 }
 0x8de   :  { %1061 = vrot.lane.b32.xlu1 %v1356_v26, %s1409_s4 }
 0x8df   :  { %v1036_v27 = vpop.f32.mrf.mxu1 }
 0x8e1   :  { %v1359_v29 = vpop.f32.mrf.mxu1 }
 0x8e2   :  { %1065 = vrot.lane.b32.xlu1 %v1359_v29, %s1409_s4 }
 0x8e3   :  { %v1046_v30 = vpop.f32.mrf.mxu1 }
 0x8e6   :  { %1063 = vrot.lane.b32.xlu1 %v1046_v30, %s1409_s4 }
 0x8ea   :  { %1059 = vrot.lane.b32.xlu1 %v1036_v27, %s1409_s4 }
 0x8ee   :  { %1089 = vperm.xlu1 %1381, %v1083_v32  }
 0x8f2   :  { %1094 = vperm.xlu1 %1381, %v1084_v33  }
 0x8f6   :  { %1104 = vperm.xlu1 %1381, %v1086_v36  }
 0x950   :  { %v1062_v37 = vpop.permute.xlu1 %1061 }
 0x951   :  { %v1072_v44 = vsel %vm657_vm3, %v1643_v49, %v1062_v37  ;;  %v1076_v49 = vld [vmem:[%s1730_s5 + $0x8] sm:$0xff] }
 0x952   :  { %v1080_v47 = vsub.f32 %v1562_v38, %v1072_v44 }
 0x954   :  { %v1066_v40 = vpop.permute.xlu1 %1065 }
 0x955   :  { %v1074_v41 = vsel %vm657_vm3, %v1647_v51, %v1066_v40 }
 0x956   :  { %v1082_v42 = vsub.f32 %v1556_v31, %v1074_v41 }
 0x958   :  { %1360 = vmatprep.subr.mxu0 %v1082_v42  ;;  %v1064_v43 = vpop.permute.xlu1 %1063 }
 0x959   :  { %v1073_v45 = vsel %vm657_vm3, %v1649_v52, %v1064_v43  ;;  %1361 = vmatpush3.msra.mxu0 %v1082_v42  ;;  %v1077_v52 = vld [vmem:[%s1730_s5 + $0x10] sm:$0xff] }
 0x95a   :  { %v1081_v46 = vsub.f32 %v1558_v34, %v1073_v45 }
 0x95c   :  { %1362 = vmatprep.subr.mxu0 %v1081_v46  ;;  %v1060_v48 = vpop.permute.xlu1 %1059 }
 0x95d   :  { %v1071_v51 = vsel %vm657_vm3, %v1645_v50, %v1060_v48  ;;  %1363 = vmatpush3.msra.mxu0 %v1081_v46  ;;  %v1078_v50 = vld [vmem:[%s1730_s5 + $0x18] sm:$0xff] }
 0x95e   :  { %v1079_v53 = vsub.f32 %v1566_v39, %v1071_v51  ;;  %1364 = vmatprep.subr.mxu0 %v1080_v47 }
 0x95f   :  { %1365 = vmatpush3.msra.mxu0 %v1080_v47 }
 0x960   :  { %1366 = vmatprep.subr.mxu0 %v1079_v53 }
 0x961   :  { %1367 = vmatpush3.msra.mxu0 %v1079_v53 }
 0x962   :  { %1369 = vmatmul.mubr.msk.f32.vlgmr.msra.gmra.mxu0 %vm161_vm2, %v1076_v49 }
 0x963   :  { %1371 = vmatprep.mubr.msk.f32.mxu0 %vm161_vm2, %v1077_v52 }
 0x966   :  { %1372 = vmatmul.mubr.msk.f32.gmra.mxu0 %vm161_vm2, %v1078_v50 }
 0x969   :  { %v1090_v54 = vpop.permute.xlu1 %1089 }
 0x96d   :  { %v1095_v55 = vpop.permute.xlu1 %1094 }
 0x971   :  { %v1105_v59 = vpop.permute.xlu1 %1104 }
 0xa22   :  { %v1370_v56 = vpop.f32.mrf.mxu0 }
 0xa23   :  { %v1191_v57 = vadd.f32 %v1370_v56, %v1095_v55 }
 0xa24   :  { %v1185_v58 = vpop.f32.mrf.mxu0 }
 0xa25   :  { %v1205_v60 = vmax.f32 %v1191_v57, 0.0  ;;  %v1186_v61 = vadd.f32 %v1185_v58, %v1090_v54 }
 0xa26   :  { %v1373_v62 = vpop.f32.mrf.mxu0 }
 0xa27   :  { %v1209_v0 = vadd.f32 %v1205_v60, %v1562_v38  ;;  %v1204_v1 = vmax.f32 %v1186_v61, 0.0  ;;  %v1201_v2 = vadd.f32 %v1373_v62, %v1105_v59 }
 0xa28   :  { %v1195_v3 = vpop.f32.mrf.mxu0 }
 0xa29   :  { %1213 = vst.msk [vmem:[%s1732_s7 + $0x8] sm:$0xff] %vm161_vm2, %v1209_v0  ;;  %v1208_v4 = vadd.f32 %v1204_v1, %v1566_v39  ;;  %v1207_v5 = vmax.f32 %v1201_v2, 0.0  ;;  %v1196_v6 = vadd.f32 %v1195_v3, %v1100_v63 }
 0xa2b   :  { %1212 = vst.msk [vmem:[%s1732_s7] sm:$0xff] %vm161_vm2, %v1208_v4  ;;  %v1211_v7 = vadd.f32 %v1207_v5, %v1556_v31  ;;  %v1206_v38 = vmax.f32 %v1196_v6, 0.0 }
 0xa2d   :  { %1215 = vst.msk [vmem:[%s1732_s7 + $0x18] sm:$0xff] %vm161_vm2, %v1211_v7  ;;  %v1210_v8 = vadd.f32 %v1206_v38, %v1558_v34 }
 0xa2f   :  { %1214 = vst.msk [vmem:[%s1732_s7 + $0x10] sm:$0xff] %vm161_vm2, %v1210_v8 }

// kernel: neg.10
= control target key start
LH: loop header
LB: loop body
LE: loop exit
PB: predicated region body
PF: predicated region fallthrough
CT: control target
= control target key end

     0   :  { %s136_s0 = inlined_call_operand.vmem [shape: f32[2,64,32], index: 0, kind: input, shape index: {}]   ;;  %s137_s1 = inlined_call_operand.vmem [shape: f32[2,64,32], index: 1, kind: output, shape index: {}]  }
   0x1   :  { %v2_v0 = vld [vmem:[%s136_s0] sm:$0xff]  ;;  %v66_v2 = vld [vmem:[%s136_s0 + $0x8] sm:$0xff]  ;;  %v70_v7 = vld [vmem:[%s136_s0 + $0x10] sm:$0xff] }
   0x2   :  { %v64_v1 = vld [vmem:[%s136_s0 + $0x20] sm:$0xff]  ;;  %v5_v3 = vxor.u32 2147483648, %v2_v0  ;;  %v20_v5 = vxor.u32 2147483648, %v66_v2  ;;  %v68_v6 = vld [vmem:[%s136_s0 + $0x28] sm:$0xff]  ;;  %v72_v8 = vld [vmem:[%s136_s0 + $0x30] sm:$0xff]  ;;  %v36_v10 = vxor.u32 2147483648, %v70_v7 }
   0x3   :  { %v12_v4 = vxor.u32 2147483648, %v64_v1  ;;  %v28_v9 = vxor.u32 2147483648, %v68_v6  ;;  %v44_v11 = vxor.u32 2147483648, %v72_v8  ;;  %v74_v12 = vld [vmem:[%s136_s0 + $0x18] sm:$0xff] }
   0x4   :  { %v76_v13 = vld [vmem:[%s136_s0 + $0x38] sm:$0xff]  ;;  %7 = vst [vmem:[%s137_s1] sm:$0xff] %v5_v3  ;;  %67 = vst [vmem:[%s137_s1 + $0x8] sm:$0xff] %v20_v5  ;;  %v52_v14 = vxor.u32 2147483648, %v74_v12 }
   0x5   :  { %65 = vst [vmem:[%s137_s1 + $0x20] sm:$0xff] %v12_v4  ;;  %v60_v15 = vxor.u32 2147483648, %v76_v13  ;;  %69 = vst [vmem:[%s137_s1 + $0x28] sm:$0xff] %v28_v9 }
   0x6   :  { %71 = vst [vmem:[%s137_s1 + $0x10] sm:$0xff] %v36_v10  ;;  %73 = vst [vmem:[%s137_s1 + $0x30] sm:$0xff] %v44_v11 }
   0x7   :  { %75 = vst [vmem:[%s137_s1 + $0x18] sm:$0xff] %v52_v14  ;;  %77 = vst [vmem:[%s137_s1 + $0x38] sm:$0xff] %v60_v15 }

// kernel: network_forward.10
= control target key start
LH: loop header
LB: loop body
LE: loop exit
PB: predicated region body
PF: predicated region fallthrough
CT: control target
= control target key end

     0   :  { %vm31_vm0 = vcmask 523264   ;;  %vm177_vm1 = vcmask 261120   ;;  %vm275_vm2 = vcmask 64512   ;;  %s1209_s0 = inlined_call_operand.vmem [shape: f32[64,64], index: 0, kind: input, shape index: {}]   ;;  %s1210_s1 = inlined_call_operand.vmem [shape: f32[32,64], index: 1, kind: input, shape index: {}]   ;;  %s1211_s4 = inlined_call_operand.vmem [shape: f32[32,64], index: 4, kind: output, shape index: {0}]   ;;  %s1212_s2 = inlined_call_operand.vmem [shape: f32[32,8], index: 2, kind: input, shape index: {}]   ;;  %s1213_s3 = inlined_call_operand.vmem [shape: f32[32,8], index: 3, kind: input, shape index: {}]   ;;  %s1214_s5 = inlined_call_operand.vmem [shape: f32[2,32,8], index: 5, kind: output, shape index: {1}]  }
   0x1   :  { %v26_v0 = vld [vmem:[%s1209_s0 + $0x38] sm:$0xff]  ;;  %v25_v1 = vld [vmem:[%s1209_s0 + $0x30] sm:$0xff]  ;;  %v24_v2 = vld [vmem:[%s1209_s0 + $0x28] sm:$0xff] }
   0x2   :  { %868 = vmatprep.subr.mxu0 %v26_v0  ;;  %v27_v3 = vld [vmem:[%s1210_s1] sm:$0xff]  ;;  %v22_v5 = vld [vmem:[%s1209_s0 + $0x18] sm:$0xff]  ;;  %v21_v6 = vld [vmem:[%s1209_s0 + $0x10] sm:$0xff] }
   0x3   :  { %869 = vmatpush3.msra.mxu0 %v26_v0  ;;  %884 = vmatprep.mubr.msk.f32.mxu0 %vm31_vm0, %v27_v3  ;;  %v23_v4 = vld [vmem:[%s1209_s0 + $0x20] sm:$0xff]  ;;  %v20_v7 = vld [vmem:[%s1209_s0 + $0x8] sm:$0xff]  ;;  %v29_v10 = vld [vmem:[%s1210_s1 + $0x10] sm:$0xff] }
   0x4   :  { %870 = vmatprep.subr.mxu0 %v25_v1  ;;  %v19_v8 = vld [vmem:[%s1209_s0] sm:$0xff]  ;;  %v28_v9 = vld [vmem:[%s1210_s1 + $0x8] sm:$0xff]  ;;  %v30_v11 = vld [vmem:[%s1210_s1 + $0x18] sm:$0xff]  ;;  %s984_s1 = smov 96  }
   0x5   :  { %871 = vmatpush3.msra.mxu0 %v25_v1  ;;  %v140_v20 = vld [vmem:[%s1212_s2 + $0x18] sm:$0xff]  ;;  %v139_v21 = vld [vmem:[%s1212_s2 + $0x10] sm:$0xff]  ;;  %v138_v22 = vld [vmem:[%s1212_s2 + $0x8] sm:$0xff] }
   0x6   :  { %872 = vmatprep.subr.mxu0 %v24_v2  ;;  %890 = vmatprep.subr.mxu1 %v140_v20  ;;  %v137_v23 = vld [vmem:[%s1212_s2] sm:$0xff] }
   0x7   :  { %873 = vmatpush3.msra.mxu0 %v24_v2  ;;  %891 = vmatpush3.msra.mxu1 %v140_v20 }
   0x8   :  { %874 = vmatprep.subr.mxu0 %v23_v4  ;;  %892 = vmatprep.subr.mxu1 %v139_v21 }
   0x9   :  { %875 = vmatpush3.msra.mxu0 %v23_v4  ;;  %893 = vmatpush3.msra.mxu1 %v139_v21 }
   0xa   :  { %876 = vmatprep.subr.mxu0 %v22_v5  ;;  %894 = vmatprep.subr.mxu1 %v138_v22 }
   0xb   :  { %877 = vmatpush3.msra.mxu0 %v22_v5  ;;  %895 = vmatpush3.msra.mxu1 %v138_v22 }
   0xc   :  { %878 = vmatprep.subr.mxu0 %v21_v6  ;;  %896 = vmatprep.subr.mxu1 %v137_v23 }
   0xd   :  { %879 = vmatpush3.msra.mxu0 %v21_v6  ;;  %897 = vmatpush3.msra.mxu1 %v137_v23 }
   0xe   :  { %880 = vmatprep.subr.mxu0 %v20_v7 }
   0xf   :  { %881 = vmatpush3.msra.mxu0 %v20_v7 }
  0x10   :  { %882 = vmatprep.subr.mxu0 %v19_v8 }
  0x11   :  { %883 = vmatpush3.msra.mxu0 %v19_v8 }
  0x12   :  { %885 = vmatmul.mubr.msk.f32.vlgmr.msra.gmra.mxu0 %vm31_vm0, %v28_v9  ;;  %918 = vmatprep.subr.mxu0 %v140_v20 }
  0x13   :  { %887 = vmatprep.mubr.msk.f32.mxu0 %vm31_vm0, %v29_v10  ;;  %919 = vmatpush3.msra.mxu0 %v140_v20 }
  0x14   :  { %920 = vmatprep.subr.mxu0 %v139_v21 }
  0x15   :  { %921 = vmatpush3.msra.mxu0 %v139_v21 }
  0x16   :  { %888 = vmatmul.mubr.msk.f32.gmra.mxu0 %vm31_vm0, %v30_v11  ;;  %922 = vmatprep.subr.mxu0 %v138_v22 }
  0x17   :  { %923 = vmatpush3.msra.mxu0 %v138_v22 }
  0x18   :  { %924 = vmatprep.subr.mxu0 %v137_v23 }
  0x19   :  { %925 = vmatpush3.msra.mxu0 %v137_v23 }
  0xd2   :  { %v886_v12 = vpop.f32.mrf.mxu0 }
  0xd3   :  { %v1055_v13 = vmax.f32 %v886_v12, 0.0 }
  0xd4   :  { %v110_v14 = vpop.f32.mrf.mxu0 }
  0xd5   :  { %134 = vst.msk [vmem:[%s1211_s4 + $0x8] sm:$0xff] %vm31_vm0, %v1055_v13  ;;  %v129_v15 = vmax.f32 %v110_v14, 0.0 }
  0xd6   :  { %v889_v16 = vpop.f32.mrf.mxu0 }
  0xd7   :  { %133 = vst.msk [vmem:[%s1211_s4] sm:$0xff] %vm31_vm0, %v129_v15  ;;  %v1066_v17 = vmax.f32 %v889_v16, 0.0  ;;  %465 = vrot.lane.b32.xlu0 %v129_v15, %s984_s1 }
  0xd8   :  { %v120_v18 = vpop.f32.mrf.mxu0 }
  0xd9   :  { %136 = vst.msk [vmem:[%s1211_s4 + $0x18] sm:$0xff] %vm31_vm0, %v1066_v17  ;;  %v1073_v19 = vmax.f32 %v120_v18, 0.0 }
  0xdb   :  { %135 = vst.msk [vmem:[%s1211_s4 + $0x10] sm:$0xff] %vm31_vm0, %v1073_v19  ;;  %467 = vrot.lane.b32.xlu0 %v1055_v13, %s984_s1  ;;  %469 = vrot.lane.b32.xlu1 %v1073_v19, %s984_s1 }
  0xdf   :  { %471 = vrot.lane.b32.xlu1 %v1066_v17, %s984_s1 }
  0xf9   :  { %145 = vxpose.xlu0.b32.start [1/4] (short) (narrow) %v129_v15, 32 }
  0xfd   :  { %146 = vxpose.xlu0.b32.cont [2/4] (short) (narrow) %v1055_v13, 32 }
 0x101   :  { %147 = vxpose.xlu0.b32.cont [3/4] (short) (narrow) %v1073_v19, 32 }
 0x105   :  { %148 = vxpose.xlu0.b32.end [4/4] (short) (narrow) %v1066_v17, 32 }
 0x149   :  { %v1098_v24 = vpop.permute.xlu0 %465 }
 0x14a   :  { %477 = vxpose.xlu1.b32.start [1/4] (short) (narrow) %v1098_v24, 32 }
 0x14d   :  { %v1101_v25 = vpop.permute.xlu0 %467  ;;  %v1104_v26 = vpop.permute.xlu1 %469 }
 0x14e   :  { %478 = vxpose.xlu1.b32.cont [2/4] (short) (narrow) %v1101_v25, 32 }
 0x151   :  { %v1107_v27 = vpop.permute.xlu1 %471 }
 0x152   :  { %479 = vxpose.xlu1.b32.cont [3/4] (short) (narrow) %v1104_v26, 32 }
 0x156   :  { %480 = vxpose.xlu1.b32.end [4/4] (short) (narrow) %v1107_v27, 32 }
 0x175   :  { %v161_v28 = vpop.trf.xlu0 }
 0x176   :  { %898 = vmatprep.mubr.msk.f32.mxu1 %vm177_vm1, %v161_v28 }
 0x179   :  { %v162_v29 = vpop.trf.xlu0 }
 0x17a   :  { %899 = vmatmul.mubr.msk.f32.vlgmr.msra.gmra.mxu1 %vm177_vm1, %v162_v29 }
 0x17d   :  { %v163_v30 = vpop.trf.xlu0 }
 0x17e   :  { %901 = vmatprep.mubr.msk.f32.mxu1 %vm177_vm1, %v163_v30 }
 0x181   :  { %v164_v31 = vpop.trf.xlu0 }
 0x182   :  { %902 = vmatmul.mubr.msk.f32.gmra.mxu1 %vm177_vm1, %v164_v31 }
 0x183   :  { %912 = vmatprep.mubr.msk.f32.mxu1 %vm177_vm1, %v129_v15 }
 0x1c6   :  { %v493_v32 = vpop.trf.xlu1 }
 0x1c7   :  { %926 = vmatprep.mubr.msk.f32.mxu0 %vm177_vm1, %v493_v32 }
 0x1ca   :  { %v494_v33 = vpop.trf.xlu1 }
 0x1cb   :  { %927 = vmatmul.mubr.msk.f32.vlgmr.msra.gmra.mxu0 %vm177_vm1, %v494_v33 }
 0x1ce   :  { %v495_v34 = vpop.trf.xlu1 }
 0x1cf   :  { %929 = vmatprep.mubr.msk.f32.mxu0 %vm177_vm1, %v495_v34 }
 0x1d2   :  { %v496_v35 = vpop.trf.xlu1 }
 0x1d3   :  { %930 = vmatmul.mubr.msk.f32.gmra.mxu0 %vm177_vm1, %v496_v35 }
 0x23a   :  { %v900_v36 = vpop.f32.mrf.mxu1 }
 0x23b   :  { %v279_v42 = vsel %vm275_vm2, %v900_v36, -inf }
 0x23c   :  { %v256_v37 = vpop.f32.mrf.mxu1 }
 0x23d   :  { %v276_v43 = vsel %vm275_vm2, %v256_v37, -inf }
 0x242   :  { %v903_v38 = vpop.f32.mrf.mxu1 }
 0x243   :  { %v285_v39 = vsel %vm275_vm2, %v903_v38, -inf }
 0x244   :  { %286 = vmax.xlane.f32.xlu0 %v285_v39  ;;  %v266_v40 = vpop.f32.mrf.mxu1 }
 0x245   :  { %v282_v41 = vsel %vm275_vm2, %v266_v40, -inf }
 0x246   :  { %283 = vmax.xlane.f32.xlu1 %v282_v41 }
 0x248   :  { %280 = vmax.xlane.f32.xlu0 %v279_v42 }
 0x24c   :  { %277 = vmax.xlane.f32.xlu0 %v276_v43 }
 0x28b   :  { %v928_v44 = vpop.f32.mrf.mxu0 }
 0x28c   :  { %v609_v50 = vsel %vm275_vm2, %v928_v44, -inf }
 0x28d   :  { %v587_v45 = vpop.f32.mrf.mxu0 }
 0x28e   :  { %v606_v51 = vsel %vm275_vm2, %v587_v45, -inf }
 0x293   :  { %v931_v46 = vpop.f32.mrf.mxu0 }
 0x294   :  { %v615_v47 = vsel %vm275_vm2, %v931_v46, -inf }
 0x295   :  { %616 = vmax.xlane.f32.xlu1 %v615_v47  ;;  %v597_v48 = vpop.f32.mrf.mxu0 }
 0x296   :  { %v612_v49 = vsel %vm275_vm2, %v597_v48, -inf }
 0x297   :  { %613 = vmax.xlane.f32.xlu0 %v612_v49 }
 0x299   :  { %610 = vmax.xlane.f32.xlu1 %v609_v50 }
 0x29b   :  { %607 = vmax.xlane.f32.xlu0 %v606_v51 }
 0x2cd   :  { %v287_v52 = vpop.xlane.xlu0 %286 }
 0x2ce   :  { %v291_v53 = vsub.f32 %v903_v38, %v287_v52 }
 0x2cf   :  { %v284_v54 = vpop.xlane.xlu1 %283 }
 0x2d0   :  { %v298_v55 = vmul.f32 1.442695, %v291_v53  ;;  %v290_v56 = vsub.f32 %v266_v40, %v284_v54 }
 0x2d1   :  { %v281_v57 = vpop.xlane.xlu0 %280 }
 0x2d2   :  { %948 = vpow2.f32 %v298_v55  ;;  %v296_v58 = vmul.f32 1.442695, %v290_v56  ;;  %v289_v59 = vsub.f32 %v900_v36, %v281_v57 }
 0x2d4   :  { %950 = vpow2.f32 %v296_v58  ;;  %v294_v60 = vmul.f32 1.442695, %v289_v59 }
 0x2d5   :  { %v278_v61 = vpop.xlane.xlu0 %277 }
 0x2d6   :  { %952 = vpow2.f32 %v294_v60  ;;  %v288_v62 = vsub.f32 %v256_v37, %v278_v61 }
 0x2d8   :  { %v292_v63 = vmul.f32 1.442695, %v288_v62 }
 0x2da   :  { %954 = vpow2.f32 %v292_v63 }
 0x2df   :  { %v949_v0 = vpop.eup %948 }
 0x2e0   :  { %v309_v1 = vsel %vm275_vm2, %v949_v0, 0.0 }
 0x2e1   :  { %v951_v2 = vpop.eup %950  ;;  %310 = vadd.xlane.f32.xlu1 %v309_v1 }
 0x2e2   :  { %v306_v3 = vsel %vm275_vm2, %v951_v2, 0.0 }
 0x2e3   :  { %v953_v4 = vpop.eup %952  ;;  %307 = vadd.xlane.f32.xlu0 %v306_v3 }
 0x2e4   :  { %v303_v5 = vsel %vm275_vm2, %v953_v4, 0.0 }
 0x2e5   :  { %304 = vadd.xlane.f32.xlu1 %v303_v5 }
 0x2e7   :  { %v955_v6 = vpop.eup %954 }
 0x2e8   :  { %v300_v7 = vsel %vm275_vm2, %v955_v6, 0.0 }
 0x2e9   :  { %301 = vadd.xlane.f32.xlu0 %v300_v7 }
 0x31e   :  { %v617_v8 = vpop.xlane.xlu1 %616 }
 0x31f   :  { %v621_v9 = vsub.f32 %v931_v46, %v617_v8 }
 0x320   :  { %v614_v10 = vpop.xlane.xlu0 %613 }
 0x321   :  { %v628_v11 = vmul.f32 1.442695, %v621_v9  ;;  %v620_v12 = vsub.f32 %v597_v48, %v614_v10 }
 0x322   :  { %v611_v14 = vpop.xlane.xlu1 %610 }
 0x323   :  { %956 = vpow2.f32 %v628_v11  ;;  %v626_v15 = vmul.f32 1.442695, %v620_v12  ;;  %v619_v16 = vsub.f32 %v928_v44, %v611_v14 }
 0x324   :  { %v608_v18 = vpop.xlane.xlu0 %607 }
 0x325   :  { %958 = vpow2.f32 %v626_v15  ;;  %v624_v20 = vmul.f32 1.442695, %v619_v16  ;;  %v618_v21 = vsub.f32 %v587_v45, %v608_v18  ;;  %v143_v18 = vld [vmem:[%s1213_s3 + $0x10] sm:$0xff] }
 0x327   :  { %960 = vpow2.f32 %v624_v20  ;;  %v622_v22 = vmul.f32 1.442695, %v618_v21 }
 0x329   :  { %962 = vpow2.f32 %v622_v22 }
 0x330   :  { %v957_v23 = vpop.eup %956 }
 0x331   :  { %v639_v28 = vsel %vm275_vm2, %v957_v23, 0.0 }
 0x332   :  { %v959_v29 = vpop.eup %958  ;;  %640 = vadd.xlane.f32.xlu1 %v639_v28 }
 0x333   :  { %v636_v30 = vsel %vm275_vm2, %v959_v29, 0.0 }
 0x334   :  { %v961_v31 = vpop.eup %960  ;;  %637 = vadd.xlane.f32.xlu0 %v636_v30 }
 0x335   :  { %v633_v32 = vsel %vm275_vm2, %v961_v31, 0.0 }
 0x336   :  { %v963_v33 = vpop.eup %962  ;;  %634 = vadd.xlane.f32.xlu1 %v633_v32 }
 0x337   :  { %v630_v34 = vsel %vm275_vm2, %v963_v33, 0.0 }
 0x338   :  { %631 = vadd.xlane.f32.xlu0 %v630_v34 }
 0x36a   :  { %v311_v35 = vpop.xlane.xlu1 %310 }
 0x36b   :  { %964 = vrcp.f32 %v311_v35 }
 0x36c   :  { %v308_v36 = vpop.xlane.xlu0 %307 }
 0x36d   :  { %966 = vrcp.f32 %v308_v36 }
 0x36e   :  { %v305_v37 = vpop.xlane.xlu1 %304 }
 0x36f   :  { %968 = vrcp.f32 %v305_v37 }
 0x372   :  { %v302_v38 = vpop.xlane.xlu0 %301 }
 0x373   :  { %970 = vrcp.f32 %v302_v38 }
 0x378   :  { %v965_v39 = vpop.eup %964 }
 0x379   :  { %v319_v40 = vmul.f32 %v965_v39, %v949_v0 }
 0x37a   :  { %v967_v41 = vpop.eup %966 }
 0x37b   :  { %904 = vmatprep.subr.mxu1 %v319_v40  ;;  %v318_v42 = vmul.f32 %v967_v41, %v951_v2  ;;  %v325_v52 = vsel %vm275_vm2, %v319_v40, 0.0 }
 0x37c   :  { %v969_v43 = vpop.eup %968  ;;  %905 = vmatpush3.msra.mxu1 %v319_v40 }
 0x37d   :  { %906 = vmatprep.subr.mxu1 %v318_v42  ;;  %v317_v44 = vmul.f32 %v969_v43, %v953_v4  ;;  %v323_v50 = vsel %vm275_vm2, %v318_v42, 0.0 }
 0x37e   :  { %907 = vmatpush3.msra.mxu1 %v318_v42 }
 0x37f   :  { %908 = vmatprep.subr.mxu1 %v317_v44  ;;  %v321_v47 = vsel %vm275_vm2, %v317_v44, 0.0 }
 0x380   :  { %v971_v45 = vpop.eup %970  ;;  %909 = vmatpush3.msra.mxu1 %v317_v44 }
 0x381   :  { %v316_v46 = vmul.f32 %v971_v45, %v955_v6 }
 0x383   :  { %v320_v48 = vsel %vm275_vm2, %v316_v46, 0.0  ;;  %910 = vmatprep.subr.mxu1 %v316_v46 }
 0x384   :  { %v322_v49 = vadd.f32 %v321_v47, %v320_v48  ;;  %911 = vmatpush3.msra.mxu1 %v316_v46 }
 0x385   :  { %913 = vmatmul.mubr.msk.f32.vlgmr.msra.gmra.mxu1 %vm177_vm1, %v1055_v13 }
 0x386   :  { %v324_v51 = vadd.f32 %v323_v50, %v322_v49  ;;  %915 = vmatprep.mubr.msk.f32.mxu1 %vm177_vm1, %v1073_v19 }
 0x388   :  { %v326_v53 = vadd.f32 %v325_v52, %v324_v51 }
 0x389   :  { %916 = vmatmul.mubr.msk.f32.gmra.mxu1 %vm177_vm1, %v1066_v17 }
 0x38a   :  { %940 = vmatprep.mubr.msk.f32.mxu1 %vm177_vm1, %v1098_v24  ;;  %v327_v5 = vrot.slane %v326_v53, 4 }
 0x38c   :  { %v328_v6 = vadd.f32 %v327_v5, %v326_v53 }
 0x38e   :  { %v329_v7 = vrot.slane %v328_v6, 2 }
 0x390   :  { %v330_v8 = vadd.f32 %v329_v7, %v328_v6 }
 0x392   :  { %v331_v9 = vrot.slane %v330_v8, 1 }
 0x394   :  { %v332_v10 = vadd.f32 %v331_v9, %v330_v8 }
 0x396   :  { %v432_v30 = vmul.f32 %v332_v10, %v143_v18 }
 0x3bb   :  { %v641_v54 = vpop.xlane.xlu1 %640 }
 0x3bc   :  { %972 = vrcp.f32 %v641_v54 }
 0x3bd   :  { %v638_v55 = vpop.xlane.xlu0 %637 }
 0x3be   :  { %974 = vrcp.f32 %v638_v55 }
 0x3bf   :  { %v635_v56 = vpop.xlane.xlu1 %634 }
 0x3c0   :  { %976 = vrcp.f32 %v635_v56 }
 0x3c1   :  { %v632_v13 = vpop.xlane.xlu0 %631 }
 0x3c2   :  { %978 = vrcp.f32 %v632_v13 }
 0x3c9   :  { %v973_v57 = vpop.eup %972 }
 0x3ca   :  { %v649_v58 = vmul.f32 %v973_v57, %v957_v23 }
 0x3cb   :  { %v975_v19 = vpop.eup %974 }
 0x3cc   :  { %932 = vmatprep.subr.mxu1 %v649_v58  ;;  %v648_v59 = vmul.f32 %v975_v19, %v959_v29  ;;  %v655_v3 = vsel %vm275_vm2, %v649_v58, 0.0 }
 0x3cd   :  { %v977_v60 = vpop.eup %976  ;;  %933 = vmatpush3.msra.mxu1 %v649_v58 }
 0x3ce   :  { %934 = vmatprep.subr.mxu1 %v648_v59  ;;  %v647_v17 = vmul.f32 %v977_v60, %v961_v31  ;;  %v653_v1 = vsel %vm275_vm2, %v648_v59, 0.0 }
 0x3cf   :  { %v979_v61 = vpop.eup %978  ;;  %935 = vmatpush3.msra.mxu1 %v648_v59 }
 0x3d0   :  { %936 = vmatprep.subr.mxu1 %v647_v17  ;;  %v646_v24 = vmul.f32 %v979_v61, %v963_v33  ;;  %v651_v62 = vsel %vm275_vm2, %v647_v17, 0.0 }
 0x3d1   :  { %937 = vmatpush3.msra.mxu1 %v647_v17 }
 0x3d2   :  { %v650_v63 = vsel %vm275_vm2, %v646_v24, 0.0  ;;  %938 = vmatprep.subr.mxu1 %v646_v24 }
 0x3d3   :  { %v652_v0 = vadd.f32 %v651_v62, %v650_v63  ;;  %939 = vmatpush3.msra.mxu1 %v646_v24 }
 0x3d4   :  { %941 = vmatmul.mubr.msk.f32.vlgmr.msra.gmra.mxu1 %vm177_vm1, %v1101_v25  ;;  %v142_v25 = vld [vmem:[%s1213_s3 + $0x8] sm:$0xff] }
 0x3d5   :  { %v654_v2 = vadd.f32 %v653_v1, %v652_v0  ;;  %943 = vmatprep.mubr.msk.f32.mxu1 %vm177_vm1, %v1104_v26  ;;  %v141_v26 = vld [vmem:[%s1213_s3] sm:$0xff]  ;;  %v431_v11 = vmul.f32 %v332_v10, %v142_v25 }
 0x3d6   :  { %v430_v15 = vmul.f32 %v332_v10, %v141_v26 }
 0x3d7   :  { %v656_v4 = vadd.f32 %v655_v3, %v654_v2 }
 0x3d8   :  { %944 = vmatmul.mubr.msk.f32.gmra.mxu1 %vm177_vm1, %v1107_v27  ;;  %v144_v27 = vld [vmem:[%s1213_s3 + $0x18] sm:$0xff] }
 0x3d9   :  { %v433_v21 = vmul.f32 %v332_v10, %v144_v27  ;;  %v657_v54 = vrot.slane %v656_v4, 4 }
 0x3db   :  { %v658_v55 = vadd.f32 %v657_v54, %v656_v4 }
 0x3dd   :  { %v659_v56 = vrot.slane %v658_v55, 2 }
 0x3df   :  { %v660_v13 = vadd.f32 %v659_v56, %v658_v55 }
 0x3e1   :  { %v661_v57 = vrot.slane %v660_v13, 1 }
 0x3e3   :  { %v662_v58 = vadd.f32 %v661_v57, %v660_v13 }
 0x3e5   :  { %v757_v19 = vmul.f32 %v662_v58, %v142_v25  ;;  %v756_v17 = vmul.f32 %v662_v58, %v141_v26  ;;  %v759_v62 = vmul.f32 %v662_v58, %v144_v27  ;;  %v758_v3 = vmul.f32 %v662_v58, %v143_v18 }
 0x445   :  { %v914_v12 = vpop.f32.mrf.mxu1 }
 0x446   :  { %v435_v14 = vsub.f32 %v914_v12, %v431_v11 }
 0x447   :  { %v411_v16 = vpop.f32.mrf.mxu1 }
 0x448   :  { %v434_v20 = vsub.f32 %v411_v16, %v430_v15  ;;  %v439_v23 = vmul.f32 %v435_v14, %v435_v14 }
 0x449   :  { %v917_v22 = vpop.f32.mrf.mxu1 }
 0x44a   :  { %v438_v28 = vmul.f32 %v434_v20, %v434_v20  ;;  %v437_v29 = vsub.f32 %v917_v22, %v433_v21  ;;  %v443_v34 = vsel %vm275_vm2, %v439_v23, 0.0 }
 0x44b   :  { %v421_v31 = vpop.f32.mrf.mxu1 }
 0x44c   :  { %v442_v32 = vsel %vm275_vm2, %v438_v28, 0.0  ;;  %v436_v33 = vsub.f32 %v421_v31, %v432_v30  ;;  %v441_v35 = vmul.f32 %v437_v29, %v437_v29 }
 0x44d   :  { %v444_v37 = vadd.f32 %v443_v34, %v442_v32 }
 0x44e   :  { %v440_v36 = vmul.f32 %v436_v33, %v436_v33  ;;  %v447_v40 = vsel %vm275_vm2, %v441_v35, 0.0 }
 0x450   :  { %v445_v38 = vsel %vm275_vm2, %v440_v36, 0.0 }
 0x451   :  { %v446_v39 = vadd.f32 %v445_v38, %v444_v37 }
 0x453   :  { %v448_v41 = vadd.f32 %v447_v40, %v446_v39 }
 0x455   :  { %v449_v42 = vrot.slane %v448_v41, 4 }
 0x457   :  { %v450_v43 = vadd.f32 %v449_v42, %v448_v41 }
 0x459   :  { %v451_v44 = vrot.slane %v450_v43, 2 }
 0x45b   :  { %v452_v45 = vadd.f32 %v451_v44, %v450_v43 }
 0x45d   :  { %v453_v46 = vrot.slane %v452_v45, 1 }
 0x45f   :  { %v454_v47 = vadd.f32 %v453_v46, %v452_v45 }
 0x461   :  { %v455_v48 = vmax.f32 %v454_v47, 1e-24 }
 0x463   :  { %980 = vrsqrt.f32 %v455_v48 }
 0x470   :  { %v981_v49 = vpop.eup %980 }
 0x471   :  { %v457_v50 = vmul.f32 %v981_v49, %v434_v20  ;;  %v458_v51 = vmul.f32 %v981_v49, %v435_v14  ;;  %v459_v52 = vmul.f32 %v981_v49, %v436_v33  ;;  %v460_v53 = vmul.f32 %v981_v49, %v437_v29 }
 0x473   :  { %461 = vst.msk [vmem:[%s1214_s5] sm:$0xff] %vm275_vm2, %v457_v50  ;;  %462 = vst.msk [vmem:[%s1214_s5 + $0x8] sm:$0xff] %vm275_vm2, %v458_v51 }
 0x474   :  { %463 = vst.msk [vmem:[%s1214_s5 + $0x10] sm:$0xff] %vm275_vm2, %v459_v52  ;;  %464 = vst.msk [vmem:[%s1214_s5 + $0x18] sm:$0xff] %vm275_vm2, %v460_v53 }
 0x494   :  { %v942_v59 = vpop.f32.mrf.mxu1 }
 0x495   :  { %v761_v60 = vsub.f32 %v942_v59, %v757_v19 }
 0x496   :  { %v737_v61 = vpop.f32.mrf.mxu1 }
 0x497   :  { %v760_v24 = vsub.f32 %v737_v61, %v756_v17  ;;  %v765_v0 = vmul.f32 %v761_v60, %v761_v60 }
 0x498   :  { %v945_v63 = vpop.f32.mrf.mxu1 }
 0x499   :  { %v764_v1 = vmul.f32 %v760_v24, %v760_v24  ;;  %v763_v2 = vsub.f32 %v945_v63, %v759_v62  ;;  %v769_v7 = vsel %vm275_vm2, %v765_v0, 0.0 }
 0x49a   :  { %v747_v5 = vpop.f32.mrf.mxu1 }
 0x49b   :  { %v768_v6 = vsel %vm275_vm2, %v764_v1, 0.0  ;;  %v762_v4 = vsub.f32 %v747_v5, %v758_v3  ;;  %v767_v8 = vmul.f32 %v763_v2, %v763_v2 }
 0x49c   :  { %v770_v10 = vadd.f32 %v769_v7, %v768_v6 }
 0x49d   :  { %v766_v9 = vmul.f32 %v762_v4, %v762_v4  ;;  %v773_v11 = vsel %vm275_vm2, %v767_v8, 0.0 }
 0x49f   :  { %v771_v25 = vsel %vm275_vm2, %v766_v9, 0.0 }
 0x4a0   :  { %v772_v26 = vadd.f32 %v771_v25, %v770_v10 }
 0x4a2   :  { %v774_v12 = vadd.f32 %v773_v11, %v772_v26 }
 0x4a4   :  { %v775_v27 = vrot.slane %v774_v12, 4 }
 0x4a6   :  { %v776_v14 = vadd.f32 %v775_v27, %v774_v12 }
 0x4a8   :  { %v777_v15 = vrot.slane %v776_v14, 2 }
 0x4aa   :  { %v778_v16 = vadd.f32 %v777_v15, %v776_v14 }
 0x4ac   :  { %v779_v18 = vrot.slane %v778_v16, 1 }
 0x4ae   :  { %v780_v20 = vadd.f32 %v779_v18, %v778_v16 }
 0x4b0   :  { %v781_v21 = vmax.f32 %v780_v20, 1e-24 }
 0x4b2   :  { %982 = vrsqrt.f32 %v781_v21 }
 0x4bf   :  { %v983_v22 = vpop.eup %982 }
 0x4c0   :  { %v783_v23 = vmul.f32 %v983_v22, %v760_v24  ;;  %v784_v28 = vmul.f32 %v983_v22, %v761_v60  ;;  %v785_v29 = vmul.f32 %v983_v22, %v762_v4  ;;  %v786_v30 = vmul.f32 %v983_v22, %v763_v2 }
 0x4c2   :  { %820 = vst.msk [vmem:[%s1214_s5 + $0x20] sm:$0xff] %vm275_vm2, %v783_v23  ;;  %821 = vst.msk [vmem:[%s1214_s5 + $0x28] sm:$0xff] %vm275_vm2, %v784_v28 }
 0x4c3   :  { %822 = vst.msk [vmem:[%s1214_s5 + $0x30] sm:$0xff] %vm275_vm2, %v785_v29  ;;  %823 = vst.msk [vmem:[%s1214_s5 + $0x38] sm:$0xff] %vm275_vm2, %v786_v30 }

// kernel: network_forward.11
= control target key start
LH: loop header
LB: loop body
LE: loop exit
PB: predicated region body
PF: predicated region fallthrough
CT: control target
= control target key end

     0   :  { %vm42_vm0 = vcmask 1042432   ;;  %vm29_vm1 = vcmask 285696   ;;  %s1651_s0 = inlined_call_operand.vmem [shape: f32[35,128], index: 0, kind: input, shape index: {}]   ;;  %s1652_s1 = inlined_call_operand.vmem [shape: f32[32,35], index: 1, kind: input, shape index: {}]   ;;  %s1653_s2 = inlined_call_operand.vmem [shape: f32[32,8], index: 2, kind: input, shape index: {}]   ;;  %s1654_s3 = inlined_call_operand.vmem [shape: f32[32,8], index: 3, kind: input, shape index: {}]   ;;  %s1655_s4 = inlined_call_operand.hbm [shape: f32[32,128], index: 4, kind: output, shape index: {0}]   ;;  %s1656_s5 = inlined_call_operand.vmem [shape: f32[2,32,8], index: 5, kind: output, shape index: {1}]  }
   0x1   :  { %v24_v0 = vld [vmem:[%s1651_s0 + $0x20] sm:$0x7]  ;;  %v23_v1 = vld [vmem:[%s1651_s0 + $0x18] sm:$0xff]  ;;  %v22_v3 = vld [vmem:[%s1651_s0 + $0x10] sm:$0xff] }
   0x2   :  { %1073 = vmatprep.subr.msk.mxu0 %vm42_vm0, %v24_v0  ;;  %v25_v2 = vld [vmem:[%s1652_s1] sm:$0xff] }
   0x3   :  { %1074 = vmatpush3.msk.msra.mxu0 %vm42_vm0, %v24_v0  ;;  %1083 = vmatprep.mubr.msk.f32.mxu0 %vm29_vm1, %v25_v2 }
   0x4   :  { %1075 = vmatprep.subr.mxu0 %v23_v1 }
   0x5   :  { %11 = vsyncpa [#allocation3], 0  ;;  %1076 = vmatpush3.msra.mxu0 %v23_v1  ;;  %v21_v4 = vld [vmem:[%s1651_s0 + $0x8] sm:$0xff]  ;;  %v20_v5 = vld [vmem:[%s1651_s0] sm:$0xff]  ;;  %s1268_s0 = smov 64   ;;  %vm179_vm2 = vcmask 261120  }
   0x6   :  { %1077 = vmatprep.subr.mxu0 %v22_v3  ;;  %v26_v6 = vld [vmem:[%s1652_s1 + $0x8] sm:$0xff]  ;;  %v27_v7 = vld [vmem:[%s1652_s1 + $0x10] sm:$0xff]  ;;  %v28_v8 = vld [vmem:[%s1652_s1 + $0x18] sm:$0xff]  ;;  %vm419_vm3 = vcmask 523264   ;;  %vm309_vm4 = vcmask 64512  }
   0x7   :  { %1078 = vmatpush3.msra.mxu0 %v22_v3  ;;  %v142_v17 = vld [vmem:[%s1653_s2 + $0x18] sm:$0xff]  ;;  %v141_v18 = vld [vmem:[%s1653_s2 + $0x10] sm:$0xff]  ;;  %v140_v19 = vld [vmem:[%s1653_s2 + $0x8] sm:$0xff] }
   0x8   :  { %1079 = vmatprep.subr.mxu0 %v21_v4  ;;  %1089 = vmatprep.subr.mxu1 %v142_v17  ;;  %v139_v20 = vld [vmem:[%s1653_s2] sm:$0xff]  ;;  %s1269_s2 = smov [#allocation2]  }
   0x9   :  { %1080 = vmatpush3.msra.mxu0 %v21_v4  ;;  %1090 = vmatpush3.msra.mxu1 %v142_v17  ;;  %s968_s18 = sshll.u32 %s1269_s2, 4  ;;  %s969_s18 = int_to_ptr.vmem [resolvable:$true] %s968_s18 }
   0xa   :  { %1081 = vmatprep.subr.mxu0 %v20_v5  ;;  %1091 = vmatprep.subr.mxu1 %v141_v18  ;;  %s1246_s19 = scalar_lea.vmem %s969_s18, 512  ;;  %p1251_p1 = scmp.lt.s32.totalorder %s969_s18, %s969_s18 }
   0xb   :  { %1082 = vmatpush3.msra.mxu0 %v20_v5  ;;  %1092 = vmatpush3.msra.mxu1 %v141_v18  ;;  %p1247_p0 = scmp.ne.s32.totalorder %s969_s18, %s1246_s19  ;;  %p1252_p2 = scmp.lt.s32.totalorder %s1246_s19, %s1246_s19 }
   0xc   :  { %1084 = vmatmul.mubr.msk.f32.vlgmr.msra.gmra.mxu0 %vm29_vm1, %v26_v6  ;;  %1131 = vmatprep.subr.mxu0 %v142_v17 }
   0xd   :  { %1086 = vmatprep.mubr.msk.f32.mxu0 %vm29_vm1, %v27_v7  ;;  %1132 = vmatpush3.msra.mxu0 %v142_v17  ;;  %p1253_p3 = por %p1252_p2, %p1251_p1 }
   0xe   :  { %1133 = vmatprep.subr.mxu0 %v141_v18  ;;  %1093 = vmatprep.subr.mxu1 %v140_v19 }
   0xf   :  { %1134 = vmatpush3.msra.mxu0 %v141_v18  ;;  %1094 = vmatpush3.msra.mxu1 %v140_v19  ;;  %p1254_p4 = pnand %p1253_p3, %p1247_p0 }
  0x10   :  { %1087 = vmatmul.mubr.msk.f32.gmra.mxu0 %vm29_vm1, %v28_v8  ;;  %1135 = vmatprep.subr.mxu0 %v140_v19 }
  0x11   :  { %1095 = vmatprep.subr.mxu1 %v139_v20  ;;  %1136 = vmatpush3.msra.mxu0 %v140_v19 }
  0x12   :  { %1096 = vmatpush3.msra.mxu1 %v139_v20  ;;  %1137 = vmatprep.subr.mxu0 %v139_v20 }
  0x13   :  { %1138 = vmatpush3.msra.mxu0 %v139_v20 }
  0xcc   :  { %v1085_v9 = vpop.f32.mrf.mxu0 }
  0xcd   :  { %v1333_v10 = vmax.f32 %v1085_v9, 0.0 }
  0xce   :  { %v112_v11 = vpop.f32.mrf.mxu0 }
  0xcf   :  { %136 = vst [vmem:[#allocation2 + $0x8] sm:$0xff] %v1333_v10  ;;  %v1336_v12 = vmax.f32 %v112_v11, 0.0 }
  0xd0   :  { %v1088_v13 = vpop.f32.mrf.mxu0 }
  0xd1   :  { %135 = vst [vmem:[#allocation2] sm:$0xff] %v1336_v12  ;;  %v1339_v14 = vmax.f32 %v1088_v13, 0.0  ;;  %552 = vrot.lane.b32.xlu0 %v1336_v12, %s1268_s0 }
  0xd2   :  { %v122_v15 = vpop.f32.mrf.mxu0 }
  0xd3   :  { %138 = vst [vmem:[#allocation2 + $0x18] sm:$0xff] %v1339_v14  ;;  %v1343_v16 = vmax.f32 %v122_v15, 0.0 }
  0xd5   :  { %137 = vst [vmem:[#allocation2 + $0x10] sm:$0xff] %v1343_v16  ;;  %554 = vrot.lane.b32.xlu0 %v1333_v10, %s1268_s0  ;;  %556 = vrot.lane.b32.xlu1 %v1343_v16, %s1268_s0 }
  0xd9   :  { %558 = vrot.lane.b32.xlu1 %v1339_v14, %s1268_s0 }
  0xf3   :  { %147 = vxpose.xlu0.b32.start [1/4] (short) (narrow) %v1336_v12, 64 }
  0xf7   :  { %148 = vxpose.xlu0.b32.cont [2/4] (short) (narrow) %v1333_v10, 64 }
  0xfb   :  { %149 = vxpose.xlu0.b32.cont [3/4] (short) (narrow) %v1343_v16, 64 }
  0xff   :  { %150 = vxpose.xlu0.b32.end [4/4] (short) (narrow) %v1339_v14, 64 }
 0x143   :  { %v553_v21 = vpop.permute.xlu0 %552 }
 0x144   :  { %564 = vxpose.xlu1.b32.start [1/4] (short) (narrow) %v553_v21, 64 }
 0x147   :  { %v1365_v22 = vpop.permute.xlu0 %554  ;;  %v1368_v23 = vpop.permute.xlu1 %556 }
 0x148   :  { %565 = vxpose.xlu1.b32.cont [2/4] (short) (narrow) %v1365_v22, 64 }
 0x14b   :  { %v1371_v24 = vpop.permute.xlu1 %558 }
 0x14c   :  { %566 = vxpose.xlu1.b32.cont [3/4] (short) (narrow) %v1368_v23, 64 }
 0x150   :  { %567 = vxpose.xlu1.b32.end [4/4] (short) (narrow) %v1371_v24, 64 }
 0x16f   :  { %v163_v25 = vpop.trf.xlu0 }
 0x170   :  { %1097 = vmatprep.mubr.msk.f32.mxu1 %vm179_vm2, %v163_v25 }
 0x173   :  { %v164_v26 = vpop.trf.xlu0 }
 0x174   :  { %1098 = vmatmul.mubr.msk.f32.vlgmr.msra.gmra.mxu1 %vm179_vm2, %v164_v26 }
 0x177   :  { %v165_v27 = vpop.trf.xlu0 }
 0x178   :  { %1100 = vmatprep.mubr.msk.f32.mxu1 %vm179_vm2, %v165_v27 }
 0x17b   :  { %v166_v28 = vpop.trf.xlu0 }
 0x17c   :  { %1101 = vmatmul.mubr.msk.f32.gmra.mxu1 %vm179_vm2, %v166_v28 }
 0x17f   :  { %v167_v29 = vpop.trf.xlu0 }
 0x180   :  { %1103 = vmatprep.mubr.msk.f32.mxu1 %vm179_vm2, %v167_v29 }
 0x183   :  { %v168_v30 = vpop.trf.xlu0 }
 0x184   :  { %1104 = vmatmul.mubr.msk.f32.gmra.mxu1 %vm179_vm2, %v168_v30 }
 0x187   :  { %v169_v31 = vpop.trf.xlu0 }
 0x188   :  { %1106 = vmatprep.mubr.msk.f32.mxu1 %vm179_vm2, %v169_v31 }
 0x18b   :  { %v170_v32 = vpop.trf.xlu0 }
 0x18c   :  { %1107 = vmatmul.mubr.msk.f32.gmra.mxu1 %vm179_vm2, %v170_v32 }
 0x18d   :  { %1125 = vmatprep.mubr.msk.f32.mxu1 %vm419_vm3, %v1336_v12 }
 0x1c0   :  { %v580_v33 = vpop.trf.xlu1 }
 0x1c1   :  { %1139 = vmatprep.mubr.msk.f32.mxu0 %vm179_vm2, %v580_v33 }
 0x1c4   :  { %v581_v34 = vpop.trf.xlu1 }
 0x1c5   :  { %1140 = vmatmul.mubr.msk.f32.vlgmr.msra.gmra.mxu0 %vm179_vm2, %v581_v34 }
 0x1c8   :  { %v582_v35 = vpop.trf.xlu1 }
 0x1c9   :  { %1142 = vmatprep.mubr.msk.f32.mxu0 %vm179_vm2, %v582_v35 }
 0x1cc   :  { %v583_v36 = vpop.trf.xlu1 }
 0x1cd   :  { %1143 = vmatmul.mubr.msk.f32.gmra.mxu0 %vm179_vm2, %v583_v36 }
 0x1d0   :  { %v584_v37 = vpop.trf.xlu1 }
 0x1d1   :  { %1145 = vmatprep.mubr.msk.f32.mxu0 %vm179_vm2, %v584_v37 }
 0x1d4   :  { %v585_v38 = vpop.trf.xlu1 }
 0x1d5   :  { %1146 = vmatmul.mubr.msk.f32.gmra.mxu0 %vm179_vm2, %v585_v38 }
 0x1d8   :  { %v586_v39 = vpop.trf.xlu1 }
 0x1d9   :  { %1148 = vmatprep.mubr.msk.f32.mxu0 %vm179_vm2, %v586_v39 }
 0x1dc   :  { %v587_v40 = vpop.trf.xlu1 }
 0x1dd   :  { %1149 = vmatmul.mubr.msk.f32.gmra.mxu0 %vm179_vm2, %v587_v40 }
 0x1de   :  { %1167 = vmatprep.mubr.msk.f32.mxu0 %vm419_vm3, %v553_v21 }
 0x234   :  { %v1393_v41 = vpop.f32.mrf.mxu1 }
 0x235   :  { %v313_v5 = vsel %vm309_vm4, %v1393_v41, -inf }
 0x236   :  { %v1395_v42 = vpop.f32.mrf.mxu1 }
 0x237   :  { %v310_v7 = vsel %vm309_vm4, %v1395_v42, -inf }
 0x23c   :  { %v1397_v43 = vpop.f32.mrf.mxu1 }
 0x23d   :  { %v319_v1 = vsel %vm309_vm4, %v1397_v43, -inf }
 0x23e   :  { %v1399_v44 = vpop.f32.mrf.mxu1 }
 0x23f   :  { %v316_v3 = vsel %vm309_vm4, %v1399_v44, -inf }
 0x244   :  { %v1401_v45 = vpop.f32.mrf.mxu1 }
 0x245   :  { %v325_v46 = vsel %vm309_vm4, %v1401_v45, -inf }
 0x246   :  { %326 = vmax.xlane.f32.xlu1 %v325_v46  ;;  %v1405_v47 = vpop.f32.mrf.mxu1 }
 0x247   :  { %v322_v48 = vsel %vm309_vm4, %v1405_v47, -inf }
 0x24a   :  { %323 = vmax.xlane.f32.xlu1 %v322_v48 }
 0x24c   :  { %v1409_v49 = vpop.f32.mrf.mxu1 }
 0x24d   :  { %v331_v50 = vsel %vm309_vm4, %v1409_v49, -inf }
 0x24e   :  { %332 = vmax.xlane.f32.xlu0 %v331_v50  ;;  %v1413_v51 = vpop.f32.mrf.mxu1 }
 0x24f   :  { %v328_v52 = vsel %vm309_vm4, %v1413_v51, -inf }
 0x252   :  { %329 = vmax.xlane.f32.xlu0 %v328_v52 }
 0x285   :  { %v1417_v53 = vpop.f32.mrf.mxu0 }
 0x286   :  { %v728_v6 = vsel %vm309_vm4, %v1417_v53, -inf }
 0x287   :  { %v1419_v54 = vpop.f32.mrf.mxu0 }
 0x288   :  { %v725_v8 = vsel %vm309_vm4, %v1419_v54, -inf }
 0x28d   :  { %v1144_v55 = vpop.f32.mrf.mxu0 }
 0x28e   :  { %v734_v62 = vsel %vm309_vm4, %v1144_v55, -inf }
 0x28f   :  { %v1421_v56 = vpop.f32.mrf.mxu0 }
 0x290   :  { %v731_v4 = vsel %vm309_vm4, %v1421_v56, -inf }
 0x295   :  { %v1147_v57 = vpop.f32.mrf.mxu0 }
 0x296   :  { %v740_v58 = vsel %vm309_vm4, %v1147_v57, -inf }
 0x297   :  { %741 = vmax.xlane.f32.xlu0 %v740_v58  ;;  %v706_v59 = vpop.f32.mrf.mxu0 }
 0x298   :  { %v737_v60 = vsel %vm309_vm4, %v706_v59, -inf }
 0x29b   :  { %738 = vmax.xlane.f32.xlu0 %v737_v60 }
 0x29d   :  { %v1150_v61 = vpop.f32.mrf.mxu0 }
 0x29e   :  { %v746_v63 = vsel %vm309_vm4, %v1150_v61, -inf }
 0x29f   :  { %735 = vmax.xlane.f32.xlu0 %v734_v62  ;;  %747 = vmax.xlane.f32.xlu1 %v746_v63  ;;  %v716_v0 = vpop.f32.mrf.mxu0 }
 0x2a0   :  { %v743_v2 = vsel %vm309_vm4, %v716_v0, -inf }
 0x2a3   :  { %320 = vmax.xlane.f32.xlu1 %v319_v1  ;;  %744 = vmax.xlane.f32.xlu0 %v743_v2 }
 0x2a7   :  { %317 = vmax.xlane.f32.xlu1 %v316_v3  ;;  %732 = vmax.xlane.f32.xlu0 %v731_v4 }
 0x2ab   :  { %314 = vmax.xlane.f32.xlu1 %v313_v5  ;;  %729 = vmax.xlane.f32.xlu0 %v728_v6 }
 0x2af   :  { %311 = vmax.xlane.f32.xlu1 %v310_v7  ;;  %726 = vmax.xlane.f32.xlu0 %v725_v8 }
 0x2cf   :  { %v327_v12 = vpop.xlane.xlu1 %326 }
 0x2d0   :  { %v339_v28 = vsub.f32 %v1401_v45, %v327_v12 }
 0x2d2   :  { %v352_v35 = vmul.f32 1.442695, %v339_v28 }
 0x2d3   :  { %v324_v15 = vpop.xlane.xlu1 %323 }
 0x2d4   :  { %v338_v36 = vsub.f32 %v1405_v47, %v324_v15 }
 0x2d6   :  { %v350_v40 = vmul.f32 1.442695, %v338_v36 }
 0x2d7   :  { %v333_v9 = vpop.xlane.xlu0 %332 }
 0x2d8   :  { %v341_v45 = vsub.f32 %v1409_v49, %v333_v9 }
 0x2da   :  { %v356_v52 = vmul.f32 1.442695, %v341_v45 }
 0x2db   :  { %v330_v11 = vpop.xlane.xlu0 %329 }
 0x320   :  { %v742_v13 = vpop.xlane.xlu0 %741 }
 0x321   :  { %v754_v18 = vsub.f32 %v1147_v57, %v742_v13 }
 0x323   :  { %v767_v25 = vmul.f32 1.442695, %v754_v18 }
 0x324   :  { %v739_v17 = vpop.xlane.xlu0 %738 }
 0x325   :  { %v753_v26 = vsub.f32 %v706_v59, %v739_v17 }
 0x327   :  { %v765_v32 = vmul.f32 1.442695, %v753_v26 }
 0x328   :  { %v736_v19 = vpop.xlane.xlu0 %735  ;;  %v748_v20 = vpop.xlane.xlu1 %747 }
 0x329   :  { %v752_v21 = vsub.f32 %v1144_v55, %v736_v19  ;;  %v756_v33 = vsub.f32 %v1150_v61, %v748_v20  ;;  %v340_v55 = vsub.f32 %v1413_v51, %v330_v11 }
 0x32b   :  { %v763_v27 = vmul.f32 1.442695, %v752_v21  ;;  %v771_v38 = vmul.f32 1.442695, %v756_v33  ;;  %v354_v61 = vmul.f32 1.442695, %v340_v55 }
 0x32c   :  { %v745_v29 = vpop.xlane.xlu0 %744  ;;  %v321_v30 = vpop.xlane.xlu1 %320 }
 0x32d   :  { %1178 = vpow2.f32 %v763_v27  ;;  %v337_v31 = vsub.f32 %v1397_v43, %v321_v30  ;;  %v755_v39 = vsub.f32 %v716_v0, %v745_v29 }
 0x32e   :  { %1180 = vpow2.f32 %v767_v25 }
 0x32f   :  { %v348_v34 = vmul.f32 1.442695, %v337_v31  ;;  %v769_v43 = vmul.f32 1.442695, %v755_v39 }
 0x330   :  { %v733_v37 = vpop.xlane.xlu0 %732  ;;  %v318_v46 = vpop.xlane.xlu1 %317 }
 0x331   :  { %1182 = vpow2.f32 %v348_v34  ;;  %v751_v50 = vsub.f32 %v1421_v56, %v733_v37  ;;  %v336_v56 = vsub.f32 %v1399_v44, %v318_v46 }
 0x332   :  { %1184 = vpow2.f32 %v765_v32 }
 0x333   :  { %1186 = vpow2.f32 %v352_v35  ;;  %v761_v57 = vmul.f32 1.442695, %v751_v50  ;;  %v346_v2 = vmul.f32 1.442695, %v336_v56 }
 0x334   :  { %v730_v48 = vpop.xlane.xlu0 %729  ;;  %1188 = vpow2.f32 %v771_v38  ;;  %v315_v59 = vpop.xlane.xlu1 %314 }
 0x335   :  { %1190 = vpow2.f32 %v350_v40  ;;  %v750_v58 = vsub.f32 %v1417_v53, %v730_v48  ;;  %v335_v3 = vsub.f32 %v1393_v41, %v315_v59 }
 0x336   :  { %1192 = vpow2.f32 %v769_v43 }
 0x337   :  { %1194 = vpow2.f32 %v356_v52  ;;  %v759_v51 = vmul.f32 1.442695, %v750_v58  ;;  %v344_v8 = vmul.f32 1.442695, %v335_v3 }
 0x338   :  { %v727_v62 = vpop.xlane.xlu0 %726  ;;  %1196 = vpow2.f32 %v761_v57  ;;  %v312_v5 = vpop.xlane.xlu1 %311 }
 0x339   :  { %v749_v0 = vsub.f32 %v1419_v54, %v727_v62  ;;  %1198 = vpow2.f32 %v354_v61  ;;  %v334_v9 = vsub.f32 %v1395_v42, %v312_v5 }
 0x33a   :  { %v1448_v47 = vpop.eup %1178  ;;  %1200 = vpow2.f32 %v759_v51 }
 0x33b   :  { %v782_v49 = vsel %vm309_vm4, %v1448_v47, 0.0  ;;  %v1453_v60 = vpop.eup %1180  ;;  %v757_v6 = vmul.f32 1.442695, %v749_v0  ;;  %1202 = vpow2.f32 %v346_v2  ;;  %v342_v15 = vmul.f32 1.442695, %v334_v9 }
 0x33c   :  { %783 = vadd.xlane.f32.xlu0 %v782_v49  ;;  %v788_v53 = vsel %vm309_vm4, %v1453_v60, 0.0 }
 0x33d   :  { %1204 = vpow2.f32 %v757_v6 }
 0x33e   :  { %v1456_v63 = vpop.eup %1182  ;;  %1206 = vpow2.f32 %v344_v8 }
 0x33f   :  { %v1461_v1 = vpop.eup %1184  ;;  %v367_v44 = vsel %vm309_vm4, %v1456_v63, 0.0  ;;  %1208 = vpow2.f32 %v342_v15 }
 0x340   :  { %789 = vadd.xlane.f32.xlu0 %v788_v53  ;;  %v1466_v4 = vpop.eup %1186  ;;  %368 = vadd.xlane.f32.xlu1 %v367_v44  ;;  %v785_v54 = vsel %vm309_vm4, %v1461_v1, 0.0 }
 0x341   :  { %v1470_v7 = vpop.eup %1188  ;;  %v373_v41 = vsel %vm309_vm4, %v1466_v4, 0.0 }
 0x342   :  { %v1475_v11 = vpop.eup %1190  ;;  %v794_v12 = vsel %vm309_vm4, %v1470_v7, 0.0 }
 0x343   :  { %v1479_v13 = vpop.eup %1192  ;;  %v370_v17 = vsel %vm309_vm4, %v1475_v11, 0.0 }
 0x344   :  { %786 = vadd.xlane.f32.xlu0 %v785_v54  ;;  %374 = vadd.xlane.f32.xlu1 %v373_v41  ;;  %v1483_v42 = vpop.eup %1194  ;;  %v791_v18 = vsel %vm309_vm4, %v1479_v13, 0.0 }
 0x345   :  { %v1487_v19 = vpop.eup %1196  ;;  %v379_v20 = vsel %vm309_vm4, %v1483_v42, 0.0 }
 0x346   :  { %v1491_v21 = vpop.eup %1198  ;;  %v779_v25 = vsel %vm309_vm4, %v1487_v19, 0.0 }
 0x347   :  { %v1495_v26 = vpop.eup %1200  ;;  %v376_v27 = vsel %vm309_vm4, %v1491_v21, 0.0 }
 0x348   :  { %795 = vadd.xlane.f32.xlu0 %v794_v12  ;;  %371 = vadd.xlane.f32.xlu1 %v370_v17  ;;  %v1499_v28 = vpop.eup %1202  ;;  %v776_v29 = vsel %vm309_vm4, %v1495_v26, 0.0 }
 0x349   :  { %v364_v31 = vsel %vm309_vm4, %v1499_v28, 0.0 }
 0x34a   :  { %v1503_v30 = vpop.eup %1204 }
 0x34b   :  { %v1507_v32 = vpop.eup %1206  ;;  %v773_v33 = vsel %vm309_vm4, %v1503_v30, 0.0 }
 0x34c   :  { %792 = vadd.xlane.f32.xlu0 %v791_v18  ;;  %380 = vadd.xlane.f32.xlu1 %v379_v20  ;;  %v361_v34 = vsel %vm309_vm4, %v1507_v32, 0.0  ;;  %v1513_v35 = vpop.eup %1208 }
 0x34d   :  { %v358_v36 = vsel %vm309_vm4, %v1513_v35, 0.0 }
 0x350   :  { %780 = vadd.xlane.f32.xlu0 %v779_v25  ;;  %377 = vadd.xlane.f32.xlu1 %v376_v27 }
 0x354   :  { %777 = vadd.xlane.f32.xlu0 %v776_v29  ;;  %365 = vadd.xlane.f32.xlu1 %v364_v31 }
 0x358   :  { %774 = vadd.xlane.f32.xlu0 %v773_v33  ;;  %362 = vadd.xlane.f32.xlu1 %v361_v34 }
 0x35c   :  { %359 = vadd.xlane.f32.xlu1 %v358_v36 }
 0x3c5   :  { %v784_v37 = vpop.xlane.xlu0 %783 }
 0x3c9   :  { %v790_v38 = vpop.xlane.xlu0 %789  ;;  %v369_v39 = vpop.xlane.xlu1 %368 }
 0x3cd   :  { %v787_v40 = vpop.xlane.xlu0 %786  ;;  %v375_v45 = vpop.xlane.xlu1 %374 }
 0x3d1   :  { %v796_v46 = vpop.xlane.xlu0 %795  ;;  %v372_v48 = vpop.xlane.xlu1 %371 }
 0x3d2   :  { %1210 = vrcp.f32 %v796_v46 }
 0x3d3   :  { %1212 = vrcp.f32 %v790_v38 }
 0x3d5   :  { %v793_v43 = vpop.xlane.xlu0 %792  ;;  %v381_v50 = vpop.xlane.xlu1 %380 }
 0x3d6   :  { %1214 = vrcp.f32 %v793_v43 }
 0x3d7   :  { %1216 = vrcp.f32 %v381_v50 }
 0x3d8   :  { %1218 = vrcp.f32 %v787_v40 }
 0x3d9   :  { %1220 = vrcp.f32 %v784_v37  ;;  %v781_v52 = vpop.xlane.xlu0 %780  ;;  %v378_v55 = vpop.xlane.xlu1 %377 }
 0x3da   :  { %1222 = vrcp.f32 %v375_v45 }
 0x3db   :  { %1224 = vrcp.f32 %v378_v55 }
 0x3dc   :  { %1226 = vrcp.f32 %v781_v52 }
 0x3dd   :  { %1228 = vrcp.f32 %v372_v48  ;;  %v778_v57 = vpop.xlane.xlu0 %777  ;;  %v366_v58 = vpop.xlane.xlu1 %365 }
 0x3de   :  { %1230 = vrcp.f32 %v778_v57 }
 0x3df   :  { %v1211_v59 = vpop.eup %1210  ;;  %1232 = vrcp.f32 %v369_v39 }
 0x3e0   :  { %v1518_v49 = vmul.f32 %v1211_v59, %v1470_v7  ;;  %1234 = vrcp.f32 %v366_v58  ;;  %v1213_v56 = vpop.eup %1212 }
 0x3e1   :  { %v775_v61 = vpop.xlane.xlu0 %774  ;;  %v363_v62 = vpop.xlane.xlu1 %362  ;;  %v1530_v6 = vmul.f32 %v1213_v56, %v1453_v60 }
 0x3e2   :  { %1236 = vrcp.f32 %v775_v61  ;;  %1151 = vmatprep.subr.mxu0 %v1518_v49  ;;  %v826_v43 = vsel %vm309_vm4, %v1518_v49, 0.0 }
 0x3e3   :  { %v1215_v51 = vpop.eup %1214  ;;  %1238 = vrcp.f32 %v363_v62  ;;  %1152 = vmatpush3.msra.mxu0 %v1518_v49 }
 0x3e4   :  { %v1217_v0 = vpop.eup %1216  ;;  %v1523_v53 = vmul.f32 %v1215_v51, %v1479_v13 }
 0x3e5   :  { %v1219_v2 = vpop.eup %1218  ;;  %v1526_v3 = vmul.f32 %v1217_v0, %v1483_v42  ;;  %v360_v5 = vpop.xlane.xlu1 %359 }
 0x3e6   :  { %v1221_v44 = vpop.eup %1220  ;;  %1153 = vmatprep.subr.mxu0 %v1523_v53  ;;  %1240 = vrcp.f32 %v360_v5  ;;  %v809_v8 = vmul.f32 %v1219_v2, %v1461_v1  ;;  %v824_v46 = vsel %vm309_vm4, %v1523_v53, 0.0 }
 0x3e7   :  { %v1223_v54 = vpop.eup %1222  ;;  %1109 = vmatprep.subr.mxu1 %v1526_v3  ;;  %1154 = vmatpush3.msra.mxu0 %v1523_v53  ;;  %v808_v12 = vmul.f32 %v1221_v44, %v1448_v47  ;;  %v411_v59 = vsel %vm309_vm4, %v1526_v3, 0.0 }
 0x3e8   :  { %v1225_v7 = vpop.eup %1224  ;;  %1110 = vmatpush3.msra.mxu1 %v1526_v3  ;;  %1155 = vmatprep.subr.mxu0 %v1530_v6  ;;  %v1544_v15 = vmul.f32 %v1223_v54, %v1466_v4  ;;  %v820_v37 = vsel %vm309_vm4, %v809_v8, 0.0 }
 0x3e9   :  { %v1227_v9 = vpop.eup %1226  ;;  %1156 = vmatpush3.msra.mxu0 %v1530_v6  ;;  %v1539_v41 = vmul.f32 %v1225_v7, %v1491_v21  ;;  %v818_v33 = vsel %vm309_vm4, %v808_v12, 0.0 }
 0x3ea   :  { %v1229_v60 = vpop.eup %1228  ;;  %1157 = vmatprep.subr.mxu0 %v809_v8  ;;  %v807_v1 = vmul.f32 %v1227_v9, %v1487_v19 }
 0x3eb   :  { %v1231_v13 = vpop.eup %1230  ;;  %1111 = vmatprep.subr.mxu1 %v1539_v41  ;;  %1158 = vmatpush3.msra.mxu0 %v809_v8  ;;  %v394_v42 = vmul.f32 %v1229_v60, %v1475_v11  ;;  %v409_v57 = vsel %vm309_vm4, %v1539_v41, 0.0 }
 0x3ec   :  { %v1233_v17 = vpop.eup %1232  ;;  %1112 = vmatpush3.msra.mxu1 %v1539_v41  ;;  %1159 = vmatprep.subr.mxu0 %v808_v12  ;;  %v806_v47 = vmul.f32 %v1231_v13, %v1495_v26  ;;  %v816_v31 = vsel %vm309_vm4, %v807_v1, 0.0 }
 0x3ed   :  { %1113 = vmatprep.subr.mxu1 %v1544_v15  ;;  %1160 = vmatpush3.msra.mxu0 %v808_v12  ;;  %v1235_v18 = vpop.eup %1234  ;;  %v393_v4 = vmul.f32 %v1233_v17, %v1456_v63  ;;  %v405_v48 = vsel %vm309_vm4, %v394_v42, 0.0 }
 0x3ee   :  { %1114 = vmatpush3.msra.mxu1 %v1544_v15  ;;  %1161 = vmatprep.subr.mxu0 %v807_v1  ;;  %v392_v11 = vmul.f32 %v1235_v18, %v1499_v28  ;;  %v814_v25 = vsel %vm309_vm4, %v806_v47, 0.0 }
 0x3ef   :  { %v1237_v20 = vpop.eup %1236  ;;  %1115 = vmatprep.subr.mxu1 %v394_v42  ;;  %1162 = vmatpush3.msra.mxu0 %v807_v1  ;;  %v403_v40 = vsel %vm309_vm4, %v393_v4, 0.0 }
 0x3f0   :  { %v1239_v21 = vpop.eup %1238  ;;  %1116 = vmatpush3.msra.mxu1 %v394_v42  ;;  %1163 = vmatprep.subr.mxu0 %v806_v47  ;;  %v805_v19 = vmul.f32 %v1237_v20, %v1503_v30 }
 0x3f1   :  { %1117 = vmatprep.subr.mxu1 %v393_v4  ;;  %1164 = vmatpush3.msra.mxu0 %v806_v47  ;;  %v391_v63 = vmul.f32 %v1239_v21, %v1507_v32 }
 0x3f2   :  { %1118 = vmatpush3.msra.mxu1 %v393_v4  ;;  %v813_v27 = vsel %vm309_vm4, %v805_v19, 0.0  ;;  %1165 = vmatprep.subr.mxu0 %v805_v19 }
 0x3f3   :  { %1119 = vmatprep.subr.mxu1 %v392_v11  ;;  %v815_v26 = vadd.f32 %v814_v25, %v813_v27  ;;  %1166 = vmatpush3.msra.mxu0 %v805_v19  ;;  %v1241_v29 = vpop.eup %1240  ;;  %v399_v32 = vsel %vm309_vm4, %v391_v63, 0.0 }
 0x3f4   :  { %1120 = vmatpush3.msra.mxu1 %v392_v11  ;;  %1168 = vmatmul.mubr.msk.f32.vlgmr.msra.gmra.mxu0 %vm419_vm3, %v1365_v22  ;;  %v390_v28 = vmul.f32 %v1241_v29, %v1513_v35  ;;  %v401_v22 = vsel %vm309_vm4, %v392_v11, 0.0  ;;  %v822_v35 = vsel %vm309_vm4, %v1530_v6, 0.0 }
 0x3f5   :  { %v817_v30 = vadd.f32 %v816_v31, %v815_v26  ;;  %1121 = vmatprep.subr.mxu1 %v391_v63  ;;  %1170 = vmatprep.mubr.msk.f32.mxu0 %vm419_vm3, %v1368_v23 }
 0x3f6   :  { %1122 = vmatpush3.msra.mxu1 %v391_v63  ;;  %v398_v36 = vsel %vm309_vm4, %v390_v28, 0.0 }
 0x3f7   :  { %v819_v34 = vadd.f32 %v818_v33, %v817_v30  ;;  %1123 = vmatprep.subr.mxu1 %v390_v28  ;;  %v400_v38 = vadd.f32 %v399_v32, %v398_v36 }
 0x3f8   :  { %1124 = vmatpush3.msra.mxu1 %v390_v28  ;;  %1171 = vmatmul.mubr.msk.f32.gmra.mxu0 %vm419_vm3, %v1371_v24 }
 0x3f9   :  { %v821_v23 = vadd.f32 %v820_v37, %v819_v34  ;;  %1126 = vmatmul.mubr.msk.f32.vlgmr.msra.gmra.mxu1 %vm419_vm3, %v1333_v10  ;;  %v402_v39 = vadd.f32 %v401_v22, %v400_v38 }
 0x3fa   :  { %1128 = vmatprep.mubr.msk.f32.mxu1 %vm419_vm3, %v1343_v16  ;;  %v407_v16 = vsel %vm309_vm4, %v1544_v15, 0.0 }
 0x3fb   :  { %v823_v45 = vadd.f32 %v822_v35, %v821_v23  ;;  %v404_v24 = vadd.f32 %v403_v40, %v402_v39 }
 0x3fd   :  { %1129 = vmatmul.mubr.msk.f32.gmra.mxu1 %vm419_vm3, %v1339_v14  ;;  %v825_v10 = vadd.f32 %v824_v46, %v823_v45  ;;  %v406_v50 = vadd.f32 %v405_v48, %v404_v24 }
 0x3ff   :  { %v827_v52 = vadd.f32 %v826_v43, %v825_v10  ;;  %v408_v55 = vadd.f32 %v407_v16, %v406_v50 }
 0x401   :  { %v410_v58 = vadd.f32 %v409_v57, %v408_v55 }
 0x403   :  { %v412_v61 = vadd.f32 %v411_v59, %v410_v58 }
 0x404   :  { %1257 = shalt.err (!%p1254_p4)
}
 0x405   :  { %s1270_s20 = smov 128   ;;  %s1271_s21 = smov 8   ;;  %v828_v14 = vrot.slane %v827_v52, 4  ;;  %v413_v56 = vrot.slane %v412_v61, 4  ;;  %v144_v5 = vld [vmem:[%s1654_s3 + $0x8] sm:$0xff]  ;;  %v143_v54 = vld [vmem:[%s1654_s3] sm:$0xff] }
 0x406   :  { %974 = dma.vmem_to_hbm [thread:$0]  %s969_s18, 512, %s1655_s4, [#allocation3], %s1270_s20, %s1270_s20, %s1271_s21  }
 0x407   :  { %v829_v49 = vadd.f32 %v828_v14, %v827_v52  ;;  %v414_v51 = vadd.f32 %v413_v56, %v412_v61  ;;  %v146_v41 = vld [vmem:[%s1654_s3 + $0x18] sm:$0xff]  ;;  %v145_v15 = vld [vmem:[%s1654_s3 + $0x10] sm:$0xff] }
 0x409   :  { %v830_v62 = vrot.slane %v829_v49, 2  ;;  %v415_v53 = vrot.slane %v414_v51, 2 }
 0x40b   :  { %v831_v0 = vadd.f32 %v830_v62, %v829_v49  ;;  %v416_v3 = vadd.f32 %v415_v53, %v414_v51 }
 0x40d   :  { %v832_v2 = vrot.slane %v831_v0, 1  ;;  %v417_v6 = vrot.slane %v416_v3, 1 }
 0x40f   :  { %v833_v44 = vadd.f32 %v832_v2, %v831_v0  ;;  %v418_v9 = vadd.f32 %v417_v6, %v416_v3 }
 0x411   :  { %v928_v7 = vmul.f32 %v833_v44, %v144_v5  ;;  %v927_v12 = vmul.f32 %v833_v44, %v143_v54  ;;  %v930_v1 = vmul.f32 %v833_v44, %v146_v41  ;;  %v518_v42 = vmul.f32 %v418_v9, %v144_v5 }
 0x412   :  { %v929_v19 = vmul.f32 %v833_v44, %v145_v15  ;;  %v517_v25 = vmul.f32 %v418_v9, %v143_v54  ;;  %v520_v30 = vmul.f32 %v418_v9, %v146_v41  ;;  %v519_v36 = vmul.f32 %v418_v9, %v145_v15 }
 0x4b4   :  { %v1169_v8 = vpop.f32.mrf.mxu0 }
 0x4b5   :  { %v1603_v60 = vsub.f32 %v1169_v8, %v928_v7 }
 0x4b6   :  { %v908_v13 = vpop.f32.mrf.mxu0 }
 0x4b7   :  { %v931_v17 = vsub.f32 %v908_v13, %v927_v12  ;;  %v936_v47 = vmul.f32 %v1603_v60, %v1603_v60 }
 0x4b8   :  { %v1172_v18 = vpop.f32.mrf.mxu0 }
 0x4b9   :  { %v935_v20 = vmul.f32 %v931_v17, %v931_v17  ;;  %v1127_v4 = vpop.f32.mrf.mxu1  ;;  %v934_v21 = vsub.f32 %v1172_v18, %v930_v1  ;;  %v940_v28 = vsel %vm309_vm4, %v936_v47, 0.0 }
 0x4ba   :  { %v522_v11 = vsub.f32 %v1127_v4, %v518_v42  ;;  %v918_v27 = vpop.f32.mrf.mxu0 }
 0x4bb   :  { %v939_v26 = vsel %vm309_vm4, %v935_v20, 0.0  ;;  %v498_v63 = vpop.f32.mrf.mxu1  ;;  %v933_v29 = vsub.f32 %v918_v27, %v929_v19  ;;  %v938_v33 = vmul.f32 %v934_v21, %v934_v21 }
 0x4bc   :  { %v521_v31 = vsub.f32 %v498_v63, %v517_v25  ;;  %v941_v37 = vadd.f32 %v940_v28, %v939_v26  ;;  %v526_v38 = vmul.f32 %v522_v11, %v522_v11 }
 0x4bd   :  { %v937_v34 = vmul.f32 %v933_v29, %v933_v29  ;;  %v1130_v32 = vpop.f32.mrf.mxu1  ;;  %v944_v24 = vsel %vm309_vm4, %v938_v33, 0.0 }
 0x4be   :  { %v525_v22 = vmul.f32 %v521_v31, %v521_v31  ;;  %v524_v23 = vsub.f32 %v1130_v32, %v520_v30  ;;  %v530_v48 = vsel %vm309_vm4, %v526_v38, 0.0 }
 0x4bf   :  { %v942_v35 = vsel %vm309_vm4, %v937_v34, 0.0  ;;  %v508_v39 = vpop.f32.mrf.mxu1 }
 0x4c0   :  { %v529_v40 = vsel %vm309_vm4, %v525_v22, 0.0  ;;  %v943_v45 = vadd.f32 %v942_v35, %v941_v37  ;;  %v523_v46 = vsub.f32 %v508_v39, %v519_v36  ;;  %v528_v43 = vmul.f32 %v524_v23, %v524_v23 }
 0x4c1   :  { %v531_v16 = vadd.f32 %v530_v48, %v529_v40 }
 0x4c2   :  { %v945_v10 = vadd.f32 %v944_v24, %v943_v45  ;;  %v527_v50 = vmul.f32 %v523_v46, %v523_v46  ;;  %v534_v59 = vsel %vm309_vm4, %v528_v43, 0.0 }
 0x4c4   :  { %v946_v52 = vrot.slane %v945_v10, 4  ;;  %v532_v55 = vsel %vm309_vm4, %v527_v50, 0.0 }
 0x4c5   :  { %v533_v57 = vadd.f32 %v532_v55, %v531_v16 }
 0x4c6   :  { %v947_v58 = vadd.f32 %v946_v52, %v945_v10 }
 0x4c7   :  { %v535_v61 = vadd.f32 %v534_v59, %v533_v57 }
 0x4c8   :  { %v948_v14 = vrot.slane %v947_v58, 2 }
 0x4c9   :  { %v536_v49 = vrot.slane %v535_v61, 4 }
 0x4ca   :  { %v949_v56 = vadd.f32 %v948_v14, %v947_v58 }
 0x4cb   :  { %v537_v62 = vadd.f32 %v536_v49, %v535_v61 }
 0x4cc   :  { %v950_v51 = vrot.slane %v949_v56, 1 }
 0x4cd   :  { %v538_v0 = vrot.slane %v537_v62, 2 }
 0x4ce   :  { %v951_v53 = vadd.f32 %v950_v51, %v949_v56 }
 0x4cf   :  { %v539_v2 = vadd.f32 %v538_v0, %v537_v62 }
 0x4d0   :  { %v952_v3 = vmax.f32 %v951_v53, 1e-24 }
 0x4d1   :  { %v540_v44 = vrot.slane %v539_v2, 1 }
 0x4d2   :  { %1242 = vrsqrt.f32 %v952_v3 }
 0x4d3   :  { %v541_v5 = vadd.f32 %v540_v44, %v539_v2 }
 0x4d5   :  { %v542_v6 = vmax.f32 %v541_v5, 1e-24 }
 0x4d7   :  { %1244 = vrsqrt.f32 %v542_v6 }
 0x4df   :  { %v1243_v54 = vpop.eup %1242 }
 0x4e0   :  { %v954_v7 = vmul.f32 %v1243_v54, %v931_v17  ;;  %v955_v8 = vmul.f32 %v1243_v54, %v1603_v60  ;;  %v956_v9 = vmul.f32 %v1243_v54, %v933_v29  ;;  %v957_v41 = vmul.f32 %v1243_v54, %v934_v21 }
 0x4e2   :  { %1012 = vst.msk [vmem:[%s1656_s5 + $0x20] sm:$0xff] %vm309_vm4, %v954_v7  ;;  %1013 = vst.msk [vmem:[%s1656_s5 + $0x28] sm:$0xff] %vm309_vm4, %v955_v8 }
 0x4e3   :  { %1014 = vst.msk [vmem:[%s1656_s5 + $0x30] sm:$0xff] %vm309_vm4, %v956_v9  ;;  %1015 = vst.msk [vmem:[%s1656_s5 + $0x38] sm:$0xff] %vm309_vm4, %v957_v41 }
 0x4e4   :  { %v1245_v60 = vpop.eup %1244 }
 0x4e5   :  { %v544_v12 = vmul.f32 %v1245_v60, %v521_v31  ;;  %v545_v13 = vmul.f32 %v1245_v60, %v522_v11  ;;  %v546_v15 = vmul.f32 %v1245_v60, %v523_v46  ;;  %v547_v17 = vmul.f32 %v1245_v60, %v524_v23 }
 0x4e7   :  { %548 = vst.msk [vmem:[%s1656_s5] sm:$0xff] %vm309_vm4, %v544_v12  ;;  %549 = vst.msk [vmem:[%s1656_s5 + $0x8] sm:$0xff] %vm309_vm4, %v545_v13 }
 0x4e8   :  { %550 = vst.msk [vmem:[%s1656_s5 + $0x10] sm:$0xff] %vm309_vm4, %v546_v15  ;;  %551 = vst.msk [vmem:[%s1656_s5 + $0x18] sm:$0xff] %vm309_vm4, %v547_v17 }
 0x4e9   :  { %1266 = dma.done.wait [#allocation3], 512  }
 0x4ea   :  { %1267 = vsyncadd [#allocation3], 4294966784 }
 0x4eb   :  { %982 = vsyncpa [#allocation3], 1 }

</bundles_post_ra>
